<compile_context>
chip_gen: v7x
topology: tpu7x:2x2x1
jax: 0.10.0
libtpu: 0.0.40
codegen_flags: <defaults>
</compile_context>

<pallas_src>
import jax
import jax.numpy as jnp
from jax.experimental import pallas as pl
from jax.experimental.pallas import tpu as pltpu

# SELU constants (match torch.nn.SELU), scale folded into both branches.
_SELU_ALPHA = 1.6732632423543772848170429916717
_SELU_SCALE = 1.0507009873554804934193349852946
_SELU_SCALE_ALPHA = _SELU_SCALE * _SELU_ALPHA

_SUBLANE = 16  # bf16 sublane packing


def _selu(x):
    # scale * where(x>0, x, alpha*(exp(x)-1)) with constants pre-folded.
    return jnp.where(x > 0, _SELU_SCALE * x,
                     _SELU_SCALE_ALPHA * (jnp.exp(x) - 1.0))


def _round_up(n, m):
    return ((n + m - 1) // m) * m


def _autoppi_kernel(xs_ref,
                    ew1_ref, eb1_ref, ew2_ref, eb2_ref, ew3_ref, eb3_ref,
                    dw1a_ref, dw1b_ref, db1_ref,
                    dw2_ref, db2_ref, dw3_ref, db3_ref,
                    o_ref):
    _, tb, fp = xs_ref.shape
    # (2, tb, Fp) bf16 -> (2*tb, Fp): tb is a multiple of 16 and Fp of 128,
    # so collapsing the leading (branch) dim is a layout-preserving no-op.
    xs = xs_ref[...].reshape(2 * tb, fp)

    def dense(h_bf16, w_ref, b_ref):
        # bf16 MXU matmul with f32 accumulation; bias add in f32.
        return (jnp.dot(h_bf16, w_ref[...],
                        preferred_element_type=jnp.float32) + b_ref[...])

    bf16 = jnp.bfloat16

    # Stacked Siamese encoder: one pass over 2*tb rows.
    h = _selu(dense(xs, ew1_ref, eb1_ref)).astype(bf16)
    h = _selu(dense(h, ew2_ref, eb2_ref)).astype(bf16)
    z = _selu(dense(h, ew3_ref, eb3_ref)).astype(bf16)      # (2*tb, M)

    # Sublane-aligned split back into the two branches; DecL1 on [z1 | z2]
    # is a split-K matmul (no lane-axis concat).
    z1 = z[:tb]
    z2 = z[tb:]
    h = _selu(jnp.dot(z1, dw1a_ref[...], preferred_element_type=jnp.float32)
              + jnp.dot(z2, dw1b_ref[...], preferred_element_type=jnp.float32)
              + db1_ref[...]).astype(bf16)
    h = _selu(dense(h, dw2_ref, db2_ref)).astype(bf16)
    o_ref[...] = dense(h, dw3_ref, db3_ref).astype(o_ref.dtype)


def autoppi_siamese_joint(x, params, *, feature_size, batch_tile=512):
    """Pallas forward pass of CzibulaAutoPPISiameseJoint.

    x: (B, 2*feature_size) float32
    params: dict of f32 weights [in, out] and biases [1, out].
    """
    B, two_f = x.shape
    assert two_f == 2 * feature_size
    F = feature_size
    Fp = _round_up(F, 128)        # lane-pad encoder input  (763 -> 768)
    Np = _round_up(2 * F, 128)    # lane-pad decoder output (1526 -> 1536)

    reg_size = params["ew1"].shape[1]
    min_size = params["ew3"].shape[1]

    # Batch tile: bf16-sublane aligned (16), capped at batch_tile, and split
    # into >= 2 grid steps when possible so the "parallel" axis can shard
    # across v7x's two TensorCores.
    bt = min(batch_tile, _round_up(B, _SUBLANE))
    if B > _SUBLANE:
        bt = min(bt, _round_up((B + 1) // 2, _SUBLANE))
    bt = max(bt, _SUBLANE)
    Bp = _round_up(B, bt)

    # Single fused pass over x: cast to bf16, split the two branches, stack on
    # a new leading axis, zero-pad batch rows and feature lanes.
    x_bf = x.astype(jnp.bfloat16)
    xs = jnp.stack([x_bf[:, :F], x_bf[:, F:]], axis=0)         # (2, B, F)
    xs = jnp.pad(xs, ((0, 0), (0, Bp - B), (0, Fp - F)))       # (2, Bp, Fp)

    bf16, f32 = jnp.bfloat16, jnp.float32
    ew1 = jnp.pad(params["ew1"], ((0, Fp - F), (0, 0))).astype(bf16)
    dw1 = params["dw1"]
    dw3 = jnp.pad(params["dw3"], ((0, 0), (0, Np - 2 * F))).astype(bf16)
    db3 = jnp.pad(params["db3"], ((0, 0), (0, Np - 2 * F))).astype(f32)
    weight_args = (
        ew1, params["eb1"].astype(f32),
        params["ew2"].astype(bf16), params["eb2"].astype(f32),
        params["ew3"].astype(bf16), params["eb3"].astype(f32),
        dw1[:min_size].astype(bf16), dw1[min_size:].astype(bf16),
        params["db1"].astype(f32),
        params["dw2"].astype(bf16), params["db2"].astype(f32),
        dw3, db3,
    )

    # Advisory cost estimate for XLA scheduling.
    R, M = reg_size, min_size
    flops = (2 * (2 * Bp) * (Fp * R + R * R + R * M)          # stacked encoder
             + 2 * Bp * (2 * M * R + R * R + R * Np))         # joint decoder
    transcendentals = (2 * Bp) * (2 * R + M) + Bp * 2 * R     # SELU exp count
    bytes_accessed = (2 * Bp * Fp * 2 + Bp * Np * 4
                      + sum(int(a.size) * a.dtype.itemsize for a in weight_args))
    cost = pl.CostEstimate(flops=flops, transcendentals=transcendentals,
                           bytes_accessed=bytes_accessed)

    def weight_spec(shape, single_buffer):
        if single_buffer:
            # Grid-invariant operand: single-buffer to halve its VMEM footprint.
            return pl.BlockSpec(shape, lambda i: (0, 0),
                                pipeline_mode=pl.Buffered(1))
        return pl.BlockSpec(shape, lambda i: (0, 0))

    def run(single_buffer_weights):
        in_specs = ([pl.BlockSpec((2, bt, Fp), lambda i: (0, i, 0))]
                    + [weight_spec(a.shape, single_buffer_weights)
                       for a in weight_args])
        out_specs = pl.BlockSpec((bt, Np), lambda i: (i, 0))
        return pl.pallas_call(
            _autoppi_kernel,
            out_shape=jax.ShapeDtypeStruct((Bp, Np), jnp.float32),
            grid_spec=pltpu.PrefetchScalarGridSpec(
                num_scalar_prefetch=0,
                grid=(Bp // bt,),
                in_specs=in_specs,
                out_specs=out_specs,
            ),
            compiler_params=pltpu.CompilerParams(
                dimension_semantics=("parallel",),
                vmem_limit_bytes=48 * 1024 * 1024,
            ),
            cost_estimate=cost,
        )(xs, *weight_args)

    try:
        out = run(single_buffer_weights=True)
    except Exception:  # fallback for jax builds without BlockSpec pipeline_mode
        out = run(single_buffer_weights=False)

    # Slice off padded batch rows and padded output lanes.
    return out[:B, :two_f]


def init_params(key, feature_size, reg_size, min_size):
    """Deterministic synthetic parameters (weights [in,out], biases [1,out])."""
    shapes = {
        "ew1": (feature_size, reg_size), "eb1": (1, reg_size),
        "ew2": (reg_size, reg_size),     "eb2": (1, reg_size),
        "ew3": (reg_size, min_size),     "eb3": (1, min_size),
        "dw1": (2 * min_size, reg_size), "db1": (1, reg_size),
        "dw2": (reg_size, reg_size),     "db2": (1, reg_size),
        "dw3": (reg_size, 2 * feature_size), "db3": (1, 2 * feature_size),
    }
    params = {}
    for name, shape in sorted(shapes.items()):
        key, sub = jax.random.split(key)
        fan_in = shape[0] if shape[0] > 1 else shape[1]
        params[name] = (jax.random.normal(sub, shape, jnp.float32)
                        / jnp.sqrt(jnp.float32(fan_in)))
    return params


def reference_forward_f32(x, params, feature_size):
    """Plain-JAX f32 reference matching the PyTorch module semantics."""
    x1 = x[:, :feature_size]
    x2 = x[:, feature_size:]

    def enc(h):
        h = jax.nn.selu(h @ params["ew1"] + params["eb1"])
        h = jax.nn.selu(h @ params["ew2"] + params["eb2"])
        h = jax.nn.selu(h @ params["ew3"] + params["eb3"])
        return h

    z = jnp.concatenate([enc(x1), enc(x2)], axis=1)
    h = jax.nn.selu(z @ params["dw1"] + params["db1"])
    h = jax.nn.selu(h @ params["dw2"] + params["db2"])
    return h @ params["dw3"] + params["db3"]


def reference_forward_bf16(x, params, feature_size):
    """Reference mirroring the kernel's bf16-input / f32-accumulation matmuls."""
    bf16, f32 = jnp.bfloat16, jnp.float32

    def dense(h, w, b):
        return jnp.dot(h.astype(bf16), w.astype(bf16),
                       preferred_element_type=f32) + b

    x1 = x[:, :feature_size]
    x2 = x[:, feature_size:]

    def enc(h):
        h = _selu(dense(h, params["ew1"], params["eb1"]))
        h = _selu(dense(h, params["ew2"], params["eb2"]))
        h = _selu(dense(h, params["ew3"], params["eb3"]))
        return h

    z1, z2 = enc(x1), enc(x2)
    M = params["ew3"].shape[1]
    h = _selu(jnp.dot(z1.astype(bf16), params["dw1"][:M].astype(bf16),
                      preferred_element_type=f32)
              + jnp.dot(z2.astype(bf16), params["dw1"][M:].astype(bf16),
                        preferred_element_type=f32)
              + params["db1"])
    h = _selu(dense(h, params["dw2"], params["db2"]))
    return dense(h, params["dw3"], params["db3"])


def _check(feature, reg, minsz, batch, batch_tile, key):
    kx, kp = jax.random.split(key)
    x = jax.random.normal(kx, (batch, 2 * feature), jnp.float32)
    params = init_params(kp, feature, reg, minsz)

    out = autoppi_siamese_joint(x, params, feature_size=feature,
                                batch_tile=batch_tile)
    out = jax.block_until_ready(out)
    assert out.shape == (batch, 2 * feature)

    # Tight check against a reference using the same bf16/f32 matmul scheme.
    ref_bf16 = jax.block_until_ready(reference_forward_bf16(x, params, feature))
    assert jnp.allclose(out, ref_bf16, atol=2e-3, rtol=2e-3)

    # Looser check against the pure-f32 module semantics (bf16 weight rounding).
    ref_f32 = jax.block_until_ready(reference_forward_f32(x, params, feature))
    assert jnp.allclose(out, ref_f32, atol=8e-2, rtol=8e-2)


if __name__ == "__main__":
    # Small shapes consistent with the module structure
    # (original: featureSize=763, regSize=600, minSize=300).
    key = jax.random.PRNGKey(0)
    k1, k2 = jax.random.split(key)

    # Case 1: 128-aligned features, batch not a tile multiple (padding path).
    _check(feature=128, reg=128, minsz=64, batch=40, batch_tile=32, key=k1)

    # Case 2: non-128-aligned features (exercises the 763->768 style lane
    # padding of ew1 / dw3 / db3 and the output slice-back).
    _check(feature=100, reg=96, minsz=48, batch=24, batch_tile=512, key=k2)

    print("KERNEL_OK")
</pallas_src>

<mosaic_0001>
module attributes {stable_mosaic.version = 11 : i64} {
  func.func @_autoppi_kernel(%arg0: i32, %arg1: memref<2x32x128xbf16, #tpu.memory_space<vmem>>, %arg2: memref<128x128xbf16, #tpu.memory_space<vmem>>, %arg3: memref<1x128xf32, #tpu.memory_space<vmem>>, %arg4: memref<128x128xbf16, #tpu.memory_space<vmem>>, %arg5: memref<1x128xf32, #tpu.memory_space<vmem>>, %arg6: memref<128x64xbf16, #tpu.memory_space<vmem>>, %arg7: memref<1x64xf32, #tpu.memory_space<vmem>>, %arg8: memref<64x128xbf16, #tpu.memory_space<vmem>>, %arg9: memref<64x128xbf16, #tpu.memory_space<vmem>>, %arg10: memref<1x128xf32, #tpu.memory_space<vmem>>, %arg11: memref<128x128xbf16, #tpu.memory_space<vmem>>, %arg12: memref<1x128xf32, #tpu.memory_space<vmem>>, %arg13: memref<128x256xbf16, #tpu.memory_space<vmem>>, %arg14: memref<1x256xf32, #tpu.memory_space<vmem>>, %arg15: memref<32x256xf32, #tpu.memory_space<vmem>>) attributes {dimension_semantics = [#tpu.dimension_semantics<parallel>], iteration_bounds = array<i64: 2>, scalar_prefetch = 0 : i64, scratch_operands = 0 : i64, tpu.core_type = #tpu.core_type<tc>, window_params = [{transform_indices = @transform_0, window_bounds = array<i64: 2, 32, 128>}, {pipeline_mode = #tpu.pipeline_mode<synchronous>, transform_indices = @transform_1, window_bounds = array<i64: 128, 128>}, {pipeline_mode = #tpu.pipeline_mode<synchronous>, transform_indices = @transform_2, window_bounds = array<i64: 1, 128>}, {pipeline_mode = #tpu.pipeline_mode<synchronous>, transform_indices = @transform_3, window_bounds = array<i64: 128, 128>}, {pipeline_mode = #tpu.pipeline_mode<synchronous>, transform_indices = @transform_4, window_bounds = array<i64: 1, 128>}, {pipeline_mode = #tpu.pipeline_mode<synchronous>, transform_indices = @transform_5, window_bounds = array<i64: 128, 64>}, {pipeline_mode = #tpu.pipeline_mode<synchronous>, transform_indices = @transform_6, window_bounds = array<i64: 1, 64>}, {pipeline_mode = #tpu.pipeline_mode<synchronous>, transform_indices = @transform_7, window_bounds = array<i64: 64, 128>}, {pipeline_mode = #tpu.pipeline_mode<synchronous>, transform_indices = @transform_8, window_bounds = array<i64: 64, 128>}, {pipeline_mode = #tpu.pipeline_mode<synchronous>, transform_indices = @transform_9, window_bounds = array<i64: 1, 128>}, {pipeline_mode = #tpu.pipeline_mode<synchronous>, transform_indices = @transform_10, window_bounds = array<i64: 128, 128>}, {pipeline_mode = #tpu.pipeline_mode<synchronous>, transform_indices = @transform_11, window_bounds = array<i64: 1, 128>}, {pipeline_mode = #tpu.pipeline_mode<synchronous>, transform_indices = @transform_12, window_bounds = array<i64: 128, 256>}, {pipeline_mode = #tpu.pipeline_mode<synchronous>, transform_indices = @transform_13, window_bounds = array<i64: 1, 256>}, {transform_indices = @transform_14, window_bounds = array<i64: 32, 256>}]} {
    %c0 = arith.constant 0 : index
    %c0_0 = arith.constant 0 : index
    %c0_1 = arith.constant 0 : index
    %0 = vector.load %arg1[%c0, %c0_0, %c0_1] : memref<2x32x128xbf16, #tpu.memory_space<vmem>>, vector<2x32x128xbf16>
    %1 = vector.shape_cast %0 : vector<2x32x128xbf16> to vector<64x128xbf16>
    %c0_2 = arith.constant 0 : index
    %c0_3 = arith.constant 0 : index
    %2 = vector.load %arg2[%c0_2, %c0_3] : memref<128x128xbf16, #tpu.memory_space<vmem>>, vector<128x128xbf16>
    %cst = arith.constant dense<0.000000e+00> : vector<64x128xf32>
    %3 = tpu.matmul %1, %2, %cst {dimension_numbers = #tpu.dot_dimension_numbers<[1], [0], [0], [1], [0, 0, 1, 1], [], []>} : vector<64x128xbf16>, vector<128x128xbf16>, vector<64x128xf32> -> vector<64x128xf32>
    %c0_4 = arith.constant 0 : index
    %c0_5 = arith.constant 0 : index
    %4 = vector.load %arg3[%c0_4, %c0_5] : memref<1x128xf32, #tpu.memory_space<vmem>>, vector<1x128xf32>
    %5 = vector.broadcast %4 : vector<1x128xf32> to vector<64x128xf32>
    %6 = arith.addf %3, %5 : vector<64x128xf32>
    %cst_6 = arith.constant 0.000000e+00 : f32
    %7 = vector.broadcast %cst_6 : f32 to vector<64x128xf32>
    %8 = arith.cmpf ogt, %6, %7 : vector<64x128xf32>
    %cst_7 = arith.constant 1.05070102 : f32
    %9 = vector.broadcast %cst_7 : f32 to vector<64x128xf32>
    %10 = arith.mulf %9, %6 : vector<64x128xf32>
    %11 = math.exp %6 : vector<64x128xf32>
    %cst_8 = arith.constant 1.000000e+00 : f32
    %12 = vector.broadcast %cst_8 : f32 to vector<64x128xf32>
    %13 = arith.subf %11, %12 : vector<64x128xf32>
    %cst_9 = arith.constant 1.75809932 : f32
    %14 = vector.broadcast %cst_9 : f32 to vector<64x128xf32>
    %15 = arith.mulf %14, %13 : vector<64x128xf32>
    %16 = arith.select %8, %10, %15 : vector<64x128xi1>, vector<64x128xf32>
    %17 = arith.truncf %16 : vector<64x128xf32> to vector<64x128xbf16>
    %c0_10 = arith.constant 0 : index
    %c0_11 = arith.constant 0 : index
    %18 = vector.load %arg4[%c0_10, %c0_11] : memref<128x128xbf16, #tpu.memory_space<vmem>>, vector<128x128xbf16>
    %cst_12 = arith.constant dense<0.000000e+00> : vector<64x128xf32>
    %19 = tpu.matmul %17, %18, %cst_12 {dimension_numbers = #tpu.dot_dimension_numbers<[1], [0], [0], [1], [0, 0, 1, 1], [], []>} : vector<64x128xbf16>, vector<128x128xbf16>, vector<64x128xf32> -> vector<64x128xf32>
    %c0_13 = arith.constant 0 : index
    %c0_14 = arith.constant 0 : index
    %20 = vector.load %arg5[%c0_13, %c0_14] : memref<1x128xf32, #tpu.memory_space<vmem>>, vector<1x128xf32>
    %21 = vector.broadcast %20 : vector<1x128xf32> to vector<64x128xf32>
    %22 = arith.addf %19, %21 : vector<64x128xf32>
    %cst_15 = arith.constant 0.000000e+00 : f32
    %23 = vector.broadcast %cst_15 : f32 to vector<64x128xf32>
    %24 = arith.cmpf ogt, %22, %23 : vector<64x128xf32>
    %cst_16 = arith.constant 1.05070102 : f32
    %25 = vector.broadcast %cst_16 : f32 to vector<64x128xf32>
    %26 = arith.mulf %25, %22 : vector<64x128xf32>
    %27 = math.exp %22 : vector<64x128xf32>
    %cst_17 = arith.constant 1.000000e+00 : f32
    %28 = vector.broadcast %cst_17 : f32 to vector<64x128xf32>
    %29 = arith.subf %27, %28 : vector<64x128xf32>
    %cst_18 = arith.constant 1.75809932 : f32
    %30 = vector.broadcast %cst_18 : f32 to vector<64x128xf32>
    %31 = arith.mulf %30, %29 : vector<64x128xf32>
    %32 = arith.select %24, %26, %31 : vector<64x128xi1>, vector<64x128xf32>
    %33 = arith.truncf %32 : vector<64x128xf32> to vector<64x128xbf16>
    %c0_19 = arith.constant 0 : index
    %c0_20 = arith.constant 0 : index
    %34 = vector.load %arg6[%c0_19, %c0_20] : memref<128x64xbf16, #tpu.memory_space<vmem>>, vector<128x64xbf16>
    %cst_21 = arith.constant dense<0.000000e+00> : vector<64x64xf32>
    %35 = tpu.matmul %33, %34, %cst_21 {dimension_numbers = #tpu.dot_dimension_numbers<[1], [0], [0], [1], [0, 0, 1, 1], [], []>} : vector<64x128xbf16>, vector<128x64xbf16>, vector<64x64xf32> -> vector<64x64xf32>
    %c0_22 = arith.constant 0 : index
    %c0_23 = arith.constant 0 : index
    %36 = vector.load %arg7[%c0_22, %c0_23] : memref<1x64xf32, #tpu.memory_space<vmem>>, vector<1x64xf32>
    %37 = vector.broadcast %36 : vector<1x64xf32> to vector<64x64xf32>
    %38 = arith.addf %35, %37 : vector<64x64xf32>
    %cst_24 = arith.constant 0.000000e+00 : f32
    %39 = vector.broadcast %cst_24 : f32 to vector<64x64xf32>
    %40 = arith.cmpf ogt, %38, %39 : vector<64x64xf32>
    %cst_25 = arith.constant 1.05070102 : f32
    %41 = vector.broadcast %cst_25 : f32 to vector<64x64xf32>
    %42 = arith.mulf %41, %38 : vector<64x64xf32>
    %43 = math.exp %38 : vector<64x64xf32>
    %cst_26 = arith.constant 1.000000e+00 : f32
    %44 = vector.broadcast %cst_26 : f32 to vector<64x64xf32>
    %45 = arith.subf %43, %44 : vector<64x64xf32>
    %cst_27 = arith.constant 1.75809932 : f32
    %46 = vector.broadcast %cst_27 : f32 to vector<64x64xf32>
    %47 = arith.mulf %46, %45 : vector<64x64xf32>
    %48 = arith.select %40, %42, %47 : vector<64x64xi1>, vector<64x64xf32>
    %49 = arith.truncf %48 : vector<64x64xf32> to vector<64x64xbf16>
    %50 = vector.extract_strided_slice %49 {offsets = [0, 0], sizes = [32, 64], strides = [1, 1]} : vector<64x64xbf16> to vector<32x64xbf16>
    %51 = vector.extract_strided_slice %49 {offsets = [32, 0], sizes = [32, 64], strides = [1, 1]} : vector<64x64xbf16> to vector<32x64xbf16>
    %c0_28 = arith.constant 0 : index
    %c0_29 = arith.constant 0 : index
    %52 = vector.load %arg8[%c0_28, %c0_29] : memref<64x128xbf16, #tpu.memory_space<vmem>>, vector<64x128xbf16>
    %cst_30 = arith.constant dense<0.000000e+00> : vector<32x128xf32>
    %53 = tpu.matmul %50, %52, %cst_30 {dimension_numbers = #tpu.dot_dimension_numbers<[1], [0], [0], [1], [0, 0, 1, 1], [], []>} : vector<32x64xbf16>, vector<64x128xbf16>, vector<32x128xf32> -> vector<32x128xf32>
    %c0_31 = arith.constant 0 : index
    %c0_32 = arith.constant 0 : index
    %54 = vector.load %arg9[%c0_31, %c0_32] : memref<64x128xbf16, #tpu.memory_space<vmem>>, vector<64x128xbf16>
    %cst_33 = arith.constant dense<0.000000e+00> : vector<32x128xf32>
    %55 = tpu.matmul %51, %54, %cst_33 {dimension_numbers = #tpu.dot_dimension_numbers<[1], [0], [0], [1], [0, 0, 1, 1], [], []>} : vector<32x64xbf16>, vector<64x128xbf16>, vector<32x128xf32> -> vector<32x128xf32>
    %56 = arith.addf %53, %55 : vector<32x128xf32>
    %c0_34 = arith.constant 0 : index
    %c0_35 = arith.constant 0 : index
    %57 = vector.load %arg10[%c0_34, %c0_35] : memref<1x128xf32, #tpu.memory_space<vmem>>, vector<1x128xf32>
    %58 = vector.broadcast %57 : vector<1x128xf32> to vector<32x128xf32>
    %59 = arith.addf %56, %58 : vector<32x128xf32>
    %cst_36 = arith.constant 0.000000e+00 : f32
    %60 = vector.broadcast %cst_36 : f32 to vector<32x128xf32>
    %61 = arith.cmpf ogt, %59, %60 : vector<32x128xf32>
    %cst_37 = arith.constant 1.05070102 : f32
    %62 = vector.broadcast %cst_37 : f32 to vector<32x128xf32>
    %63 = arith.mulf %62, %59 : vector<32x128xf32>
    %64 = math.exp %59 : vector<32x128xf32>
    %cst_38 = arith.constant 1.000000e+00 : f32
    %65 = vector.broadcast %cst_38 : f32 to vector<32x128xf32>
    %66 = arith.subf %64, %65 : vector<32x128xf32>
    %cst_39 = arith.constant 1.75809932 : f32
    %67 = vector.broadcast %cst_39 : f32 to vector<32x128xf32>
    %68 = arith.mulf %67, %66 : vector<32x128xf32>
    %69 = arith.select %61, %63, %68 : vector<32x128xi1>, vector<32x128xf32>
    %70 = arith.truncf %69 : vector<32x128xf32> to vector<32x128xbf16>
    %c0_40 = arith.constant 0 : index
    %c0_41 = arith.constant 0 : index
    %71 = vector.load %arg11[%c0_40, %c0_41] : memref<128x128xbf16, #tpu.memory_space<vmem>>, vector<128x128xbf16>
    %cst_42 = arith.constant dense<0.000000e+00> : vector<32x128xf32>
    %72 = tpu.matmul %70, %71, %cst_42 {dimension_numbers = #tpu.dot_dimension_numbers<[1], [0], [0], [1], [0, 0, 1, 1], [], []>} : vector<32x128xbf16>, vector<128x128xbf16>, vector<32x128xf32> -> vector<32x128xf32>
    %c0_43 = arith.constant 0 : index
    %c0_44 = arith.constant 0 : index
    %73 = vector.load %arg12[%c0_43, %c0_44] : memref<1x128xf32, #tpu.memory_space<vmem>>, vector<1x128xf32>
    %74 = vector.broadcast %73 : vector<1x128xf32> to vector<32x128xf32>
    %75 = arith.addf %72, %74 : vector<32x128xf32>
    %cst_45 = arith.constant 0.000000e+00 : f32
    %76 = vector.broadcast %cst_45 : f32 to vector<32x128xf32>
    %77 = arith.cmpf ogt, %75, %76 : vector<32x128xf32>
    %cst_46 = arith.constant 1.05070102 : f32
    %78 = vector.broadcast %cst_46 : f32 to vector<32x128xf32>
    %79 = arith.mulf %78, %75 : vector<32x128xf32>
    %80 = math.exp %75 : vector<32x128xf32>
    %cst_47 = arith.constant 1.000000e+00 : f32
    %81 = vector.broadcast %cst_47 : f32 to vector<32x128xf32>
    %82 = arith.subf %80, %81 : vector<32x128xf32>
    %cst_48 = arith.constant 1.75809932 : f32
    %83 = vector.broadcast %cst_48 : f32 to vector<32x128xf32>
    %84 = arith.mulf %83, %82 : vector<32x128xf32>
    %85 = arith.select %77, %79, %84 : vector<32x128xi1>, vector<32x128xf32>
    %86 = arith.truncf %85 : vector<32x128xf32> to vector<32x128xbf16>
    %c0_49 = arith.constant 0 : index
    %c0_50 = arith.constant 0 : index
    %87 = vector.load %arg13[%c0_49, %c0_50] : memref<128x256xbf16, #tpu.memory_space<vmem>>, vector<128x256xbf16>
    %cst_51 = arith.constant dense<0.000000e+00> : vector<32x256xf32>
    %88 = tpu.matmul %86, %87, %cst_51 {dimension_numbers = #tpu.dot_dimension_numbers<[1], [0], [0], [1], [0, 0, 1, 1], [], []>} : vector<32x128xbf16>, vector<128x256xbf16>, vector<32x256xf32> -> vector<32x256xf32>
    %c0_52 = arith.constant 0 : index
    %c0_53 = arith.constant 0 : index
    %89 = vector.load %arg14[%c0_52, %c0_53] : memref<1x256xf32, #tpu.memory_space<vmem>>, vector<1x256xf32>
    %90 = vector.broadcast %89 : vector<1x256xf32> to vector<32x256xf32>
    %91 = arith.addf %88, %90 : vector<32x256xf32>
    %c0_54 = arith.constant 0 : index
    %c0_55 = arith.constant 0 : index
    %92 = vector.load %arg15[%c0_54, %c0_55] : memref<32x256xf32, #tpu.memory_space<vmem>>, vector<32x256xf32>
    tpu.vector_store %arg15[%c0_54, %c0_55], %91 {strides = array<i32>} : memref<32x256xf32, #tpu.memory_space<vmem>>, vector<32x256xf32>,
    return
  }
  func.func @transform_0(%arg0: i32) -> (i32, i32, i32) {
    %c0_i32 = arith.constant 0 : i32
    %c0_i32_0 = arith.constant 0 : i32
    %c0_i32_1 = arith.constant 0 : i32
    return %c0_i32, %arg0, %c0_i32_0 : i32, i32, i32
  }
  func.func @transform_1(%arg0: i32) -> (i32, i32) {
    %c0_i32 = arith.constant 0 : i32
    %c0_i32_0 = arith.constant 0 : i32
    %c0_i32_1 = arith.constant 0 : i32
    return %c0_i32, %c0_i32_0 : i32, i32
  }
  func.func @transform_2(%arg0: i32) -> (i32, i32) {
    %c0_i32 = arith.constant 0 : i32
    %c0_i32_0 = arith.constant 0 : i32
    %c0_i32_1 = arith.constant 0 : i32
    return %c0_i32, %c0_i32_0 : i32, i32
  }
  func.func @transform_3(%arg0: i32) -> (i32, i32) {
    %c0_i32 = arith.constant 0 : i32
    %c0_i32_0 = arith.constant 0 : i32
    %c0_i32_1 = arith.constant 0 : i32
    return %c0_i32, %c0_i32_0 : i32, i32
  }
  func.func @transform_4(%arg0: i32) -> (i32, i32) {
    %c0_i32 = arith.constant 0 : i32
    %c0_i32_0 = arith.constant 0 : i32
    %c0_i32_1 = arith.constant 0 : i32
    return %c0_i32, %c0_i32_0 : i32, i32
  }
  func.func @transform_5(%arg0: i32) -> (i32, i32) {
    %c0_i32 = arith.constant 0 : i32
    %c0_i32_0 = arith.constant 0 : i32
    %c0_i32_1 = arith.constant 0 : i32
    return %c0_i32, %c0_i32_0 : i32, i32
  }
  func.func @transform_6(%arg0: i32) -> (i32, i32) {
    %c0_i32 = arith.constant 0 : i32
    %c0_i32_0 = arith.constant 0 : i32
    %c0_i32_1 = arith.constant 0 : i32
    return %c0_i32, %c0_i32_0 : i32, i32
  }
  func.func @transform_7(%arg0: i32) -> (i32, i32) {
    %c0_i32 = arith.constant 0 : i32
    %c0_i32_0 = arith.constant 0 : i32
    %c0_i32_1 = arith.constant 0 : i32
    return %c0_i32, %c0_i32_0 : i32, i32
  }
  func.func @transform_8(%arg0: i32) -> (i32, i32) {
    %c0_i32 = arith.constant 0 : i32
    %c0_i32_0 = arith.constant 0 : i32
    %c0_i32_1 = arith.constant 0 : i32
    return %c0_i32, %c0_i32_0 : i32, i32
  }
  func.func @transform_9(%arg0: i32) -> (i32, i32) {
    %c0_i32 = arith.constant 0 : i32
    %c0_i32_0 = arith.constant 0 : i32
    %c0_i32_1 = arith.constant 0 : i32
    return %c0_i32, %c0_i32_0 : i32, i32
  }
  func.func @transform_10(%arg0: i32) -> (i32, i32) {
    %c0_i32 = arith.constant 0 : i32
    %c0_i32_0 = arith.constant 0 : i32
    %c0_i32_1 = arith.constant 0 : i32
    return %c0_i32, %c0_i32_0 : i32, i32
  }
  func.func @transform_11(%arg0: i32) -> (i32, i32) {
    %c0_i32 = arith.constant 0 : i32
    %c0_i32_0 = arith.constant 0 : i32
    %c0_i32_1 = arith.constant 0 : i32
    return %c0_i32, %c0_i32_0 : i32, i32
  }
  func.func @transform_12(%arg0: i32) -> (i32, i32) {
    %c0_i32 = arith.constant 0 : i32
    %c0_i32_0 = arith.constant 0 : i32
    %c0_i32_1 = arith.constant 0 : i32
    return %c0_i32, %c0_i32_0 : i32, i32
  }
  func.func @transform_13(%arg0: i32) -> (i32, i32) {
    %c0_i32 = arith.constant 0 : i32
    %c0_i32_0 = arith.constant 0 : i32
    %c0_i32_1 = arith.constant 0 : i32
    return %c0_i32, %c0_i32_0 : i32, i32
  }
  func.func @transform_14(%arg0: i32) -> (i32, i32) {
    %c0_i32 = arith.constant 0 : i32
    %c0_i32_0 = arith.constant 0 : i32
    return %arg0, %c0_i32 : i32, i32
  }
}

module attributes {stable_mosaic.version = 11 : i64} {
  func.func @_autoppi_kernel(%arg0: i32, %arg1: memref<2x32x128xbf16, #tpu.memory_space<vmem>>, %arg2: memref<128x128xbf16, #tpu.memory_space<vmem>>, %arg3: memref<1x128xf32, #tpu.memory_space<vmem>>, %arg4: memref<128x128xbf16, #tpu.memory_space<vmem>>, %arg5: memref<1x128xf32, #tpu.memory_space<vmem>>, %arg6: memref<128x64xbf16, #tpu.memory_space<vmem>>, %arg7: memref<1x64xf32, #tpu.memory_space<vmem>>, %arg8: memref<64x128xbf16, #tpu.memory_space<vmem>>, %arg9: memref<64x128xbf16, #tpu.memory_space<vmem>>, %arg10: memref<1x128xf32, #tpu.memory_space<vmem>>, %arg11: memref<128x128xbf16, #tpu.memory_space<vmem>>, %arg12: memref<1x128xf32, #tpu.memory_space<vmem>>, %arg13: memref<128x256xbf16, #tpu.memory_space<vmem>>, %arg14: memref<1x256xf32, #tpu.memory_space<vmem>>, %arg15: memref<32x256xf32, #tpu.memory_space<vmem>>) attributes {dimension_semantics = [#tpu.dimension_semantics<parallel>], iteration_bounds = array<i64: 2>, scalar_prefetch = 0 : i64, scratch_operands = 0 : i64, tpu.core_type = #tpu.core_type<tc>, window_params = [{transform_indices = @transform_0, window_bounds = array<i64: 2, 32, 128>}, {pipeline_mode = #tpu.pipeline_mode<synchronous>, transform_indices = @transform_1, window_bounds = array<i64: 128, 128>}, {pipeline_mode = #tpu.pipeline_mode<synchronous>, transform_indices = @transform_2, window_bounds = array<i64: 1, 128>}, {pipeline_mode = #tpu.pipeline_mode<synchronous>, transform_indices = @transform_3, window_bounds = array<i64: 128, 128>}, {pipeline_mode = #tpu.pipeline_mode<synchronous>, transform_indices = @transform_4, window_bounds = array<i64: 1, 128>}, {pipeline_mode = #tpu.pipeline_mode<synchronous>, transform_indices = @transform_5, window_bounds = array<i64: 128, 64>}, {pipeline_mode = #tpu.pipeline_mode<synchronous>, transform_indices = @transform_6, window_bounds = array<i64: 1, 64>}, {pipeline_mode = #tpu.pipeline_mode<synchronous>, transform_indices = @transform_7, window_bounds = array<i64: 64, 128>}, {pipeline_mode = #tpu.pipeline_mode<synchronous>, transform_indices = @transform_8, window_bounds = array<i64: 64, 128>}, {pipeline_mode = #tpu.pipeline_mode<synchronous>, transform_indices = @transform_9, window_bounds = array<i64: 1, 128>}, {pipeline_mode = #tpu.pipeline_mode<synchronous>, transform_indices = @transform_10, window_bounds = array<i64: 128, 128>}, {pipeline_mode = #tpu.pipeline_mode<synchronous>, transform_indices = @transform_11, window_bounds = array<i64: 1, 128>}, {pipeline_mode = #tpu.pipeline_mode<synchronous>, transform_indices = @transform_12, window_bounds = array<i64: 128, 256>}, {pipeline_mode = #tpu.pipeline_mode<synchronous>, transform_indices = @transform_13, window_bounds = array<i64: 1, 256>}, {transform_indices = @transform_14, window_bounds = array<i64: 32, 256>}]} {
    %c0 = arith.constant 0 : index
    %c0_0 = arith.constant 0 : index
    %c0_1 = arith.constant 0 : index
    %0 = vector.load %arg1[%c0, %c0_0, %c0_1] : memref<2x32x128xbf16, #tpu.memory_space<vmem>>, vector<2x32x128xbf16>
    %1 = vector.shape_cast %0 : vector<2x32x128xbf16> to vector<64x128xbf16>
    %c0_2 = arith.constant 0 : index
    %c0_3 = arith.constant 0 : index
    %2 = vector.load %arg2[%c0_2, %c0_3] : memref<128x128xbf16, #tpu.memory_space<vmem>>, vector<128x128xbf16>
    %cst = arith.constant dense<0.000000e+00> : vector<64x128xf32>
    %3 = tpu.matmul %1, %2, %cst {dimension_numbers = #tpu.dot_dimension_numbers<[1], [0], [0], [1], [0, 0, 1, 1], [], []>} : vector<64x128xbf16>, vector<128x128xbf16>, vector<64x128xf32> -> vector<64x128xf32>
    %c0_4 = arith.constant 0 : index
    %c0_5 = arith.constant 0 : index
    %4 = vector.load %arg3[%c0_4, %c0_5] : memref<1x128xf32, #tpu.memory_space<vmem>>, vector<1x128xf32>
    %5 = vector.broadcast %4 : vector<1x128xf32> to vector<64x128xf32>
    %6 = arith.addf %3, %5 : vector<64x128xf32>
    %cst_6 = arith.constant 0.000000e+00 : f32
    %7 = vector.broadcast %cst_6 : f32 to vector<64x128xf32>
    %8 = arith.cmpf ogt, %6, %7 : vector<64x128xf32>
    %cst_7 = arith.constant 1.05070102 : f32
    %9 = vector.broadcast %cst_7 : f32 to vector<64x128xf32>
    %10 = arith.mulf %9, %6 : vector<64x128xf32>
    %11 = math.exp %6 : vector<64x128xf32>
    %cst_8 = arith.constant 1.000000e+00 : f32
    %12 = vector.broadcast %cst_8 : f32 to vector<64x128xf32>
    %13 = arith.subf %11, %12 : vector<64x128xf32>
    %cst_9 = arith.constant 1.75809932 : f32
    %14 = vector.broadcast %cst_9 : f32 to vector<64x128xf32>
    %15 = arith.mulf %14, %13 : vector<64x128xf32>
    %16 = arith.select %8, %10, %15 : vector<64x128xi1>, vector<64x128xf32>
    %17 = arith.truncf %16 : vector<64x128xf32> to vector<64x128xbf16>
    %c0_10 = arith.constant 0 : index
    %c0_11 = arith.constant 0 : index
    %18 = vector.load %arg4[%c0_10, %c0_11] : memref<128x128xbf16, #tpu.memory_space<vmem>>, vector<128x128xbf16>
    %cst_12 = arith.constant dense<0.000000e+00> : vector<64x128xf32>
    %19 = tpu.matmul %17, %18, %cst_12 {dimension_numbers = #tpu.dot_dimension_numbers<[1], [0], [0], [1], [0, 0, 1, 1], [], []>} : vector<64x128xbf16>, vector<128x128xbf16>, vector<64x128xf32> -> vector<64x128xf32>
    %c0_13 = arith.constant 0 : index
    %c0_14 = arith.constant 0 : index
    %20 = vector.load %arg5[%c0_13, %c0_14] : memref<1x128xf32, #tpu.memory_space<vmem>>, vector<1x128xf32>
    %21 = vector.broadcast %20 : vector<1x128xf32> to vector<64x128xf32>
    %22 = arith.addf %19, %21 : vector<64x128xf32>
    %cst_15 = arith.constant 0.000000e+00 : f32
    %23 = vector.broadcast %cst_15 : f32 to vector<64x128xf32>
    %24 = arith.cmpf ogt, %22, %23 : vector<64x128xf32>
    %cst_16 = arith.constant 1.05070102 : f32
    %25 = vector.broadcast %cst_16 : f32 to vector<64x128xf32>
    %26 = arith.mulf %25, %22 : vector<64x128xf32>
    %27 = math.exp %22 : vector<64x128xf32>
    %cst_17 = arith.constant 1.000000e+00 : f32
    %28 = vector.broadcast %cst_17 : f32 to vector<64x128xf32>
    %29 = arith.subf %27, %28 : vector<64x128xf32>
    %cst_18 = arith.constant 1.75809932 : f32
    %30 = vector.broadcast %cst_18 : f32 to vector<64x128xf32>
    %31 = arith.mulf %30, %29 : vector<64x128xf32>
    %32 = arith.select %24, %26, %31 : vector<64x128xi1>, vector<64x128xf32>
    %33 = arith.truncf %32 : vector<64x128xf32> to vector<64x128xbf16>
    %c0_19 = arith.constant 0 : index
    %c0_20 = arith.constant 0 : index
    %34 = vector.load %arg6[%c0_19, %c0_20] : memref<128x64xbf16, #tpu.memory_space<vmem>>, vector<128x64xbf16>
    %cst_21 = arith.constant dense<0.000000e+00> : vector<64x64xf32>
    %35 = tpu.matmul %33, %34, %cst_21 {dimension_numbers = #tpu.dot_dimension_numbers<[1], [0], [0], [1], [0, 0, 1, 1], [], []>} : vector<64x128xbf16>, vector<128x64xbf16>, vector<64x64xf32> -> vector<64x64xf32>
    %c0_22 = arith.constant 0 : index
    %c0_23 = arith.constant 0 : index
    %36 = vector.load %arg7[%c0_22, %c0_23] : memref<1x64xf32, #tpu.memory_space<vmem>>, vector<1x64xf32>
    %37 = vector.broadcast %36 : vector<1x64xf32> to vector<64x64xf32>
    %38 = arith.addf %35, %37 : vector<64x64xf32>
    %cst_24 = arith.constant 0.000000e+00 : f32
    %39 = vector.broadcast %cst_24 : f32 to vector<64x64xf32>
    %40 = arith.cmpf ogt, %38, %39 : vector<64x64xf32>
    %cst_25 = arith.constant 1.05070102 : f32
    %41 = vector.broadcast %cst_25 : f32 to vector<64x64xf32>
    %42 = arith.mulf %41, %38 : vector<64x64xf32>
    %43 = math.exp %38 : vector<64x64xf32>
    %cst_26 = arith.constant 1.000000e+00 : f32
    %44 = vector.broadcast %cst_26 : f32 to vector<64x64xf32>
    %45 = arith.subf %43, %44 : vector<64x64xf32>
    %cst_27 = arith.constant 1.75809932 : f32
    %46 = vector.broadcast %cst_27 : f32 to vector<64x64xf32>
    %47 = arith.mulf %46, %45 : vector<64x64xf32>
    %48 = arith.select %40, %42, %47 : vector<64x64xi1>, vector<64x64xf32>
    %49 = arith.truncf %48 : vector<64x64xf32> to vector<64x64xbf16>
    %50 = vector.extract_strided_slice %49 {offsets = [0, 0], sizes = [32, 64], strides = [1, 1]} : vector<64x64xbf16> to vector<32x64xbf16>
    %51 = vector.extract_strided_slice %49 {offsets = [32, 0], sizes = [32, 64], strides = [1, 1]} : vector<64x64xbf16> to vector<32x64xbf16>
    %c0_28 = arith.constant 0 : index
    %c0_29 = arith.constant 0 : index
    %52 = vector.load %arg8[%c0_28, %c0_29] : memref<64x128xbf16, #tpu.memory_space<vmem>>, vector<64x128xbf16>
    %cst_30 = arith.constant dense<0.000000e+00> : vector<32x128xf32>
    %53 = tpu.matmul %50, %52, %cst_30 {dimension_numbers = #tpu.dot_dimension_numbers<[1], [0], [0], [1], [0, 0, 1, 1], [], []>} : vector<32x64xbf16>, vector<64x128xbf16>, vector<32x128xf32> -> vector<32x128xf32>
    %c0_31 = arith.constant 0 : index
    %c0_32 = arith.constant 0 : index
    %54 = vector.load %arg9[%c0_31, %c0_32] : memref<64x128xbf16, #tpu.memory_space<vmem>>, vector<64x128xbf16>
    %cst_33 = arith.constant dense<0.000000e+00> : vector<32x128xf32>
    %55 = tpu.matmul %51, %54, %cst_33 {dimension_numbers = #tpu.dot_dimension_numbers<[1], [0], [0], [1], [0, 0, 1, 1], [], []>} : vector<32x64xbf16>, vector<64x128xbf16>, vector<32x128xf32> -> vector<32x128xf32>
    %56 = arith.addf %53, %55 : vector<32x128xf32>
    %c0_34 = arith.constant 0 : index
    %c0_35 = arith.constant 0 : index
    %57 = vector.load %arg10[%c0_34, %c0_35] : memref<1x128xf32, #tpu.memory_space<vmem>>, vector<1x128xf32>
    %58 = vector.broadcast %57 : vector<1x128xf32> to vector<32x128xf32>
    %59 = arith.addf %56, %58 : vector<32x128xf32>
    %cst_36 = arith.constant 0.000000e+00 : f32
    %60 = vector.broadcast %cst_36 : f32 to vector<32x128xf32>
    %61 = arith.cmpf ogt, %59, %60 : vector<32x128xf32>
    %cst_37 = arith.constant 1.05070102 : f32
    %62 = vector.broadcast %cst_37 : f32 to vector<32x128xf32>
    %63 = arith.mulf %62, %59 : vector<32x128xf32>
    %64 = math.exp %59 : vector<32x128xf32>
    %cst_38 = arith.constant 1.000000e+00 : f32
    %65 = vector.broadcast %cst_38 : f32 to vector<32x128xf32>
    %66 = arith.subf %64, %65 : vector<32x128xf32>
    %cst_39 = arith.constant 1.75809932 : f32
    %67 = vector.broadcast %cst_39 : f32 to vector<32x128xf32>
    %68 = arith.mulf %67, %66 : vector<32x128xf32>
    %69 = arith.select %61, %63, %68 : vector<32x128xi1>, vector<32x128xf32>
    %70 = arith.truncf %69 : vector<32x128xf32> to vector<32x128xbf16>
    %c0_40 = arith.constant 0 : index
    %c0_41 = arith.constant 0 : index
    %71 = vector.load %arg11[%c0_40, %c0_41] : memref<128x128xbf16, #tpu.memory_space<vmem>>, vector<128x128xbf16>
    %cst_42 = arith.constant dense<0.000000e+00> : vector<32x128xf32>
    %72 = tpu.matmul %70, %71, %cst_42 {dimension_numbers = #tpu.dot_dimension_numbers<[1], [0], [0], [1], [0, 0, 1, 1], [], []>} : vector<32x128xbf16>, vector<128x128xbf16>, vector<32x128xf32> -> vector<32x128xf32>
    %c0_43 = arith.constant 0 : index
    %c0_44 = arith.constant 0 : index
    %73 = vector.load %arg12[%c0_43, %c0_44] : memref<1x128xf32, #tpu.memory_space<vmem>>, vector<1x128xf32>
    %74 = vector.broadcast %73 : vector<1x128xf32> to vector<32x128xf32>
    %75 = arith.addf %72, %74 : vector<32x128xf32>
    %cst_45 = arith.constant 0.000000e+00 : f32
    %76 = vector.broadcast %cst_45 : f32 to vector<32x128xf32>
    %77 = arith.cmpf ogt, %75, %76 : vector<32x128xf32>
    %cst_46 = arith.constant 1.05070102 : f32
    %78 = vector.broadcast %cst_46 : f32 to vector<32x128xf32>
    %79 = arith.mulf %78, %75 : vector<32x128xf32>
    %80 = math.exp %75 : vector<32x128xf32>
    %cst_47 = arith.constant 1.000000e+00 : f32
    %81 = vector.broadcast %cst_47 : f32 to vector<32x128xf32>
    %82 = arith.subf %80, %81 : vector<32x128xf32>
    %cst_48 = arith.constant 1.75809932 : f32
    %83 = vector.broadcast %cst_48 : f32 to vector<32x128xf32>
    %84 = arith.mulf %83, %82 : vector<32x128xf32>
    %85 = arith.select %77, %79, %84 : vector<32x128xi1>, vector<32x128xf32>
    %86 = arith.truncf %85 : vector<32x128xf32> to vector<32x128xbf16>
    %c0_49 = arith.constant 0 : index
    %c0_50 = arith.constant 0 : index
    %87 = vector.load %arg13[%c0_49, %c0_50] : memref<128x256xbf16, #tpu.memory_space<vmem>>, vector<128x256xbf16>
    %cst_51 = arith.constant dense<0.000000e+00> : vector<32x256xf32>
    %88 = tpu.matmul %86, %87, %cst_51 {dimension_numbers = #tpu.dot_dimension_numbers<[1], [0], [0], [1], [0, 0, 1, 1], [], []>} : vector<32x128xbf16>, vector<128x256xbf16>, vector<32x256xf32> -> vector<32x256xf32>
    %c0_52 = arith.constant 0 : index
    %c0_53 = arith.constant 0 : index
    %89 = vector.load %arg14[%c0_52, %c0_53] : memref<1x256xf32, #tpu.memory_space<vmem>>, vector<1x256xf32>
    %90 = vector.broadcast %89 : vector<1x256xf32> to vector<32x256xf32>
    %91 = arith.addf %88, %90 : vector<32x256xf32>
    %c0_54 = arith.constant 0 : index
    %c0_55 = arith.constant 0 : index
    %92 = vector.load %arg15[%c0_54, %c0_55] : memref<32x256xf32, #tpu.memory_space<vmem>>, vector<32x256xf32>
    tpu.vector_store %arg15[%c0_54, %c0_55], %91 {strides = array<i32>} : memref<32x256xf32, #tpu.memory_space<vmem>>, vector<32x256xf32>,
    return
  }
  func.func @transform_0(%arg0: i32) -> (i32, i32, i32) {
    %c0_i32 = arith.constant 0 : i32
    %c0_i32_0 = arith.constant 0 : i32
    %c0_i32_1 = arith.constant 0 : i32
    return %c0_i32, %arg0, %c0_i32_0 : i32, i32, i32
  }
  func.func @transform_1(%arg0: i32) -> (i32, i32) {
    %c0_i32 = arith.constant 0 : i32
    %c0_i32_0 = arith.constant 0 : i32
    %c0_i32_1 = arith.constant 0 : i32
    return %c0_i32, %c0_i32_0 : i32, i32
  }
  func.func @transform_2(%arg0: i32) -> (i32, i32) {
    %c0_i32 = arith.constant 0 : i32
    %c0_i32_0 = arith.constant 0 : i32
    %c0_i32_1 = arith.constant 0 : i32
    return %c0_i32, %c0_i32_0 : i32, i32
  }
  func.func @transform_3(%arg0: i32) -> (i32, i32) {
    %c0_i32 = arith.constant 0 : i32
    %c0_i32_0 = arith.constant 0 : i32
    %c0_i32_1 = arith.constant 0 : i32
    return %c0_i32, %c0_i32_0 : i32, i32
  }
  func.func @transform_4(%arg0: i32) -> (i32, i32) {
    %c0_i32 = arith.constant 0 : i32
    %c0_i32_0 = arith.constant 0 : i32
    %c0_i32_1 = arith.constant 0 : i32
    return %c0_i32, %c0_i32_0 : i32, i32
  }
  func.func @transform_5(%arg0: i32) -> (i32, i32) {
    %c0_i32 = arith.constant 0 : i32
    %c0_i32_0 = arith.constant 0 : i32
    %c0_i32_1 = arith.constant 0 : i32
    return %c0_i32, %c0_i32_0 : i32, i32
  }
  func.func @transform_6(%arg0: i32) -> (i32, i32) {
    %c0_i32 = arith.constant 0 : i32
    %c0_i32_0 = arith.constant 0 : i32
    %c0_i32_1 = arith.constant 0 : i32
    return %c0_i32, %c0_i32_0 : i32, i32
  }
  func.func @transform_7(%arg0: i32) -> (i32, i32) {
    %c0_i32 = arith.constant 0 : i32
    %c0_i32_0 = arith.constant 0 : i32
    %c0_i32_1 = arith.constant 0 : i32
    return %c0_i32, %c0_i32_0 : i32, i32
  }
  func.func @transform_8(%arg0: i32) -> (i32, i32) {
    %c0_i32 = arith.constant 0 : i32
    %c0_i32_0 = arith.constant 0 : i32
    %c0_i32_1 = arith.constant 0 : i32
    return %c0_i32, %c0_i32_0 : i32, i32
  }
  func.func @transform_9(%arg0: i32) -> (i32, i32) {
    %c0_i32 = arith.constant 0 : i32
    %c0_i32_0 = arith.constant 0 : i32
    %c0_i32_1 = arith.constant 0 : i32
    return %c0_i32, %c0_i32_0 : i32, i32
  }
  func.func @transform_10(%arg0: i32) -> (i32, i32) {
    %c0_i32 = arith.constant 0 : i32
    %c0_i32_0 = arith.constant 0 : i32
    %c0_i32_1 = arith.constant 0 : i32
    return %c0_i32, %c0_i32_0 : i32, i32
  }
  func.func @transform_11(%arg0: i32) -> (i32, i32) {
    %c0_i32 = arith.constant 0 : i32
    %c0_i32_0 = arith.constant 0 : i32
    %c0_i32_1 = arith.constant 0 : i32
    return %c0_i32, %c0_i32_0 : i32, i32
  }
  func.func @transform_12(%arg0: i32) -> (i32, i32) {
    %c0_i32 = arith.constant 0 : i32
    %c0_i32_0 = arith.constant 0 : i32
    %c0_i32_1 = arith.constant 0 : i32
    return %c0_i32, %c0_i32_0 : i32, i32
  }
  func.func @transform_13(%arg0: i32) -> (i32, i32) {
    %c0_i32 = arith.constant 0 : i32
    %c0_i32_0 = arith.constant 0 : i32
    %c0_i32_1 = arith.constant 0 : i32
    return %c0_i32, %c0_i32_0 : i32, i32
  }
  func.func @transform_14(%arg0: i32) -> (i32, i32) {
    %c0_i32 = arith.constant 0 : i32
    %c0_i32_0 = arith.constant 0 : i32
    return %arg0, %c0_i32 : i32, i32
  }
}

</mosaic_0001>

<bundles_post_ra>
// kernel: tpu_custom_call.1
= control target key start
LH: loop header
LB: loop body
LE: loop exit
PB: predicated region body
PF: predicated region fallthrough
CT: control target
= control target key end

     0   :  { %s3152_s0 = inlined_call_operand.hbm [shape: bf16[2,64,128], index: 0, kind: input, shape index: {}]   ;;  %s3153_s1 = inlined_call_operand.hbm [shape: bf16[128,128], index: 1, kind: input, shape index: {}]   ;;  %s3154_s2 = inlined_call_operand.vmem [shape: f32[1,128], index: 2, kind: input, shape index: {}]   ;;  %s3155_s3 = inlined_call_operand.hbm [shape: bf16[128,128], index: 3, kind: input, shape index: {}]   ;;  %s3156_s4 = inlined_call_operand.vmem [shape: f32[1,128], index: 4, kind: input, shape index: {}]   ;;  %s3157_s5 = inlined_call_operand.vmem [shape: bf16[128,64], index: 5, kind: input, shape index: {}]   ;;  %s3158_s6 = inlined_call_operand.vmem [shape: f32[1,64], index: 6, kind: input, shape index: {}]   ;;  %s3159_s7 = inlined_call_operand.hbm [shape: bf16[64,128], index: 7, kind: input, shape index: {}]   ;;  %s3160_s8 = inlined_call_operand.hbm [shape: bf16[64,128], index: 8, kind: input, shape index: {}]   ;;  %s3161_s9 = inlined_call_operand.vmem [shape: f32[1,128], index: 9, kind: input, shape index: {}]   ;;  %s3162_s10 = inlined_call_operand.hbm [shape: bf16[128,128], index: 10, kind: input, shape index: {}]   ;;  %s3163_s11 = inlined_call_operand.vmem [shape: f32[1,128], index: 11, kind: input, shape index: {}]   ;;  %s3164_s12 = inlined_call_operand.vmem [shape: bf16[128,256], index: 12, kind: input, shape index: {}]   ;;  %s3165_s13 = inlined_call_operand.vmem [shape: f32[1,256], index: 13, kind: input, shape index: {}]   ;;  %s3166_s14 = inlined_call_operand.hbm [shape: f32[64,256], index: 14, kind: output, shape index: {}]  }
   0x1   :  { %3180 = sst [smem:[#allocation27_spill]] %s3153_s1 }
   0x2   :  { %3181 = sst [smem:[#allocation28_spill]] %s3156_s4 }
   0x3   :  { %3182 = sst [smem:[#allocation29_spill]] %s3158_s6 }
   0x4   :  { %3183 = sst [smem:[#allocation30_spill]] %s3161_s9 }
   0x5   :  { %3184 = sst [smem:[#allocation31_spill]] %s3163_s11 }
   0x6   :  { %3185 = sst [smem:[#allocation32_spill]] %s3164_s12 }
   0x7   :  { %3186 = sst [smem:[#allocation33_spill]] %s3165_s13 }
   0x8   :  { %3187 = sst [smem:[#allocation34_spill]] %s3166_s14 }
   0x9   :  { %19 = vsyncpa [#allocation3], 0 }
   0xa   :  { %21 = vsyncpa [#allocation3 + $0x1], 0 }
   0xb   :  { %22 = vsyncpa [#allocation6], 0 }
   0xc   :  { %23 = vsyncpa [#allocation9], 0 }
   0xd   :  { %24 = vsyncpa [#allocation12], 0 }
   0xe   :  { %25 = vsyncpa [#allocation4], 0 }
   0xf   :  { %27 = vsyncpa [#allocation4 + $0x1], 0  ;;  %s2739_s29 = smov 0   ;;  %s2741_s30 = smov 0  }
  0x10   :  { %s2743_s15 = smov 0   ;;  %s2745_s16 = smov 0  }
  0x11 LB: > { %3188 = sst [smem:[#allocation22_spill]] %s2634_s29  ;;  %s2760_s17 = sadd.s32 4294967295, %s2646_s16   ;;  %s2646_s16 = sphi %s2745_s16, %s3222_s16   ;;  %s2642_s15 = sphi %s2743_s15, %s3226_s15   ;;  %s2638_s30 = sphi %s2741_s30, %s3225_s30   ;;  %s2634_s29 = sphi %s2739_s29, %s3224_s29  }
  0x12   : > { %s1878_s18 = sadd.s32 4294967294, %s2646_s16   ;;  %s2764_s19 = sadd.s32 1, %s2646_s16  }
  0x13   : > { %3189 = sst [smem:[#allocation23_spill]] %s2764_s19  ;;  %s40_s20 = sadd.s32 1, %s2642_s15 }
  0x14   : > { %s37_s21 = ssub.s32 %s2646_s16, %s2764_s19  ;;  %p47_p0 = scmp.ne.s32.totalorder %s2642_s15, %s2638_s30 }
  0x15   : > { %p38_p1 = scmp.eq.s32.totalorder %s37_s21, 0  ;;  %p48_p2 = scmp.eq.s32.totalorder %s2646_s16, 0 }
  0x16   : > { %p53_p3 = scmp.ne.s32.totalorder %s2638_s30, %s2634_s29  ;;  %p3174_p4 = scmp.eq.s32.totalorder %s2760_s17, 0 }
  0x17   : > { %s2776_s22 = scalar_select %p38_p1, %s2642_s15, %s40_s20  }
  0x18   : > { %p2778_p5 = por %p48_p2, %p47_p0  ;;  %p2784_p6 = por %p3174_p4, %p53_p3 }
  0x19   : > { %3190 = sst [smem:[#allocation24_spill]] %s2776_s22  ;;  %p350_p7 = scmp.eq.s32.totalorder %s2760_s17, 1 }
  0x1a   : > { %s3191_s23 = scalar_select %p2778_p5, 1, 0 }
  0x1b   : > { %s3192_s24 = scalar_select %p2784_p6, 1, 0 }
  0x1c   : > { %p356_p8 = scmp.eq.s32.totalorder %s1878_s18, 1  ;;  %p1879_p9 = scmp.ge.s32.totalorder %s2646_s16, 1 }
  0x1d   : > { %p363_p10 = scmp.lt.s32.totalorder %s2646_s16, 3  ;;  %p2791_p11 = por %p350_p7, %p47_p0 }
  0x1e   : > { %p2795_p12 = por %p356_p8, %p53_p3  ;;  %s2648_s28 = smov [#allocation5]  }
  0x1f   : > { %s3193_s25 = scalar_select %p2791_p11, 1, 0 }
  0x20   : > { %s3195_s26 = scalar_select %p2795_p12, 1, 0 }
  0x21   : > { %3194 = sst [smem:[#allocation25_spill]] %s3193_s25  ;;  %p2799_p13 = pnand %p1879_p9, %p363_p10 }
  0x22   : > { %3196 = sst [smem:[#allocation26_spill]] %s3195_s26  ;;  %s375_s20 = sshll.u32 %s2648_s28, 4  ;;  %s376_s20 = int_to_ptr.vmem [resolvable:$true] %s375_s20 }
  0x23   : > { %s3197_s27 = scalar_select %p2799_p13, 1, 0 }
  0x24   : > { %p2218_p1 = pneg %p2799_p13  ;;  %s2649_s21 = smov [#allocation8]  }
  0x25   : > { %s413_s22 = sshll.u32 %s2649_s21, 4  ;;  %s3199_s1 = sld [smem:[#allocation27_spill]]  ;;  %s2811_s22 = int_to_ptr.vmem [resolvable:$true] %s413_s22 }
  0x26   : > { %p2807_p2 = pnand %p2218_p1, %p3174_p4 }
  0x28   : > { %p2821_p3 = pneg %p2807_p2 }
  0x2b   : > { %s2428_s29 = scalar_lea.hbm %s3199_s1, 1024 }
  0x2c   : > { %p2429_p0 = scmp.ne.s32.totalorder %s3199_s1, %s2428_s29  ;;  %p2435_p9 = scmp.lt.u32.totalorder %s2428_s29, %s3199_s1 }
  0x2e   : > { %p2431_p7 = pnand %p2821_p3, %p2429_p0 }
  0x30   : > { %p2432_p8 = pneg %p2431_p7 }
  0x32   : > { %p2437_p10 = pnand %p2435_p9, %p2432_p8 }
  0x34   : > { %2440 = shalt.err (!%p2437_p10)
}
  0x35   : > { %s2441_s19 = scalar_lea.vmem %s376_s20, 1024  ;;  %p2449_p11 = scmp.lt.s32.totalorder %s376_s20, %s376_s20 }
  0x36   : > { %p2442_p1 = scmp.ne.s32.totalorder %s376_s20, %s2441_s19  ;;  %p2450_p6 = scmp.lt.s32.totalorder %s2441_s19, %s2441_s19 }
  0x38   : > { %p2444_p4 = pnand %p2442_p1, %p2821_p3  ;;  %p2451_p13 = por %p2450_p6, %p2449_p11 }
  0x3a   : > { %p2445_p12 = pneg %p2444_p4 }
  0x3c   : > { %p2452_p5 = pnand %p2451_p13, %p2445_p12 }
  0x3e   : > { %2455 = shalt.err (!%p2452_p5)
}
  0x3f   : > { %s2650_s14 = smov 64   ;;  %s2651_s25 = smov 4  }
  0x40   : > { %2221 = dma.hbm_to_vmem [thread:$0]  (!%p2807_p2), %s3199_s1, 1024, %s376_s20, [#allocation6], %s2650_s14, %s2650_s14, %s2651_s25  }
  0x41   : > { %s2456_s11 = scalar_lea.hbm %s3159_s7, 512 }
  0x42   : > { %p2457_p4 = scmp.ne.s32.totalorder %s3159_s7, %s2456_s11  ;;  %p2463_p11 = scmp.lt.u32.totalorder %s2456_s11, %s3159_s7 }
  0x44   : > { %p2459_p5 = pnand %p2457_p4, %p2821_p3 }
  0x46   : > { %p2460_p6 = pneg %p2459_p5 }
  0x48   : > { %p2465_p12 = pnand %p2463_p11, %p2460_p6 }
  0x4a   : > { %2468 = shalt.err (!%p2465_p12)
}
  0x4b   : > { %s2469_s20 = scalar_lea.vmem %s2811_s22, 512  ;;  %p2477_p8 = scmp.lt.s32.totalorder %s2811_s22, %s2811_s22 }
  0x4c   : > { %p2470_p13 = scmp.ne.s32.totalorder %s2811_s22, %s2469_s20  ;;  %p2478_p9 = scmp.lt.s32.totalorder %s2469_s20, %s2469_s20 }
  0x4e   : > { %p2472_p0 = pnand %p2470_p13, %p2821_p3  ;;  %p2479_p10 = por %p2478_p9, %p2477_p8 }
  0x50   : > { %p2473_p7 = pneg %p2472_p0 }
  0x52   : > { %p2480_p1 = pnand %p2479_p10, %p2473_p7 }
  0x54   : > { %2483 = shalt.err (!%p2480_p1)
}
  0x55   : > { %2227 = dma.hbm_to_vmem [thread:$0]  (!%p2807_p2), %s3159_s7, 512, %s2811_s22, [#allocation9], %s2650_s14, %s2650_s14, %s2651_s25  }
  0x56   : > { %s2652_s11 = smov [#allocation7]   ;;  %s2653_s13 = smov [#allocation10]  }
  0x57   : > { %s391_s12 = sshll.u32 %s2652_s11, 4  ;;  %s426_s29 = sshll.u32 %s2653_s13, 4  ;;  %s392_s12 = int_to_ptr.vmem [resolvable:$true] %s391_s12  ;;  %s427_s29 = int_to_ptr.vmem [resolvable:$true] %s426_s29 }
  0x58   : > { %s2484_s19 = scalar_lea.hbm %s3155_s3, 1024 }
  0x59   : > { %p2485_p4 = scmp.ne.s32.totalorder %s3155_s3, %s2484_s19  ;;  %p2491_p11 = scmp.lt.u32.totalorder %s2484_s19, %s3155_s3 }
  0x5b   : > { %p2487_p5 = pnand %p2485_p4, %p2821_p3 }
  0x5d   : > { %p2488_p6 = pneg %p2487_p5 }
  0x5f   : > { %p2493_p12 = pnand %p2491_p11, %p2488_p6 }
  0x61   : > { %2496 = shalt.err (!%p2493_p12)
}
  0x62   : > { %s2497_s22 = scalar_lea.vmem %s392_s12, 1024  ;;  %p2505_p8 = scmp.lt.s32.totalorder %s392_s12, %s392_s12 }
  0x63   : > { %p2498_p13 = scmp.ne.s32.totalorder %s392_s12, %s2497_s22  ;;  %p2506_p9 = scmp.lt.s32.totalorder %s2497_s22, %s2497_s22 }
  0x65   : > { %p2500_p0 = pnand %p2498_p13, %p2821_p3  ;;  %p2507_p10 = por %p2506_p9, %p2505_p8 }
  0x67   : > { %p2501_p7 = pneg %p2500_p0 }
  0x69   : > { %p2508_p1 = pnand %p2507_p10, %p2501_p7 }
  0x6b   : > { %2511 = shalt.err (!%p2508_p1)
}
  0x6c   : > { %2224 = dma.hbm_to_vmem [thread:$0]  (!%p2807_p2), %s3155_s3, 1024, %s392_s12, [#allocation6], %s2650_s14, %s2650_s14, %s2651_s25  }
  0x6d   : > { %s2512_s13 = scalar_lea.hbm %s3160_s8, 512 }
  0x6e   : > { %p2513_p4 = scmp.ne.s32.totalorder %s3160_s8, %s2512_s13  ;;  %p2519_p11 = scmp.lt.u32.totalorder %s2512_s13, %s3160_s8 }
  0x70   : > { %p2515_p5 = pnand %p2513_p4, %p2821_p3 }
  0x72   : > { %p2516_p6 = pneg %p2515_p5 }
  0x74   : > { %p2521_p12 = pnand %p2519_p11, %p2516_p6 }
  0x76   : > { %2524 = shalt.err (!%p2521_p12)
}
  0x77   : > { %s2525_s6 = scalar_lea.vmem %s427_s29, 512  ;;  %p2533_p8 = scmp.lt.s32.totalorder %s427_s29, %s427_s29 }
  0x78   : > { %p2526_p13 = scmp.ne.s32.totalorder %s427_s29, %s2525_s6  ;;  %p2534_p9 = scmp.lt.s32.totalorder %s2525_s6, %s2525_s6 }
  0x7a   : > { %p2528_p0 = pnand %p2526_p13, %p2821_p3  ;;  %p2535_p10 = por %p2534_p9, %p2533_p8 }
  0x7c   : > { %p2529_p7 = pneg %p2528_p0 }
  0x7e   : > { %p2536_p1 = pnand %p2535_p10, %p2529_p7 }
  0x80   : > { %2539 = shalt.err (!%p2536_p1)
}
  0x81   : > { %2230 = dma.hbm_to_vmem [thread:$0]  (!%p2807_p2), %s3160_s8, 512, %s427_s29, [#allocation9], %s2650_s14, %s2650_s14, %s2651_s25  }
  0x82   : > { %s2654_s1 = smov [#allocation11]   ;;  %s2540_s13 = scalar_lea.hbm %s3162_s10, 1024 }
  0x83   : > { %s442_s4 = sshll.u32 %s2654_s1, 4  ;;  %p2541_p4 = scmp.ne.s32.totalorder %s3162_s10, %s2540_s13  ;;  %s443_s4 = int_to_ptr.vmem [resolvable:$true] %s442_s4 }
  0x84   : > { %p2547_p11 = scmp.lt.u32.totalorder %s2540_s13, %s3162_s10 }
  0x85   : > { %p2543_p5 = pnand %p2541_p4, %p2821_p3 }
  0x87   : > { %p2544_p6 = pneg %p2543_p5 }
  0x89   : > { %p2549_p12 = pnand %p2547_p11, %p2544_p6 }
  0x8b   : > { %2552 = shalt.err (!%p2549_p12)
}
  0x8c   : > { %s2553_s29 = scalar_lea.vmem %s443_s4, 1024  ;;  %p2561_p8 = scmp.lt.s32.totalorder %s443_s4, %s443_s4 }
  0x8d   : > { %p2554_p13 = scmp.ne.s32.totalorder %s443_s4, %s2553_s29  ;;  %p2562_p9 = scmp.lt.s32.totalorder %s2553_s29, %s2553_s29 }
  0x8f   : > { %p2556_p0 = pnand %p2554_p13, %p2821_p3  ;;  %p2563_p10 = por %p2562_p9, %p2561_p8 }
  0x91   : > { %p2557_p7 = pneg %p2556_p0 }
  0x93   : > { %p2564_p1 = pnand %p2563_p10, %p2557_p7 }
  0x95   : > { %2567 = shalt.err (!%p2564_p1)
}
  0x96   : > { %2233 = dma.hbm_to_vmem [thread:$0]  (!%p2807_p2), %s3162_s10, 1024, %s443_s4, [#allocation12], %s2650_s14, %s2650_s14, %s2651_s25  }
  0x97   : > { %p1885_p4 = scmp.ge.s32.totalorder %s2646_s16, 2 }
  0x99   : > { %461 = sbr.rel (%p1885_p4) target bundleno = 174 (0xae), region = 68 }
  0xa0   : > { %s465_s28 = sand.u32 1, %s2642_s15   ;;  %s2006_s22 = sshll.u32 %s2646_s16, 8 }
  0xa1   : > { %s1886_s18 = sshll.u32 %s465_s28, 5  ;;  %p3201_p3 = scmp.ne.s32.totalorder %s3191_s23, 0 }
  0xa2   : > { %s475_s25 = scalar_lea.hbm %s3152_s0, %s2006_s22  ;;  %s469_s11 = scalar_lea.vmem [#allocation2], %s1886_s18 }
  0xa3   : > { %s2197_s1 = scalar_select %p3201_p3, [#allocation0], [#allocation16] }
  0xa4   : > { %s488_s13 = sshll.u32 %s469_s11, 4  ;;  %s2655_s26 = smov 512   ;;  %s489_s13 = int_to_ptr.vmem [resolvable:$true] %s488_s13 }
  0xa5   : > { %s480_s4 = sld [smem:[%s2197_s1]]   ;;  %s2656_s21 = smov 256  }
  0xa6   : > { %2198 = sst [smem:[#allocation15]] (%p3201_p3), %s2655_s26  ;;  %s2657_s19 = smov 4  }
  0xa7   : > { %2199 = sst [smem:[#allocation15 + $0x1]] (%p3201_p3), %s2656_s21  ;;  %s2658_s20 = smov 64  }
  0xa8   : > { %2200 = sst [smem:[#allocation15 + $0x2]] (%p3201_p3), %s2657_s19  ;;  %s466_s12 = scalar_lea.sflag [#allocation3], %s465_s28 }
  0xa9   : > { %2201 = sst [smem:[#allocation15 + $0x3]] (%p3201_p3), %s2658_s20  ;;  %s2659_s18 = smov [#allocation14]  }
  0xaa   : > { %2202 = sst [smem:[#allocation15 + $0x4]] (%p3201_p3), %s2658_s20 }
  0xab   : > { %s1889_s29 = sshll.u32 %s480_s4, 26  ;;  %2203 = sst [smem:[#allocation15 + $0x5]] (%p3201_p3), %s2657_s19 }
  0xac   : > { %s1890_s6 = sadd.s32 134217728, %s1889_s29 }
  0xad   : > { %2204 = dma.general (%p3201_p3), %s475_s25, 512, %s489_s13, %s466_s12, %s2659_s18, [#allocation15], %s1890_s6, 0  }
  0xae PF: > { %p3202_p2 = scmp.ne.s32.totalorder %s3197_s27, 0 }
  0xaf   : > { %s2956_s22 = sand.u32 (!%p3202_p2), 1, %s2638_s30   ;;  %p3203_p5 = scmp.ne.s32.totalorder (!%p3202_p2), %s3192_s24, 0 }
  0xb0   : > { %513 = sbr.rel (%p3202_p2) target bundleno = 1679 (0x68f), region = 76  ;;  %s1892_s1 = sshll.u32 (!%p3202_p2), %s2956_s22, 5 }
  0xb1   : > { %s516_s9 = scalar_lea.sflag (!%p3202_p2), [#allocation3], %s2956_s22  ;;  %s2960_s14 = scalar_lea.vmem (!%p3202_p2), [#allocation2], %s1892_s1 }
  0xb7   : > { %2613 = dma.done.wait (%p3203_p5), %s516_s9, 512  }
  0xb8   : > { %2615 = vsyncadd (%p3203_p5), %s516_s9, 4294966784  ;;  %p3204_p6 = scmp.eq.s32.totalorder %s2760_s17, 0 }
  0xba   : > { %2617 = dma.done.wait (%p3204_p6), [#allocation6], 2048   ;;  %p3205_p11 = pmov %p3204_p6 }
  0xbb   : > { %p3206_p12 = pmov %p3204_p6 }
  0xbc   : > { %2619 = vsyncadd (%p3205_p11), [#allocation6], 4294965248 }
  0xbd   : > { %2621 = dma.done.wait (%p3206_p12), [#allocation9], 1024   ;;  %p3207_p13 = pmov %p3204_p6 }
  0xbe   : > { %p3208_p0 = pmov %p3204_p6 }
  0xbf   : > { %2623 = vsyncadd (%p3207_p13), [#allocation9], 4294966272 }
  0xc0   : > { %2625 = dma.done.wait (%p3208_p0), [#allocation12], 1024   ;;  %p3209_p7 = pmov %p3208_p0 }
  0xc1   : > { %v2296_v0 = vld [vmem:[#allocation5] sm:$0xff]   ;;  %v2297_v1 = vld [vmem:[#allocation5 + $0x8] sm:$0xff]   ;;  %v2298_v2 = vld [vmem:[#allocation5 + $0x10] sm:$0xff]   ;;  %s3210_s24 = sld [smem:[#allocation28_spill]]  ;;  %s3211_s25 = sld [smem:[#allocation29_spill]] }
  0xc2   : > { %2627 = vsyncadd (%p3209_p7), [#allocation12], 4294966272  ;;  %2067 = vmatprep.subr.bf16.mxu0 %v2296_v0  ;;  %v2299_v3 = vld [vmem:[#allocation5 + $0x18] sm:$0xff]   ;;  %v2304_v4 = vld [vmem:[%s2960_s14] sm:$0xff]   ;;  %s3212_s13 = sld [smem:[#allocation32_spill]]  ;;  %s3213_s1 = sld [smem:[#allocation30_spill]] }
  0xc3   : > { %2068 = vmatpush3.bf16.msra.mxu0 %v2296_v0  ;;  %2083 = vmatprep.mubr.bf16.mxu0 %v2304_v4  ;;  %v2300_v5 = vld [vmem:[#allocation5 + $0x20] sm:$0xff]   ;;  %v2309_v7 = vld [vmem:[#allocation7 + $0x8] sm:$0xff]   ;;  %v2302_v9 = vld [vmem:[#allocation5 + $0x30] sm:$0xff]   ;;  %s3214_s11 = sld [smem:[#allocation31_spill]]  ;;  %s3215_s19 = sld [smem:[#allocation33_spill]] }
  0xc4   : > { %2069 = vmatprep.subr.bf16.mxu0 %v2297_v1  ;;  %v2308_v6 = vld [vmem:[#allocation7] sm:$0xff]   ;;  %v2301_v8 = vld [vmem:[#allocation5 + $0x28] sm:$0xff]   ;;  %v2303_v10 = vld [vmem:[#allocation5 + $0x38] sm:$0xff]   ;;  %s1898_s20 = sshll.u32 %s2956_s22, 6  ;;  %s2008_s12 = sshll.u32 %s2760_s17, 10 }
  0xc5   : > { %2091 = vmatprep.subr.bf16.mxu1 %v2308_v6  ;;  %v2305_v11 = vld [vmem:[%s2960_s14 + $0x8] sm:$0xff]   ;;  %v2306_v12 = vld [vmem:[%s2960_s14 + $0x10] sm:$0xff]   ;;  %v2307_v13 = vld [vmem:[%s2960_s14 + $0x18] sm:$0xff]   ;;  %s583_s29 = scalar_lea.vmem [#allocation13], %s1898_s20  ;;  %s3216_s18 = sld [smem:[#allocation25_spill]] }
  0xc6   : > { %2092 = vmatpush3.bf16.msra.mxu1 %v2308_v6  ;;  %v2310_v14 = vld [vmem:[#allocation7 + $0x10] sm:$0xff]   ;;  %v2311_v15 = vld [vmem:[#allocation7 + $0x18] sm:$0xff]   ;;  %v2312_v16 = vld [vmem:[#allocation7 + $0x20] sm:$0xff]   ;;  %s1757_s6 = sshll.u32 %s583_s29, 4  ;;  %s3217_s14 = sld [smem:[#allocation34_spill]]  ;;  %s3103_s6 = int_to_ptr.vmem [resolvable:$true] %s1757_s6 }
  0xc7   : > { %2070 = vmatpush3.bf16.msra.mxu0 %v2297_v1  ;;  %2093 = vmatprep.subr.bf16.mxu1 %v2309_v7  ;;  %v2313_v17 = vld [vmem:[#allocation7 + $0x28] sm:$0xff]   ;;  %v2314_v18 = vld [vmem:[#allocation7 + $0x30] sm:$0xff]   ;;  %v2315_v19 = vld [vmem:[#allocation7 + $0x38] sm:$0xff]   ;;  %s1743_s17 = scalar_lea.sflag [#allocation4], %s2956_s22  ;;  %s2661_s27 = smov [#allocation13]  }
  0xc8   : > { %2071 = vmatprep.subr.bf16.mxu0 %v2298_v2  ;;  %v2316_v20 = vld [vmem:[%s3157_s5] sm:$0xff]   ;;  %v2317_v21 = vld [vmem:[%s3157_s5 + $0x8] sm:$0xff]   ;;  %s2572_s28 = sshll.u32 %s2661_s27, 4  ;;  %s2573_s28 = int_to_ptr.vmem [resolvable:$false] %s2572_s28 }
  0xc9   : > { %v1899_v22 = vld [vmem:[%s3154_s2] ss:$0 sm:$0xff]  ;;  %p2575_p3 = scmp.lt.s32.totalorder %s3103_s6, %s2573_s28 }
  0xca   : > { %2094 = vmatpush3.bf16.msra.mxu1 %v2309_v7 }
  0xcb   : > { %2072 = vmatpush3.bf16.msra.mxu0 %v2298_v2  ;;  %2095 = vmatprep.subr.bf16.mxu1 %v2310_v14  ;;  %p3218_p9 = scmp.ne.s32.totalorder %s3216_s18, 0 }
  0xcc   : > { %2073 = vmatprep.subr.bf16.mxu0 %v2299_v3  ;;  %s3108_s23 = scalar_lea.hbm %s3217_s14, %s2008_s12 }
  0xce   : > { %2096 = vmatpush3.bf16.msra.mxu1 %v2310_v14 }
  0xcf   : > { %2074 = vmatpush3.bf16.msra.mxu0 %v2299_v3  ;;  %2097 = vmatprep.subr.bf16.mxu1 %v2311_v15 }
  0xd0   : > { %2075 = vmatprep.subr.bf16.mxu0 %v2300_v5 }
  0xd2   : > { %2098 = vmatpush3.bf16.msra.mxu1 %v2311_v15 }
  0xd3   : > { %2076 = vmatpush3.bf16.msra.mxu0 %v2300_v5  ;;  %2099 = vmatprep.subr.bf16.mxu1 %v2312_v16 }
  0xd4   : > { %2077 = vmatprep.subr.bf16.mxu0 %v2301_v8 }
  0xd6   : > { %2100 = vmatpush3.bf16.msra.mxu1 %v2312_v16 }
  0xd7   : > { %2078 = vmatpush3.bf16.msra.mxu0 %v2301_v8  ;;  %2101 = vmatprep.subr.bf16.mxu1 %v2313_v17 }
  0xd8   : > { %2079 = vmatprep.subr.bf16.mxu0 %v2302_v9 }
  0xda   : > { %2102 = vmatpush3.bf16.msra.mxu1 %v2313_v17 }
  0xdb   : > { %2080 = vmatpush3.bf16.msra.mxu0 %v2302_v9  ;;  %2103 = vmatprep.subr.bf16.mxu1 %v2314_v18 }
  0xdc   : > { %2081 = vmatprep.subr.bf16.mxu0 %v2303_v10 }
  0xde   : > { %2104 = vmatpush3.bf16.msra.mxu1 %v2314_v18 }
  0xdf   : > { %2082 = vmatpush3.bf16.msra.mxu0 %v2303_v10  ;;  %2105 = vmatprep.subr.bf16.mxu1 %v2315_v19 }
  0xe0   : > { %2115 = vmatprep.subr.bf16.mxu0 %v2316_v20 }
  0xe2   : > { %2084 = vmatmul.mubr.bf16.vlgmr.msra.gmra.mrb[0].mxu0 %v2305_v11  ;;  %2106 = vmatpush3.bf16.msra.mxu1 %v2315_v19 }
  0xe3   : > { %2087 = vmatprep.mubr.bf16.mxu0 %v2306_v12  ;;  %2116 = vmatpush3.bf16.msra.mxu0 %v2316_v20 }
  0xe4   : > { %2117 = vmatprep.subr.bf16.mxu0 %v2317_v21 }
  0xe7   : > { %2118 = vmatpush3.bf16.msra.mxu0 %v2317_v21 }
  0xea   : > { %2088 = vmatmul.mubr.bf16.gmra.mrb[4].mxu0 %v2307_v13 }
 0x1b5   : > { %v2085_v23 = vpop.f32.mrb[0].mxu0 }
 0x1b6   : > { %v733_v24 = vadd.f32 %v2085_v23, %v1899_v22  ;;  %v724_v25 = vpop.f32.mrb[1].mxu0 }
 0x1b7   : > { %v725_v26 = vadd.f32 %v1899_v22, %v724_v25  ;;  %v2086_v27 = vpop.f32.mrb[2].mxu0 }
 0x1b8   : > { %v775_v28 = vmul.f32 1.442695, %v733_v24  ;;  %v736_v29 = vadd.f32 %v2086_v27, %v1899_v22  ;;  %v727_v30 = vpop.f32.mrb[3].mxu0  ;;  %v765_v55 = vmul.f32 1.050701, %v733_v24  ;;  %vm757_vm0 = vcmp.gt.f32.partialorder %v733_v24, 0.0 }
 0x1b9   : > { %v771_v31 = vmul.f32 1.442695, %v725_v26  ;;  %v728_v32 = vadd.f32 %v1899_v22, %v727_v30  ;;  %v763_v58 = vmul.f32 1.050701, %v725_v26  ;;  %vm755_vm2 = vcmp.gt.f32.partialorder %v725_v26, 0.0  ;;  %v2318_v27 = vld [vmem:[%s3157_s5 + $0x10] sm:$0xff]  }
 0x1ba   : > { %2364 = vpow2.f32 %v775_v28  ;;  %v777_v33 = vmul.f32 1.442695, %v736_v29  ;;  %v766_v59 = vmul.f32 1.050701, %v736_v29  ;;  %vm758_vm1 = vcmp.gt.f32.partialorder %v736_v29, 0.0  ;;  %2119 = vmatprep.subr.bf16.mxu0 %v2318_v27  ;;  %v2319_v28 = vld [vmem:[%s3157_s5 + $0x18] sm:$0xff]  }
 0x1bb   : > { %2366 = vpow2.f32 %v771_v31  ;;  %v773_v34 = vmul.f32 1.442695, %v728_v32  ;;  %v764_v61 = vmul.f32 1.050701, %v728_v32  ;;  %vm756_vm3 = vcmp.gt.f32.partialorder %v728_v32, 0.0  ;;  %2120 = vmatpush3.bf16.msra.mxu0 %v2318_v27  ;;  %v2320_v29 = vld [vmem:[%s3157_s5 + $0x20] sm:$0xff]  }
 0x1bc   : > { %2368 = vpow2.f32 %v777_v33  ;;  %2121 = vmatprep.subr.bf16.mxu0 %v2319_v28  ;;  %v2321_v30 = vld [vmem:[%s3157_s5 + $0x28] sm:$0xff]   ;;  %v2322_v31 = vld [vmem:[%s3157_s5 + $0x30] sm:$0xff]   ;;  %v2323_v32 = vld [vmem:[%s3157_s5 + $0x38] sm:$0xff]  }
 0x1bd   : > { %2370 = vpow2.f32 %v773_v34  ;;  %v2089_v35 = vpop.f32.mrb[4].mxu0  ;;  %v1920_v33 = vld [vmem:[%s3210_s24] ss:$0 sm:$0xff]  ;;  %s2568_s24 = scalar_lea.vmem %s3103_s6, 1024 }
 0x1be   : > { %v2991_v36 = vadd.f32 %v2089_v35, %v1899_v22  ;;  %v740_v37 = vpop.f32.mrb[5].mxu0  ;;  %p2569_p8 = scmp.ne.s32.totalorder %s3103_s6, %s2568_s24 }
 0x1bf   : > { %v2993_v38 = vadd.f32 %v1899_v22, %v740_v37  ;;  %v2090_v39 = vpop.f32.mrb[6].mxu0  ;;  %2122 = vmatpush3.bf16.msra.mxu0 %v2319_v28 }
 0x1c0   : > { %v783_v40 = vmul.f32 1.442695, %v2991_v36  ;;  %v752_v41 = vadd.f32 %v2090_v39, %v1899_v22  ;;  %v743_v42 = vpop.f32.mrb[7].mxu0  ;;  %v769_v13 = vmul.f32 1.050701, %v2991_v36  ;;  %vm761_vm4 = vcmp.gt.f32.partialorder %v2991_v36, 0.0  ;;  %2123 = vmatprep.subr.bf16.mxu0 %v2320_v29  ;;  %p2570_p10 = pnand %p2569_p8, %p3218_p9 }
 0x1c1   : > { %v779_v43 = vmul.f32 1.442695, %v2993_v38  ;;  %v744_v44 = vadd.f32 %v1899_v22, %v743_v42  ;;  %v767_v16 = vmul.f32 1.050701, %v2993_v38  ;;  %vm759_vm6 = vcmp.gt.f32.partialorder %v2993_v38, 0.0 }
 0x1c2   : > { %2372 = vpow2.f32 %v783_v40  ;;  %v785_v45 = vmul.f32 1.442695, %v752_v41  ;;  %v770_v17 = vmul.f32 1.050701, %v752_v41  ;;  %vm762_vm5 = vcmp.gt.f32.partialorder %v752_v41, 0.0  ;;  %p2571_p1 = pneg %p2570_p10 }
 0x1c3   : > { %2374 = vpow2.f32 %v779_v43  ;;  %v781_v46 = vmul.f32 1.442695, %v744_v44  ;;  %v768_v19 = vmul.f32 1.050701, %v744_v44  ;;  %vm760_vm7 = vcmp.gt.f32.partialorder %v744_v44, 0.0  ;;  %2124 = vmatpush3.bf16.msra.mxu0 %v2320_v29 }
 0x1c4   : > { %v2365_v47 = vpop.eup %2364  ;;  %2376 = vpow2.f32 %v785_v45  ;;  %2125 = vmatprep.subr.bf16.mxu0 %v2321_v30 }
 0x1c5   : > { %v2367_v48 = vpop.eup %2366  ;;  %v1914_v49 = vadd.f32 -1.0, %v2365_v47  ;;  %2378 = vpow2.f32 %v781_v46 }
 0x1c6   : > { %v2369_v50 = vpop.eup %2368  ;;  %v1912_v51 = vadd.f32 -1.0, %v2367_v48 }
 0x1c7   : > { %v2371_v52 = vpop.eup %2370  ;;  %v797_v53 = vmul.f32 1.7580993, %v1914_v49  ;;  %v1915_v54 = vadd.f32 -1.0, %v2369_v50  ;;  %2126 = vmatpush3.bf16.msra.mxu0 %v2321_v30 }
 0x1c8   : > { %v1913_v56 = vadd.f32 -1.0, %v2371_v52  ;;  %v795_v57 = vmul.f32 1.7580993, %v1912_v51  ;;  %2127 = vmatprep.subr.bf16.mxu0 %v2322_v31 }
 0x1c9   : > { %v798_v60 = vmul.f32 1.7580993, %v1915_v54  ;;  %v805_v63 = vsel %vm757_vm0, %v765_v55, %v797_v53 }
 0x1ca   : > { %v796_v62 = vmul.f32 1.7580993, %v1913_v56  ;;  %v803_v2 = vsel %vm755_vm2, %v763_v58, %v795_v57 }
 0x1cb   : > { %v806_v0 = vsel %vm758_vm1, %v766_v59, %v798_v60  ;;  %2128 = vmatpush3.bf16.msra.mxu0 %v2322_v31 }
 0x1cc   : > { %v2373_v1 = vpop.eup %2372  ;;  %v804_v3 = vsel %vm756_vm3, %v764_v61, %v796_v62  ;;  %v812_v4 = vpack.c.bf16 %v806_v0, %v805_v63  ;;  %2129 = vmatprep.subr.bf16.mxu0 %v2323_v32 }
 0x1cd   : > { %v2375_v5 = vpop.eup %2374  ;;  %v1918_v6 = vadd.f32 -1.0, %v2373_v1  ;;  %v811_v7 = vpack.c.bf16 %v804_v3, %v803_v2 }
 0x1ce   : > { %v2377_v8 = vpop.eup %2376  ;;  %v1916_v9 = vadd.f32 -1.0, %v2375_v5 }
 0x1cf   : > { %v2379_v10 = vpop.eup %2378  ;;  %v801_v11 = vmul.f32 1.7580993, %v1918_v6  ;;  %v1919_v12 = vadd.f32 -1.0, %v2377_v8  ;;  %2107 = vmatprep.mubr.bf16.mxu1 %v811_v7  ;;  %2130 = vmatpush3.bf16.msra.mxu0 %v2323_v32 }
 0x1d0   : > { %v799_v14 = vmul.f32 1.7580993, %v1916_v9  ;;  %v1917_v15 = vadd.f32 -1.0, %v2379_v10  ;;  %2108 = vmatmul.mubr.bf16.vlgmr.msra.gmra.mrb[0].mxu1 %v812_v4 }
 0x1d1   : > { %v802_v18 = vmul.f32 1.7580993, %v1919_v12  ;;  %v809_v21 = vsel %vm761_vm4, %v769_v13, %v801_v11 }
 0x1d2   : > { %v800_v20 = vmul.f32 1.7580993, %v1917_v15  ;;  %v807_v23 = vsel %vm759_vm6, %v767_v16, %v799_v14 }
 0x1d3   : > { %v810_v22 = vsel %vm762_vm5, %v770_v17, %v802_v18 }
 0x1d4   : > { %v808_v24 = vsel %vm760_vm7, %v768_v19, %v800_v20  ;;  %v814_v25 = vpack.c.bf16 %v810_v22, %v809_v21 }
 0x1d5   : > { %v813_v26 = vpack.c.bf16 %v808_v24, %v807_v23 }
 0x1d7   : > { %2111 = vmatprep.mubr.bf16.mxu1 %v813_v26 }
 0x1d8   : > { %2112 = vmatmul.mubr.bf16.gmra.mrb[4].mxu1 %v814_v25 }
 0x2a3   : > { %v2109_v34 = vpop.f32.mrb[0].mxu1 }
 0x2a4   : > { %v929_v35 = vadd.f32 %v2109_v34, %v1920_v33  ;;  %v920_v36 = vpop.f32.mrb[1].mxu1 }
 0x2a5   : > { %v921_v37 = vadd.f32 %v1920_v33, %v920_v36  ;;  %v2110_v38 = vpop.f32.mrb[2].mxu1 }
 0x2a6   : > { %v971_v39 = vmul.f32 1.442695, %v929_v35  ;;  %v932_v40 = vadd.f32 %v2110_v38, %v1920_v33  ;;  %v923_v41 = vpop.f32.mrb[3].mxu1  ;;  %v961_v2 = vmul.f32 1.050701, %v929_v35  ;;  %vm953_vm8 = vcmp.gt.f32.partialorder %v929_v35, 0.0 }
 0x2a7   : > { %v967_v42 = vmul.f32 1.442695, %v921_v37  ;;  %v924_v43 = vadd.f32 %v1920_v33, %v923_v41  ;;  %v959_v5 = vmul.f32 1.050701, %v921_v37  ;;  %vm951_vm10 = vcmp.gt.f32.partialorder %v921_v37, 0.0  ;;  %v2324_v38 = vld [vmem:[#allocation10] sm:$0xff]  }
 0x2a8   : > { %2380 = vpow2.f32 %v971_v39  ;;  %v973_v44 = vmul.f32 1.442695, %v932_v40  ;;  %v962_v6 = vmul.f32 1.050701, %v932_v40  ;;  %vm954_vm9 = vcmp.gt.f32.partialorder %v932_v40, 0.0  ;;  %2139 = vmatprep.subr.bf16.mxu1 %v2324_v38  ;;  %v2325_v39 = vld [vmem:[#allocation10 + $0x8] sm:$0xff]  }
 0x2a9   : > { %2382 = vpow2.f32 %v967_v42  ;;  %v969_v45 = vmul.f32 1.442695, %v924_v43  ;;  %v960_v8 = vmul.f32 1.050701, %v924_v43  ;;  %vm952_vm11 = vcmp.gt.f32.partialorder %v924_v43, 0.0  ;;  %2140 = vmatpush3.bf16.msra.mxu1 %v2324_v38  ;;  %v2326_v40 = vld [vmem:[#allocation10 + $0x10] sm:$0xff]  }
 0x2aa   : > { %2384 = vpow2.f32 %v973_v44  ;;  %2141 = vmatprep.subr.bf16.mxu1 %v2325_v39  ;;  %v2327_v41 = vld [vmem:[#allocation10 + $0x18] sm:$0xff]   ;;  %v3032_v42 = vld [vmem:[#allocation8] sm:$0xff]   ;;  %v2333_v44 = vld [vmem:[#allocation11 + $0x8] sm:$0xff]  }
 0x2ab   : > { %2386 = vpow2.f32 %v969_v45  ;;  %v2113_v46 = vpop.f32.mrb[4].mxu1  ;;  %v2332_v43 = vld [vmem:[#allocation11] sm:$0xff]  }
 0x2ac   : > { %v3022_v47 = vadd.f32 %v2113_v46, %v1920_v33  ;;  %v936_v48 = vpop.f32.mrb[5].mxu1  ;;  %2163 = vmatprep.subr.bf16.mxu0 %v2332_v43  ;;  %v1937_v45 = vld [vmem:[%s3211_s25] ss:$0 sm:$0xff]  ;;  %s2574_s25 = scalar_lea.vmem %s2573_s28, 2048 }
 0x2ad   : > { %v3024_v49 = vadd.f32 %v1920_v33, %v936_v48  ;;  %v2114_v50 = vpop.f32.mrb[6].mxu1  ;;  %2142 = vmatpush3.bf16.msra.mxu1 %v2325_v39  ;;  %p2576_p2 = scmp.lt.s32.totalorder %s2574_s25, %s2568_s24 }
 0x2ae   : > { %v979_v51 = vmul.f32 1.442695, %v3022_v47  ;;  %v948_v52 = vadd.f32 %v2114_v50, %v1920_v33  ;;  %v939_v53 = vpop.f32.mrb[7].mxu1  ;;  %v965_v24 = vmul.f32 1.050701, %v3022_v47  ;;  %vm957_vm12 = vcmp.gt.f32.partialorder %v3022_v47, 0.0  ;;  %2143 = vmatprep.subr.bf16.mxu1 %v2326_v40 }
 0x2af   : > { %v975_v54 = vmul.f32 1.442695, %v3024_v49  ;;  %v940_v55 = vadd.f32 %v1920_v33, %v939_v53  ;;  %v963_v27 = vmul.f32 1.050701, %v3024_v49  ;;  %vm955_vm14 = vcmp.gt.f32.partialorder %v3024_v49, 0.0  ;;  %p2577_p5 = por %p2576_p2, %p2575_p3 }
 0x2b0   : > { %2388 = vpow2.f32 %v979_v51  ;;  %v981_v56 = vmul.f32 1.442695, %v948_v52  ;;  %v966_v28 = vmul.f32 1.050701, %v948_v52  ;;  %vm958_vm13 = vcmp.gt.f32.partialorder %v948_v52, 0.0 }
 0x2b1   : > { %2390 = vpow2.f32 %v975_v54  ;;  %v977_v57 = vmul.f32 1.442695, %v940_v55  ;;  %v964_v30 = vmul.f32 1.050701, %v940_v55  ;;  %vm956_vm15 = vcmp.gt.f32.partialorder %v940_v55, 0.0  ;;  %2144 = vmatpush3.bf16.msra.mxu1 %v2326_v40  ;;  %p2578_p6 = pnand %p2577_p5, %p2571_p1 }
 0x2b2   : > { %v2381_v58 = vpop.eup %2380  ;;  %2392 = vpow2.f32 %v981_v56  ;;  %2145 = vmatprep.subr.bf16.mxu1 %v2327_v41 }
 0x2b3   : > { %v2383_v59 = vpop.eup %2382  ;;  %v1931_v60 = vadd.f32 -1.0, %v2381_v58  ;;  %2394 = vpow2.f32 %v977_v57 }
 0x2b4   : > { %v2385_v61 = vpop.eup %2384  ;;  %v1929_v62 = vadd.f32 -1.0, %v2383_v59 }
 0x2b5   : > { %v2387_v63 = vpop.eup %2386  ;;  %v993_v0 = vmul.f32 1.7580993, %v1931_v60  ;;  %v1932_v1 = vadd.f32 -1.0, %v2385_v61  ;;  %2146 = vmatpush3.bf16.msra.mxu1 %v2327_v41 }
 0x2b6   : > { %v991_v3 = vmul.f32 1.7580993, %v1929_v62  ;;  %v1930_v4 = vadd.f32 -1.0, %v2387_v63  ;;  %2151 = vmatprep.subr.bf16.mxu1 %v3032_v42 }
 0x2b7   : > { %v994_v7 = vmul.f32 1.7580993, %v1932_v1  ;;  %v1001_v10 = vsel %vm953_vm8, %v961_v2, %v993_v0  ;;  %vm1247_vm8 = vcmask 523264  }
 0x2b8   : > { %v992_v9 = vmul.f32 1.7580993, %v1930_v4  ;;  %v999_v14 = vsel %vm951_vm10, %v959_v5, %v991_v3 }
 0x2b9   : > { %v1002_v11 = vsel %vm954_vm9, %v962_v6, %v994_v7 }
 0x2ba   : > { %v2389_v12 = vpop.eup %2388  ;;  %v1008_v13 = vpack.c.bf16 %v1002_v11, %v1001_v10  ;;  %v1000_v15 = vsel %vm952_vm11, %v960_v8, %v992_v9 }
 0x2bb   : > { %v2391_v16 = vpop.eup %2390  ;;  %v1935_v17 = vadd.f32 -1.0, %v2389_v12  ;;  %v1007_v18 = vpack.c.bf16 %v1000_v15, %v999_v14 }
 0x2bc   : > { %v2393_v19 = vpop.eup %2392  ;;  %v1933_v20 = vadd.f32 -1.0, %v2391_v16 }
 0x2bd   : > { %v2395_v21 = vpop.eup %2394  ;;  %v997_v22 = vmul.f32 1.7580993, %v1935_v17  ;;  %v1936_v23 = vadd.f32 -1.0, %v2393_v19  ;;  %2131 = vmatprep.mubr.bf16.mxu0 %v1007_v18 }
 0x2be   : > { %v995_v25 = vmul.f32 1.7580993, %v1933_v20  ;;  %v1934_v26 = vadd.f32 -1.0, %v2395_v21  ;;  %2132 = vmatmul.mubr.bf16.vlgmr.msra.gmra.mrb[8].mxu0 %v1008_v13 }
 0x2bf   : > { %v998_v29 = vmul.f32 1.7580993, %v1936_v23  ;;  %v1005_v32 = vsel %vm957_vm12, %v965_v24, %v997_v22  ;;  %2164 = vmatpush3.bf16.msra.mxu0 %v2332_v43 }
 0x2c0   : > { %v996_v31 = vmul.f32 1.7580993, %v1934_v26  ;;  %v1003_v34 = vsel %vm955_vm14, %v963_v27, %v995_v25  ;;  %2165 = vmatprep.subr.bf16.mxu0 %v2333_v44 }
 0x2c1   : > { %v1006_v33 = vsel %vm958_vm13, %v966_v28, %v998_v29 }
 0x2c2   : > { %v1004_v35 = vsel %vm956_vm15, %v964_v30, %v996_v31  ;;  %v1010_v36 = vpack.c.bf16 %v1006_v33, %v1005_v32 }
 0x2c3   : > { %v1009_v37 = vpack.c.bf16 %v1004_v35, %v1003_v34  ;;  %2166 = vmatpush3.bf16.msra.mxu0 %v2333_v44 }
 0x2c5   : > { %2135 = vmatprep.mubr.bf16.mxu0 %v1009_v37 }
 0x2c6   : > { %2136 = vmatmul.mubr.bf16.gmra.mrb[12].mxu0 %v1010_v36 }
 0x391   : > { %v2133_v46 = vpop.f32.mrb[8].mxu0 }
 0x392   : > { %v1125_v47 = vadd.f32 %v2133_v46, %v1937_v45  ;;  %v1116_v48 = vpop.f32.mrb[9].mxu0 }
 0x393   : > { %v1117_v49 = vadd.f32 %v1937_v45, %v1116_v48  ;;  %v2134_v50 = vpop.f32.mrb[10].mxu0 }
 0x394   : > { %v1167_v51 = vmul.f32 1.442695, %v1125_v47  ;;  %v1128_v52 = vadd.f32 %v2134_v50, %v1937_v45  ;;  %v1119_v53 = vpop.f32.mrb[11].mxu0  ;;  %v1157_v14 = vmul.f32 1.050701, %v1125_v47  ;;  %vm1149_vm0 = vcmp.gt.f32.partialorder %v1125_v47, 0.0 }
 0x395   : > { %v1163_v54 = vmul.f32 1.442695, %v1117_v49  ;;  %v1120_v55 = vadd.f32 %v1937_v45, %v1119_v53  ;;  %v1155_v17 = vmul.f32 1.050701, %v1117_v49  ;;  %vm1147_vm2 = vcmp.gt.f32.partialorder %v1117_v49, 0.0  ;;  %v2331_v53 = vld [vmem:[#allocation8 + $0x18] sm:$0xff]  }
 0x396   : > { %2396 = vpow2.f32 %v1167_v51  ;;  %v1169_v56 = vmul.f32 1.442695, %v1128_v52  ;;  %v1158_v18 = vmul.f32 1.050701, %v1128_v52  ;;  %vm1150_vm1 = vcmp.gt.f32.partialorder %v1128_v52, 0.0  ;;  %v2329_v51 = vld [vmem:[#allocation8 + $0x8] sm:$0xff]  }
 0x397   : > { %2398 = vpow2.f32 %v1163_v54  ;;  %v1165_v57 = vmul.f32 1.442695, %v1120_v55  ;;  %v1156_v20 = vmul.f32 1.050701, %v1120_v55  ;;  %vm1148_vm3 = vcmp.gt.f32.partialorder %v1120_v55, 0.0  ;;  %v2330_v52 = vld [vmem:[#allocation8 + $0x10] sm:$0xff]  }
 0x398   : > { %2400 = vpow2.f32 %v1169_v56  ;;  %v2334_v54 = vld [vmem:[#allocation11 + $0x10] sm:$0xff]   ;;  %v2335_v55 = vld [vmem:[#allocation11 + $0x18] sm:$0xff]   ;;  %v2336_v56 = vld [vmem:[#allocation11 + $0x20] sm:$0xff]  }
 0x399   : > { %2402 = vpow2.f32 %v1165_v57  ;;  %v2137_v58 = vpop.f32.mrb[12].mxu0  ;;  %2167 = vmatprep.subr.bf16.mxu0 %v2334_v54  ;;  %v2338_v57 = vld [vmem:[#allocation11 + $0x30] sm:$0xff]  }
 0x39a   : > { %v1141_v59 = vadd.f32 %v2137_v58, %v1937_v45  ;;  %v1132_v60 = vpop.f32.mrb[13].mxu0  ;;  %2168 = vmatpush3.bf16.msra.mxu0 %v2334_v54  ;;  %v2339_v58 = vld [vmem:[#allocation11 + $0x38] sm:$0xff]  }
 0x39b   : > { %v3038_v61 = vadd.f32 %v1937_v45, %v1132_v60  ;;  %v2138_v62 = vpop.f32.mrb[14].mxu0  ;;  %2169 = vmatprep.subr.bf16.mxu0 %v2335_v55  ;;  %v2342_v60 = vld [vmem:[%s3212_s13 + $0x4] ss:$8 sps:$4 sm:$0xff]  }
 0x39c   : > { %v1175_v63 = vmul.f32 1.442695, %v1141_v59  ;;  %v1144_v0 = vadd.f32 %v2138_v62, %v1937_v45  ;;  %v1135_v1 = vpop.f32.mrb[15].mxu0  ;;  %v1161_v36 = vmul.f32 1.050701, %v1141_v59  ;;  %vm1153_vm4 = vcmp.gt.f32.partialorder %v1141_v59, 0.0 }
 0x39d   : > { %v1171_v2 = vmul.f32 1.442695, %v3038_v61  ;;  %v1136_v3 = vadd.f32 %v1937_v45, %v1135_v1  ;;  %v1159_v39 = vmul.f32 1.050701, %v3038_v61  ;;  %vm1151_vm6 = vcmp.gt.f32.partialorder %v3038_v61, 0.0 }
 0x39e   : > { %2404 = vpow2.f32 %v1175_v63  ;;  %v1177_v4 = vmul.f32 1.442695, %v1144_v0  ;;  %v1162_v40 = vmul.f32 1.050701, %v1144_v0  ;;  %vm1154_vm5 = vcmp.gt.f32.partialorder %v1144_v0, 0.0  ;;  %2170 = vmatpush3.bf16.msra.mxu0 %v2335_v55 }
 0x39f   : > { %2406 = vpow2.f32 %v1171_v2  ;;  %v1173_v5 = vmul.f32 1.442695, %v1136_v3  ;;  %v1160_v43 = vmul.f32 1.050701, %v1136_v3  ;;  %vm1152_vm7 = vcmp.gt.f32.partialorder %v1136_v3, 0.0  ;;  %2171 = vmatprep.subr.bf16.mxu0 %v2336_v56 }
 0x3a0   : > { %v2397_v6 = vpop.eup %2396  ;;  %2408 = vpow2.f32 %v1177_v4  ;;  %v2340_v59 = vld [vmem:[%s3212_s13] ss:$8 sps:$4 sm:$0xff]   ;;  %v2345_v61 = vld [vmem:[%s3212_s13 + $0x14] ss:$8 sps:$4 sm:$0xff]   ;;  %v2343_v62 = vld [vmem:[%s3212_s13 + $0x10] ss:$8 sps:$4 sm:$0xff]  }
 0x3a1   : > { %v2399_v7 = vpop.eup %2398  ;;  %v1948_v8 = vadd.f32 -1.0, %v2397_v6  ;;  %2410 = vpow2.f32 %v1173_v5  ;;  %v1966_v63 = vld [vmem:[%s3213_s1] ss:$0 sm:$0xff] }
 0x3a2   : > { %v2401_v9 = vpop.eup %2400  ;;  %v1946_v10 = vadd.f32 -1.0, %v2399_v7  ;;  %2172 = vmatpush3.bf16.msra.mxu0 %v2336_v56 }
 0x3a3   : > { %v2403_v11 = vpop.eup %2402  ;;  %v1189_v12 = vmul.f32 1.7580993, %v1948_v8  ;;  %v1949_v13 = vadd.f32 -1.0, %v2401_v9 }
 0x3a4   : > { %v1187_v15 = vmul.f32 1.7580993, %v1946_v10  ;;  %v1947_v16 = vadd.f32 -1.0, %v2403_v11 }
 0x3a5   : > { %v1190_v19 = vmul.f32 1.7580993, %v1949_v13  ;;  %v1197_v22 = vsel %vm1149_vm0, %v1157_v14, %v1189_v12 }
 0x3a6   : > { %v1188_v21 = vmul.f32 1.7580993, %v1947_v16  ;;  %v1195_v25 = vsel %vm1147_vm2, %v1155_v17, %v1187_v15 }
 0x3a7   : > { %v1198_v23 = vsel %vm1150_vm1, %v1158_v18, %v1190_v19 }
 0x3a8   : > { %v2405_v24 = vpop.eup %2404  ;;  %v1204_v26 = vpack.c.bf16 %v1198_v23, %v1197_v22  ;;  %v1196_v27 = vsel %vm1148_vm3, %v1156_v20, %v1188_v21 }
 0x3a9   : > { %v2407_v28 = vpop.eup %2406  ;;  %v1952_v29 = vadd.f32 -1.0, %v2405_v24  ;;  %v1203_v30 = vpack.c.bf16 %v1196_v27, %v1195_v25 }
 0x3aa   : > { %v2409_v31 = vpop.eup %2408  ;;  %v1950_v32 = vadd.f32 -1.0, %v2407_v28 }
 0x3ab   : > { %v2411_v33 = vpop.eup %2410  ;;  %v1193_v34 = vmul.f32 1.7580993, %v1952_v29  ;;  %v1953_v35 = vadd.f32 -1.0, %v2409_v31 }
 0x3ac   : > { %v1191_v37 = vmul.f32 1.7580993, %v1950_v32  ;;  %v1951_v38 = vadd.f32 -1.0, %v2411_v33 }
 0x3ad   : > { %v1194_v41 = vmul.f32 1.7580993, %v1953_v35  ;;  %v1201_v45 = vsel %vm1153_vm4, %v1161_v36, %v1193_v34  ;;  %v2348_v34 = vld [vmem:[%s3212_s13 + $0x24] ss:$8 sps:$4 sm:$0xff]   ;;  %v2346_v35 = vld [vmem:[%s3212_s13 + $0x20] ss:$8 sps:$4 sm:$0xff]  }
 0x3ae   : > { %v1192_v44 = vmul.f32 1.7580993, %v1951_v38  ;;  %v1199_v47 = vsel %vm1151_vm6, %v1159_v39, %v1191_v37  ;;  %v2351_v36 = vld [vmem:[%s3212_s13 + $0x34] ss:$8 sps:$4 sm:$0xff]   ;;  %v2349_v37 = vld [vmem:[%s3212_s13 + $0x30] ss:$8 sps:$4 sm:$0xff]  }
 0x3af   : > { %v1202_v46 = vsel %vm1154_vm5, %v1162_v40, %v1194_v41  ;;  %v2354_v38 = vld [vmem:[%s3212_s13 + $0x44] ss:$8 sps:$4 sm:$0xff]   ;;  %v2352_v39 = vld [vmem:[%s3212_s13 + $0x40] ss:$8 sps:$4 sm:$0xff]   ;;  %v2357_v40 = vld [vmem:[%s3212_s13 + $0x54] ss:$8 sps:$4 sm:$0xff]  }
 0x3b0   : > { %v1206_v48 = vpack.c.bf16 %v1202_v46, %v1201_v45  ;;  %v1200_v49 = vsel %vm1152_vm7, %v1160_v43, %v1192_v44  ;;  %v2355_v41 = vld [vmem:[%s3212_s13 + $0x50] ss:$8 sps:$4 sm:$0xff]   ;;  %v2360_v43 = vld [vmem:[%s3212_s13 + $0x64] ss:$8 sps:$4 sm:$0xff]   ;;  %v2358_v44 = vld [vmem:[%s3212_s13 + $0x60] ss:$8 sps:$4 sm:$0xff]  }
 0x3b1   : > { %v1205_v50 = vpack.c.bf16 %v1200_v49, %v1199_v47  ;;  %v2363_v45 = vld [vmem:[%s3212_s13 + $0x74] ss:$8 sps:$4 sm:$0xff]   ;;  %v2361_v46 = vld [vmem:[%s3212_s13 + $0x70] ss:$8 sps:$4 sm:$0xff]   ;;  %v2660_v47 = vmov 0  }
 0x3b3   : > { %2147 = vmatprep.mubr.msk.bf16.mxu1 %vm1247_vm8, %v1205_v50 }
 0x3b4   : > { %2148 = vmatmul.mubr.msk.bf16.vlgmr.msra.gmra.mrb[8].mxu1 %vm1247_vm8, %v1206_v48  ;;  %v1971_v48 = vld [vmem:[%s3214_s11] ss:$0 sm:$0xff] }
 0x3b5   : > { %2152 = vmatpush3.bf16.msra.mxu1 %v3032_v42  ;;  %2159 = vmatprep.mubr.msk.bf16.mxu1 %vm1247_vm8, %v1203_v30  ;;  %v2337_v42 = vld [vmem:[#allocation11 + $0x28] sm:$0xff]  }
 0x3b6   : > { %2153 = vmatprep.subr.bf16.mxu1 %v2329_v51  ;;  %2173 = vmatprep.subr.bf16.mxu0 %v2337_v42 }
 0x3b7   : > { %2174 = vmatpush3.bf16.msra.mxu0 %v2337_v42 }
 0x3b8   : > { %2175 = vmatprep.subr.bf16.mxu0 %v2338_v57 }
 0x3b9   : > { %2154 = vmatpush3.bf16.msra.mxu1 %v2329_v51 }
 0x3ba   : > { %2155 = vmatprep.subr.bf16.mxu1 %v2330_v52 }
 0x3bb   : > { %2176 = vmatpush3.bf16.msra.mxu0 %v2338_v57 }
 0x3bc   : > { %2177 = vmatprep.subr.bf16.mxu0 %v2339_v58 }
 0x3bd   : > { %2156 = vmatpush3.bf16.msra.mxu1 %v2330_v52 }
 0x3be   : > { %2157 = vmatprep.subr.bf16.mxu1 %v2331_v53 }
 0x3bf   : > { %2178 = vmatpush3.bf16.msra.mxu0 %v2339_v58 }
 0x3c1   : > { %2158 = vmatpush3.bf16.msra.mxu1 %v2331_v53 }
 0x3c2   : > { %1681 = vmatprep.subr.bf16.mxu1 %v2342_v60 }
 0x3c4   : > { %2160 = vmatmul.mubr.msk.bf16.vlgmr.msra.gmra.mrb[8].mxu1 %vm1247_vm8, %v1204_v26 }
 0x3c5   : > { %1682 = vmatpush1.bf16.msra.mxu1 %v2340_v59  ;;  %1713 = vmatprep.mubr.bf16.mxu1 %v2660_v47 }
 0x3c6   : > { %1683 = vmatprep.subr.bf16.mxu1 %v2345_v61 }
 0x3c9   : > { %1684 = vmatpush1.bf16.msra.mxu1 %v2343_v62 }
 0x3ca   : > { %1685 = vmatprep.subr.bf16.mxu1 %v2348_v34 }
 0x3cd   : > { %1686 = vmatpush1.bf16.msra.mxu1 %v2346_v35 }
 0x3ce   : > { %1687 = vmatprep.subr.bf16.mxu1 %v2351_v36 }
 0x3d1   : > { %1688 = vmatpush1.bf16.msra.mxu1 %v2349_v37 }
 0x3d2   : > { %1689 = vmatprep.subr.bf16.mxu1 %v2354_v38 }
 0x3d5   : > { %1690 = vmatpush1.bf16.msra.mxu1 %v2352_v39 }
 0x3d6   : > { %1691 = vmatprep.subr.bf16.mxu1 %v2357_v40 }
 0x3d9   : > { %1692 = vmatpush1.bf16.msra.mxu1 %v2355_v41 }
 0x3da   : > { %1693 = vmatprep.subr.bf16.mxu1 %v2360_v43 }
 0x3dd   : > { %1694 = vmatpush1.bf16.msra.mxu1 %v2358_v44 }
 0x3de   : > { %1695 = vmatprep.subr.bf16.mxu1 %v2363_v45 }
 0x3e1   : > { %1696 = vmatpush1.bf16.msra.mxu1 %v2361_v46 }
 0x497   : > { %v2161_v0 = vpop.f32.mrb[8].mxu1 }
 0x498   : > { %v1391_v1 = vadd.f32 %v2161_v0, %v1966_v63  ;;  %v1367_v2 = vpop.f32.mrb[9].mxu1 }
 0x499   : > { %v1389_v3 = vadd.f32 %v1966_v63, %v1367_v2  ;;  %v2162_v4 = vpop.f32.mrb[10].mxu1 }
 0x49a   : > { %v1405_v5 = vmul.f32 1.442695, %v1391_v1  ;;  %v1392_v6 = vadd.f32 %v2162_v4, %v1966_v63  ;;  %v1370_v7 = vpop.f32.mrb[11].mxu1  ;;  %v1399_v20 = vmul.f32 1.050701, %v1391_v1  ;;  %vm1395_vm9 = vcmp.gt.f32.partialorder %v1391_v1, 0.0 }
 0x49b   : > { %v1401_v8 = vmul.f32 1.442695, %v1389_v3  ;;  %v1390_v9 = vadd.f32 %v1966_v63, %v1370_v7  ;;  %v1397_v23 = vmul.f32 1.050701, %v1389_v3  ;;  %vm1393_vm11 = vcmp.gt.f32.partialorder %v1389_v3, 0.0 }
 0x49c   : > { %2412 = vpow2.f32 %v1405_v5  ;;  %v1407_v10 = vmul.f32 1.442695, %v1392_v6  ;;  %v1400_v24 = vmul.f32 1.050701, %v1392_v6  ;;  %vm1396_vm10 = vcmp.gt.f32.partialorder %v1392_v6, 0.0 }
 0x49d   : > { %2414 = vpow2.f32 %v1401_v8  ;;  %v1403_v11 = vmul.f32 1.442695, %v1390_v9  ;;  %v1398_v26 = vmul.f32 1.050701, %v1390_v9  ;;  %vm1394_vm12 = vcmp.gt.f32.partialorder %v1390_v9, 0.0 }
 0x49e   : > { %2416 = vpow2.f32 %v1407_v10 }
 0x49f   : > { %2418 = vpow2.f32 %v1403_v11 }
 0x4a6   : > { %v2413_v12 = vpop.eup %2412 }
 0x4a7   : > { %v2415_v13 = vpop.eup %2414  ;;  %v1969_v14 = vadd.f32 -1.0, %v2413_v12 }
 0x4a8   : > { %v2417_v15 = vpop.eup %2416  ;;  %v1967_v16 = vadd.f32 -1.0, %v2415_v13 }
 0x4a9   : > { %v2419_v17 = vpop.eup %2418  ;;  %v1415_v18 = vmul.f32 1.7580993, %v1969_v14  ;;  %v1970_v19 = vadd.f32 -1.0, %v2417_v15 }
 0x4aa   : > { %v1413_v21 = vmul.f32 1.7580993, %v1967_v16  ;;  %v1968_v22 = vadd.f32 -1.0, %v2419_v17 }
 0x4ab   : > { %v1416_v25 = vmul.f32 1.7580993, %v1970_v19  ;;  %v1419_v28 = vsel %vm1395_vm9, %v1399_v20, %v1415_v18  ;;  %v1591_v18 = vlaneseq }
 0x4ac   : > { %v1414_v27 = vmul.f32 1.7580993, %v1968_v22  ;;  %v1417_v31 = vsel %vm1393_vm11, %v1397_v23, %v1413_v21  ;;  %v1589_v21 = vld [vmem:[%s3215_s19] sm:$0x3] }
 0x4ad   : > { %v1420_v29 = vsel %vm1396_vm10, %v1400_v24, %v1416_v25  ;;  %v1592_v19 = vshrl.u32 %v1591_v18, 7 }
 0x4ae   : > { %v1422_v30 = vpack.c.bf16 %v1420_v29, %v1419_v28  ;;  %v1418_v32 = vsel %vm1394_vm12, %v1398_v26, %v1414_v27 }
 0x4af   : > { %v1421_v33 = vpack.c.bf16 %v1418_v32, %v1417_v31  ;;  %v1593_v20 = vsub.s32 0, %v1592_v19  ;;  %v1597_v22 = vsub.s32 1, %v1592_v19 }
 0x4b1   : > { %2179 = vmatprep.mubr.bf16.mxu0 %v1421_v33  ;;  %v1594_v23 = vrot.slane %v1589_v21, %v1593_v20  ;;  %v1598_v24 = vrot.slane %v1589_v21, %v1597_v22 }
 0x4b2   : > { %2180 = vmatmul.mubr.bf16.vlgmr.msra.gmra.mrb[16].mxu0 %v1422_v30 }
 0x585   : > { %v2181_v49 = vpop.f32.mrb[16].mxu0 }
 0x586   : > { %v1537_v50 = vadd.f32 %v2181_v49, %v1971_v48  ;;  %v1528_v51 = vpop.f32.mrb[17].mxu0 }
 0x587   : > { %v1529_v52 = vadd.f32 %v1971_v48, %v1528_v51  ;;  %v2182_v53 = vpop.f32.mrb[18].mxu0 }
 0x588   : > { %v1555_v54 = vmul.f32 1.442695, %v1537_v50  ;;  %v1540_v55 = vadd.f32 %v2182_v53, %v1971_v48  ;;  %v1531_v56 = vpop.f32.mrb[19].mxu0  ;;  %v1549_v4 = vmul.f32 1.050701, %v1537_v50  ;;  %vm1545_vm13 = vcmp.gt.f32.partialorder %v1537_v50, 0.0 }
 0x589   : > { %v1551_v42 = vmul.f32 1.442695, %v1529_v52  ;;  %v1532_v57 = vadd.f32 %v1971_v48, %v1531_v56  ;;  %v1547_v7 = vmul.f32 1.050701, %v1529_v52  ;;  %vm1543_vm15 = vcmp.gt.f32.partialorder %v1529_v52, 0.0 }
 0x58a   : > { %2420 = vpow2.f32 %v1555_v54  ;;  %v1557_v58 = vmul.f32 1.442695, %v1540_v55  ;;  %v1550_v8 = vmul.f32 1.050701, %v1540_v55  ;;  %vm1546_vm14 = vcmp.gt.f32.partialorder %v1540_v55, 0.0 }
 0x58b   : > { %2422 = vpow2.f32 %v1551_v42  ;;  %v1553_v59 = vmul.f32 1.442695, %v1532_v57  ;;  %v1548_v10 = vmul.f32 1.050701, %v1532_v57  ;;  %vm1544_vm0 = vcmp.gt.f32.partialorder %v1532_v57, 0.0 }
 0x58c   : > { %2424 = vpow2.f32 %v1557_v58 }
 0x58d   : > { %2426 = vpow2.f32 %v1553_v59 }
 0x594   : > { %v2421_v60 = vpop.eup %2420 }
 0x595   : > { %v2423_v61 = vpop.eup %2422  ;;  %v1982_v62 = vadd.f32 -1.0, %v2421_v60 }
 0x596   : > { %v2425_v63 = vpop.eup %2424  ;;  %v1980_v0 = vadd.f32 -1.0, %v2423_v61 }
 0x597   : > { %v2427_v1 = vpop.eup %2426  ;;  %v1565_v2 = vmul.f32 1.7580993, %v1982_v62  ;;  %v1983_v3 = vadd.f32 -1.0, %v2425_v63 }
 0x598   : > { %v1563_v5 = vmul.f32 1.7580993, %v1980_v0  ;;  %v1981_v6 = vadd.f32 -1.0, %v2427_v1 }
 0x599   : > { %v1566_v9 = vmul.f32 1.7580993, %v1983_v3  ;;  %v1569_v12 = vsel %vm1545_vm13, %v1549_v4, %v1565_v2 }
 0x59a   : > { %v1564_v11 = vmul.f32 1.7580993, %v1981_v6  ;;  %v1567_v14 = vsel %vm1543_vm15, %v1547_v7, %v1563_v5 }
 0x59b   : > { %v1570_v13 = vsel %vm1546_vm14, %v1550_v8, %v1566_v9 }
 0x59c   : > { %v1568_v15 = vsel %vm1544_vm0, %v1548_v10, %v1564_v11  ;;  %v1572_v16 = vpack.c.bf16 %v1570_v13, %v1569_v12 }
 0x59d   : > { %v1571_v17 = vpack.c.bf16 %v1568_v15, %v1567_v14 }
 0x59f   : > { %1714 = vmatmul.mubr.bf16.vlgmr.msra.gmra.mrb[12].mxu1 %v1571_v17 }
 0x5a0   : > { %1723 = vmatprep.mubr.bf16.mxu1 %v2660_v47 }
 0x5a7   : > { %1724 = vmatmul.mubr.bf16.gmra.mrb[16].mxu1 %v1572_v16 }
 0x672   : > { %v1715_v25 = vpop.f32.mrb[12].mxu1 }
 0x673   : > { %v1716_v26 = vadd.f32 %v1715_v25, %v1594_v23  ;;  %v1717_v27 = vpop.f32.mrb[13].mxu1 }
 0x674   : > { %v1718_v28 = vadd.f32 %v1717_v27, %v1598_v24  ;;  %v1719_v29 = vpop.f32.mrb[14].mxu1 }
 0x675   : > { %1734 = vst [vmem:[%s583_s29] sm:$0xff] %v1716_v26  ;;  %v1720_v30 = vadd.f32 %v1719_v29, %v1594_v23  ;;  %v1721_v31 = vpop.f32.mrb[15].mxu1 }
 0x676   : > { %1735 = vst [vmem:[%s583_s29 + $0x8] sm:$0xff] %v1718_v28  ;;  %v1722_v32 = vadd.f32 %v1721_v31, %v1598_v24 }
 0x677   : > { %1736 = vst [vmem:[%s583_s29 + $0x10] sm:$0xff] %v1720_v30 }
 0x678   : > { %1737 = vst [vmem:[%s583_s29 + $0x18] sm:$0xff] %v1722_v32 }
 0x67a   : > { %v1725_v33 = vpop.f32.mrb[16].mxu1 }
 0x67b   : > { %v1726_v34 = vadd.f32 %v1725_v33, %v1594_v23  ;;  %v1727_v35 = vpop.f32.mrb[17].mxu1 }
 0x67c   : > { %v1728_v36 = vadd.f32 %v1727_v35, %v1598_v24  ;;  %v1729_v37 = vpop.f32.mrb[18].mxu1 }
 0x67d   : > { %1738 = vst [vmem:[%s583_s29 + $0x20] sm:$0xff] %v1726_v34  ;;  %v1730_v38 = vadd.f32 %v1729_v37, %v1594_v23  ;;  %v1731_v39 = vpop.f32.mrb[19].mxu1 }
 0x67e   : > { %1739 = vst [vmem:[%s583_s29 + $0x28] sm:$0xff] %v1728_v36  ;;  %v1732_v40 = vadd.f32 %v1731_v39, %v1598_v24 }
 0x67f   : > { %1740 = vst [vmem:[%s583_s29 + $0x30] sm:$0xff] %v1730_v38 }
 0x680   : > { %1741 = vst [vmem:[%s583_s29 + $0x38] sm:$0xff] %v1732_v40 }
 0x681   : > { %2581 = shalt.err (!%p2578_p6)
}
 0x682   : > { %s2582_s4 = scalar_lea.hbm %s3108_s23, 1024  ;;  %s2586_s21 = scalar_lea.hbm %s3217_s14, 2048 }
 0x683   : > { %p2583_p11 = scmp.ne.s32.totalorder %s3108_s23, %s2582_s4  ;;  %p2587_p0 = scmp.lt.u32.totalorder %s3108_s23, %s3217_s14 }
 0x684   : > { %p2588_p7 = scmp.lt.u32.totalorder %s2586_s21, %s2582_s4  ;;  %p2590_p10 = scmp.lt.u32.totalorder %s2582_s4, %s3108_s23 }
 0x685   : > { %p2584_p12 = pnand %p2583_p11, %p3218_p9 }
 0x686   : > { %p2589_p8 = por %p2588_p7, %p2587_p0 }
 0x687   : > { %p2585_p13 = pneg %p2584_p12 }
 0x688   : > { %p2591_p1 = por %p2590_p10, %p2589_p8 }
 0x68a   : > { %p2592_p3 = pnand %p2591_p1, %p2585_p13 }
 0x68c   : > { %2595 = shalt.err (!%p2592_p3)
}
 0x68d   : > { %s2662_s29 = smov 256   ;;  %s2663_s12 = smov 16  }
 0x68e   : > { %2216 = dma.vmem_to_hbm [thread:$0]  (%p3218_p9), %s3103_s6, 1024, %s3108_s23, %s1743_s17, %s2662_s29, %s2662_s29, %s2663_s12  }
 0x68f PF: > { %s3219_s1 = sld [smem:[#allocation22_spill]]  ;;  %s3220_s9 = sld [smem:[#allocation26_spill]] }
 0x695   : > { %s1772_s24 = sand.u32 1, %s3219_s1   ;;  %p3221_p2 = scmp.ne.s32.totalorder %s3220_s9, 0 }
 0x696   : > { %s1773_s27 = scalar_lea.sflag [#allocation4], %s1772_s24 }
 0x697   : > { %p2235_p5 = pnand %p1885_p4, %p3221_p2 }
 0x699   : > { %2629 = dma.done.wait (!%p2235_p5), %s1773_s27, 1024  }
 0x69a   : > { %2631 = vsyncadd (!%p2235_p5), %s1773_s27, 4294966272  ;;  %s3222_s16 = sld [smem:[#allocation23_spill]]  ;;  %s3223_s28 = sld [smem:[#allocation24_spill]] }
 0x69b   : > { %s3224_s29 = smov %s2638_s30  ;;  %s3225_s30 = smov %s2642_s15 }
 0x6a0   : > { %p30_p6 = scmp.ge.s32.totalorder %s3222_s16, 4   ;;  %s3226_s15 = smov %s3223_s28 }
 0x6a2   :  { %32 = sbr.rel (!%p30_p6) target bundleno = 17 (0x11), region = 146 }
 0x6a9   :  { %1778 = vsyncpa [#allocation3], 1 }
 0x6aa   :  { %1780 = vsyncpa [#allocation3 + $0x1], 1 }
 0x6ab   :  { %1781 = vsyncpa [#allocation6], 1 }
 0x6ac   :  { %1782 = vsyncpa [#allocation9], 1 }
 0x6ad   :  { %1783 = vsyncpa [#allocation12], 1 }
 0x6ae   :  { %1784 = vsyncpa [#allocation4], 1 }
 0x6af   :  { %1786 = vsyncpa [#allocation4 + $0x1], 1 }

// kernel: tpu_custom_call.1
= control target key start
LH: loop header
LB: loop body
LE: loop exit
PB: predicated region body
PF: predicated region fallthrough
CT: control target
= control target key end

     0   :  { %s3152_s0 = inlined_call_operand.hbm [shape: bf16[2,64,128], index: 0, kind: input, shape index: {}]   ;;  %s3153_s1 = inlined_call_operand.hbm [shape: bf16[128,128], index: 1, kind: input, shape index: {}]   ;;  %s3154_s2 = inlined_call_operand.vmem [shape: f32[1,128], index: 2, kind: input, shape index: {}]   ;;  %s3155_s3 = inlined_call_operand.hbm [shape: bf16[128,128], index: 3, kind: input, shape index: {}]   ;;  %s3156_s4 = inlined_call_operand.vmem [shape: f32[1,128], index: 4, kind: input, shape index: {}]   ;;  %s3157_s5 = inlined_call_operand.vmem [shape: bf16[128,64], index: 5, kind: input, shape index: {}]   ;;  %s3158_s6 = inlined_call_operand.vmem [shape: f32[1,64], index: 6, kind: input, shape index: {}]   ;;  %s3159_s7 = inlined_call_operand.hbm [shape: bf16[64,128], index: 7, kind: input, shape index: {}]   ;;  %s3160_s8 = inlined_call_operand.hbm [shape: bf16[64,128], index: 8, kind: input, shape index: {}]   ;;  %s3161_s9 = inlined_call_operand.vmem [shape: f32[1,128], index: 9, kind: input, shape index: {}]   ;;  %s3162_s10 = inlined_call_operand.hbm [shape: bf16[128,128], index: 10, kind: input, shape index: {}]   ;;  %s3163_s11 = inlined_call_operand.vmem [shape: f32[1,128], index: 11, kind: input, shape index: {}]   ;;  %s3164_s12 = inlined_call_operand.vmem [shape: bf16[128,256], index: 12, kind: input, shape index: {}]   ;;  %s3165_s13 = inlined_call_operand.vmem [shape: f32[1,256], index: 13, kind: input, shape index: {}]   ;;  %s3166_s14 = inlined_call_operand.hbm [shape: f32[64,256], index: 14, kind: output, shape index: {}]  }
   0x1   :  { %3180 = sst [smem:[#allocation27_spill]] %s3153_s1 }
   0x2   :  { %3181 = sst [smem:[#allocation28_spill]] %s3156_s4 }
   0x3   :  { %3182 = sst [smem:[#allocation29_spill]] %s3158_s6 }
   0x4   :  { %3183 = sst [smem:[#allocation30_spill]] %s3161_s9 }
   0x5   :  { %3184 = sst [smem:[#allocation31_spill]] %s3163_s11 }
   0x6   :  { %3185 = sst [smem:[#allocation32_spill]] %s3164_s12 }
   0x7   :  { %3186 = sst [smem:[#allocation33_spill]] %s3165_s13 }
   0x8   :  { %3187 = sst [smem:[#allocation34_spill]] %s3166_s14 }
   0x9   :  { %19 = vsyncpa [#allocation3], 0 }
   0xa   :  { %21 = vsyncpa [#allocation3 + $0x1], 0 }
   0xb   :  { %22 = vsyncpa [#allocation6], 0 }
   0xc   :  { %23 = vsyncpa [#allocation9], 0 }
   0xd   :  { %24 = vsyncpa [#allocation12], 0 }
   0xe   :  { %25 = vsyncpa [#allocation4], 0 }
   0xf   :  { %27 = vsyncpa [#allocation4 + $0x1], 0  ;;  %s2739_s29 = smov 0   ;;  %s2741_s30 = smov 0  }
  0x10   :  { %s2743_s15 = smov 0   ;;  %s2745_s16 = smov 0  }
  0x11 LB: > { %3188 = sst [smem:[#allocation22_spill]] %s2634_s29  ;;  %s2760_s17 = sadd.s32 4294967295, %s2646_s16   ;;  %s2646_s16 = sphi %s2745_s16, %s3222_s16   ;;  %s2642_s15 = sphi %s2743_s15, %s3226_s15   ;;  %s2638_s30 = sphi %s2741_s30, %s3225_s30   ;;  %s2634_s29 = sphi %s2739_s29, %s3224_s29  }
  0x12   : > { %s1878_s18 = sadd.s32 4294967294, %s2646_s16   ;;  %s2764_s19 = sadd.s32 1, %s2646_s16  }
  0x13   : > { %3189 = sst [smem:[#allocation23_spill]] %s2764_s19  ;;  %s40_s20 = sadd.s32 1, %s2642_s15 }
  0x14   : > { %s37_s21 = ssub.s32 %s2646_s16, %s2764_s19  ;;  %p47_p0 = scmp.ne.s32.totalorder %s2642_s15, %s2638_s30 }
  0x15   : > { %p38_p1 = scmp.eq.s32.totalorder %s37_s21, 0  ;;  %p48_p2 = scmp.eq.s32.totalorder %s2646_s16, 0 }
  0x16   : > { %p53_p3 = scmp.ne.s32.totalorder %s2638_s30, %s2634_s29  ;;  %p3174_p4 = scmp.eq.s32.totalorder %s2760_s17, 0 }
  0x17   : > { %s2776_s22 = scalar_select %p38_p1, %s2642_s15, %s40_s20  }
  0x18   : > { %p2778_p5 = por %p48_p2, %p47_p0  ;;  %p2784_p6 = por %p3174_p4, %p53_p3 }
  0x19   : > { %3190 = sst [smem:[#allocation24_spill]] %s2776_s22  ;;  %p350_p7 = scmp.eq.s32.totalorder %s2760_s17, 1 }
  0x1a   : > { %s3191_s23 = scalar_select %p2778_p5, 1, 0 }
  0x1b   : > { %s3192_s24 = scalar_select %p2784_p6, 1, 0 }
  0x1c   : > { %p356_p8 = scmp.eq.s32.totalorder %s1878_s18, 1  ;;  %p1879_p9 = scmp.ge.s32.totalorder %s2646_s16, 1 }
  0x1d   : > { %p363_p10 = scmp.lt.s32.totalorder %s2646_s16, 3  ;;  %p2791_p11 = por %p350_p7, %p47_p0 }
  0x1e   : > { %p2795_p12 = por %p356_p8, %p53_p3  ;;  %s2648_s28 = smov [#allocation5]  }
  0x1f   : > { %s3193_s25 = scalar_select %p2791_p11, 1, 0 }
  0x20   : > { %s3195_s26 = scalar_select %p2795_p12, 1, 0 }
  0x21   : > { %3194 = sst [smem:[#allocation25_spill]] %s3193_s25  ;;  %p2799_p13 = pnand %p1879_p9, %p363_p10 }
  0x22   : > { %3196 = sst [smem:[#allocation26_spill]] %s3195_s26  ;;  %s375_s20 = sshll.u32 %s2648_s28, 4  ;;  %s376_s20 = int_to_ptr.vmem [resolvable:$true] %s375_s20 }
  0x23   : > { %s3197_s27 = scalar_select %p2799_p13, 1, 0 }
  0x24   : > { %p2218_p1 = pneg %p2799_p13  ;;  %s2649_s21 = smov [#allocation8]  }
  0x25   : > { %s413_s22 = sshll.u32 %s2649_s21, 4  ;;  %s3199_s1 = sld [smem:[#allocation27_spill]]  ;;  %s2811_s22 = int_to_ptr.vmem [resolvable:$true] %s413_s22 }
  0x26   : > { %p2807_p2 = pnand %p2218_p1, %p3174_p4 }
  0x28   : > { %p2821_p3 = pneg %p2807_p2 }
  0x2b   : > { %s2428_s29 = scalar_lea.hbm %s3199_s1, 1024 }
  0x2c   : > { %p2429_p0 = scmp.ne.s32.totalorder %s3199_s1, %s2428_s29  ;;  %p2435_p9 = scmp.lt.u32.totalorder %s2428_s29, %s3199_s1 }
  0x2e   : > { %p2431_p7 = pnand %p2821_p3, %p2429_p0 }
  0x30   : > { %p2432_p8 = pneg %p2431_p7 }
  0x32   : > { %p2437_p10 = pnand %p2435_p9, %p2432_p8 }
  0x34   : > { %2440 = shalt.err (!%p2437_p10)
}
  0x35   : > { %s2441_s19 = scalar_lea.vmem %s376_s20, 1024  ;;  %p2449_p11 = scmp.lt.s32.totalorder %s376_s20, %s376_s20 }
  0x36   : > { %p2442_p1 = scmp.ne.s32.totalorder %s376_s20, %s2441_s19  ;;  %p2450_p6 = scmp.lt.s32.totalorder %s2441_s19, %s2441_s19 }
  0x38   : > { %p2444_p4 = pnand %p2442_p1, %p2821_p3  ;;  %p2451_p13 = por %p2450_p6, %p2449_p11 }
  0x3a   : > { %p2445_p12 = pneg %p2444_p4 }
  0x3c   : > { %p2452_p5 = pnand %p2451_p13, %p2445_p12 }
  0x3e   : > { %2455 = shalt.err (!%p2452_p5)
}
  0x3f   : > { %s2650_s14 = smov 64   ;;  %s2651_s25 = smov 4  }
  0x40   : > { %2221 = dma.hbm_to_vmem [thread:$0]  (!%p2807_p2), %s3199_s1, 1024, %s376_s20, [#allocation6], %s2650_s14, %s2650_s14, %s2651_s25  }
  0x41   : > { %s2456_s11 = scalar_lea.hbm %s3159_s7, 512 }
  0x42   : > { %p2457_p4 = scmp.ne.s32.totalorder %s3159_s7, %s2456_s11  ;;  %p2463_p11 = scmp.lt.u32.totalorder %s2456_s11, %s3159_s7 }
  0x44   : > { %p2459_p5 = pnand %p2457_p4, %p2821_p3 }
  0x46   : > { %p2460_p6 = pneg %p2459_p5 }
  0x48   : > { %p2465_p12 = pnand %p2463_p11, %p2460_p6 }
  0x4a   : > { %2468 = shalt.err (!%p2465_p12)
}
  0x4b   : > { %s2469_s20 = scalar_lea.vmem %s2811_s22, 512  ;;  %p2477_p8 = scmp.lt.s32.totalorder %s2811_s22, %s2811_s22 }
  0x4c   : > { %p2470_p13 = scmp.ne.s32.totalorder %s2811_s22, %s2469_s20  ;;  %p2478_p9 = scmp.lt.s32.totalorder %s2469_s20, %s2469_s20 }
  0x4e   : > { %p2472_p0 = pnand %p2470_p13, %p2821_p3  ;;  %p2479_p10 = por %p2478_p9, %p2477_p8 }
  0x50   : > { %p2473_p7 = pneg %p2472_p0 }
  0x52   : > { %p2480_p1 = pnand %p2479_p10, %p2473_p7 }
  0x54   : > { %2483 = shalt.err (!%p2480_p1)
}
  0x55   : > { %2227 = dma.hbm_to_vmem [thread:$0]  (!%p2807_p2), %s3159_s7, 512, %s2811_s22, [#allocation9], %s2650_s14, %s2650_s14, %s2651_s25  }
  0x56   : > { %s2652_s11 = smov [#allocation7]   ;;  %s2653_s13 = smov [#allocation10]  }
  0x57   : > { %s391_s12 = sshll.u32 %s2652_s11, 4  ;;  %s426_s29 = sshll.u32 %s2653_s13, 4  ;;  %s392_s12 = int_to_ptr.vmem [resolvable:$true] %s391_s12  ;;  %s427_s29 = int_to_ptr.vmem [resolvable:$true] %s426_s29 }
  0x58   : > { %s2484_s19 = scalar_lea.hbm %s3155_s3, 1024 }
  0x59   : > { %p2485_p4 = scmp.ne.s32.totalorder %s3155_s3, %s2484_s19  ;;  %p2491_p11 = scmp.lt.u32.totalorder %s2484_s19, %s3155_s3 }
  0x5b   : > { %p2487_p5 = pnand %p2485_p4, %p2821_p3 }
  0x5d   : > { %p2488_p6 = pneg %p2487_p5 }
  0x5f   : > { %p2493_p12 = pnand %p2491_p11, %p2488_p6 }
  0x61   : > { %2496 = shalt.err (!%p2493_p12)
}
  0x62   : > { %s2497_s22 = scalar_lea.vmem %s392_s12, 1024  ;;  %p2505_p8 = scmp.lt.s32.totalorder %s392_s12, %s392_s12 }
  0x63   : > { %p2498_p13 = scmp.ne.s32.totalorder %s392_s12, %s2497_s22  ;;  %p2506_p9 = scmp.lt.s32.totalorder %s2497_s22, %s2497_s22 }
  0x65   : > { %p2500_p0 = pnand %p2498_p13, %p2821_p3  ;;  %p2507_p10 = por %p2506_p9, %p2505_p8 }
  0x67   : > { %p2501_p7 = pneg %p2500_p0 }
  0x69   : > { %p2508_p1 = pnand %p2507_p10, %p2501_p7 }
  0x6b   : > { %2511 = shalt.err (!%p2508_p1)
}
  0x6c   : > { %2224 = dma.hbm_to_vmem [thread:$0]  (!%p2807_p2), %s3155_s3, 1024, %s392_s12, [#allocation6], %s2650_s14, %s2650_s14, %s2651_s25  }
  0x6d   : > { %s2512_s13 = scalar_lea.hbm %s3160_s8, 512 }
  0x6e   : > { %p2513_p4 = scmp.ne.s32.totalorder %s3160_s8, %s2512_s13  ;;  %p2519_p11 = scmp.lt.u32.totalorder %s2512_s13, %s3160_s8 }
  0x70   : > { %p2515_p5 = pnand %p2513_p4, %p2821_p3 }
  0x72   : > { %p2516_p6 = pneg %p2515_p5 }
  0x74   : > { %p2521_p12 = pnand %p2519_p11, %p2516_p6 }
  0x76   : > { %2524 = shalt.err (!%p2521_p12)
}
  0x77   : > { %s2525_s6 = scalar_lea.vmem %s427_s29, 512  ;;  %p2533_p8 = scmp.lt.s32.totalorder %s427_s29, %s427_s29 }
  0x78   : > { %p2526_p13 = scmp.ne.s32.totalorder %s427_s29, %s2525_s6  ;;  %p2534_p9 = scmp.lt.s32.totalorder %s2525_s6, %s2525_s6 }
  0x7a   : > { %p2528_p0 = pnand %p2526_p13, %p2821_p3  ;;  %p2535_p10 = por %p2534_p9, %p2533_p8 }
  0x7c   : > { %p2529_p7 = pneg %p2528_p0 }
  0x7e   : > { %p2536_p1 = pnand %p2535_p10, %p2529_p7 }
  0x80   : > { %2539 = shalt.err (!%p2536_p1)
}
  0x81   : > { %2230 = dma.hbm_to_vmem [thread:$0]  (!%p2807_p2), %s3160_s8, 512, %s427_s29, [#allocation9], %s2650_s14, %s2650_s14, %s2651_s25  }
  0x82   : > { %s2654_s1 = smov [#allocation11]   ;;  %s2540_s13 = scalar_lea.hbm %s3162_s10, 1024 }
  0x83   : > { %s442_s4 = sshll.u32 %s2654_s1, 4  ;;  %p2541_p4 = scmp.ne.s32.totalorder %s3162_s10, %s2540_s13  ;;  %s443_s4 = int_to_ptr.vmem [resolvable:$true] %s442_s4 }
  0x84   : > { %p2547_p11 = scmp.lt.u32.totalorder %s2540_s13, %s3162_s10 }
  0x85   : > { %p2543_p5 = pnand %p2541_p4, %p2821_p3 }
  0x87   : > { %p2544_p6 = pneg %p2543_p5 }
  0x89   : > { %p2549_p12 = pnand %p2547_p11, %p2544_p6 }
  0x8b   : > { %2552 = shalt.err (!%p2549_p12)
}
  0x8c   : > { %s2553_s29 = scalar_lea.vmem %s443_s4, 1024  ;;  %p2561_p8 = scmp.lt.s32.totalorder %s443_s4, %s443_s4 }
  0x8d   : > { %p2554_p13 = scmp.ne.s32.totalorder %s443_s4, %s2553_s29  ;;  %p2562_p9 = scmp.lt.s32.totalorder %s2553_s29, %s2553_s29 }
  0x8f   : > { %p2556_p0 = pnand %p2554_p13, %p2821_p3  ;;  %p2563_p10 = por %p2562_p9, %p2561_p8 }
  0x91   : > { %p2557_p7 = pneg %p2556_p0 }
  0x93   : > { %p2564_p1 = pnand %p2563_p10, %p2557_p7 }
  0x95   : > { %2567 = shalt.err (!%p2564_p1)
}
  0x96   : > { %2233 = dma.hbm_to_vmem [thread:$0]  (!%p2807_p2), %s3162_s10, 1024, %s443_s4, [#allocation12], %s2650_s14, %s2650_s14, %s2651_s25  }
  0x97   : > { %p1885_p4 = scmp.ge.s32.totalorder %s2646_s16, 2 }
  0x99   : > { %461 = sbr.rel (%p1885_p4) target bundleno = 174 (0xae), region = 68 }
  0xa0   : > { %s465_s28 = sand.u32 1, %s2642_s15   ;;  %s2006_s22 = sshll.u32 %s2646_s16, 8 }
  0xa1   : > { %s1886_s18 = sshll.u32 %s465_s28, 5  ;;  %p3201_p3 = scmp.ne.s32.totalorder %s3191_s23, 0 }
  0xa2   : > { %s475_s25 = scalar_lea.hbm %s3152_s0, %s2006_s22  ;;  %s469_s11 = scalar_lea.vmem [#allocation2], %s1886_s18 }
  0xa3   : > { %s2197_s1 = scalar_select %p3201_p3, [#allocation0], [#allocation16] }
  0xa4   : > { %s488_s13 = sshll.u32 %s469_s11, 4  ;;  %s2655_s26 = smov 512   ;;  %s489_s13 = int_to_ptr.vmem [resolvable:$true] %s488_s13 }
  0xa5   : > { %s480_s4 = sld [smem:[%s2197_s1]]   ;;  %s2656_s21 = smov 256  }
  0xa6   : > { %2198 = sst [smem:[#allocation15]] (%p3201_p3), %s2655_s26  ;;  %s2657_s19 = smov 4  }
  0xa7   : > { %2199 = sst [smem:[#allocation15 + $0x1]] (%p3201_p3), %s2656_s21  ;;  %s2658_s20 = smov 64  }
  0xa8   : > { %2200 = sst [smem:[#allocation15 + $0x2]] (%p3201_p3), %s2657_s19  ;;  %s466_s12 = scalar_lea.sflag [#allocation3], %s465_s28 }
  0xa9   : > { %2201 = sst [smem:[#allocation15 + $0x3]] (%p3201_p3), %s2658_s20  ;;  %s2659_s18 = smov [#allocation14]  }
  0xaa   : > { %2202 = sst [smem:[#allocation15 + $0x4]] (%p3201_p3), %s2658_s20 }
  0xab   : > { %s1889_s29 = sshll.u32 %s480_s4, 26  ;;  %2203 = sst [smem:[#allocation15 + $0x5]] (%p3201_p3), %s2657_s19 }
  0xac   : > { %s1890_s6 = sadd.s32 134217728, %s1889_s29 }
  0xad   : > { %2204 = dma.general (%p3201_p3), %s475_s25, 512, %s489_s13, %s466_s12, %s2659_s18, [#allocation15], %s1890_s6, 0  }
  0xae PF: > { %p3202_p2 = scmp.ne.s32.totalorder %s3197_s27, 0 }
  0xaf   : > { %s2956_s22 = sand.u32 (!%p3202_p2), 1, %s2638_s30   ;;  %p3203_p5 = scmp.ne.s32.totalorder (!%p3202_p2), %s3192_s24, 0 }
  0xb0   : > { %513 = sbr.rel (%p3202_p2) target bundleno = 1679 (0x68f), region = 76  ;;  %s1892_s1 = sshll.u32 (!%p3202_p2), %s2956_s22, 5 }
  0xb1   : > { %s516_s9 = scalar_lea.sflag (!%p3202_p2), [#allocation3], %s2956_s22  ;;  %s2960_s14 = scalar_lea.vmem (!%p3202_p2), [#allocation2], %s1892_s1 }
  0xb7   : > { %2613 = dma.done.wait (%p3203_p5), %s516_s9, 512  }
  0xb8   : > { %2615 = vsyncadd (%p3203_p5), %s516_s9, 4294966784  ;;  %p3204_p6 = scmp.eq.s32.totalorder %s2760_s17, 0 }
  0xba   : > { %2617 = dma.done.wait (%p3204_p6), [#allocation6], 2048   ;;  %p3205_p11 = pmov %p3204_p6 }
  0xbb   : > { %p3206_p12 = pmov %p3204_p6 }
  0xbc   : > { %2619 = vsyncadd (%p3205_p11), [#allocation6], 4294965248 }
  0xbd   : > { %2621 = dma.done.wait (%p3206_p12), [#allocation9], 1024   ;;  %p3207_p13 = pmov %p3204_p6 }
  0xbe   : > { %p3208_p0 = pmov %p3204_p6 }
  0xbf   : > { %2623 = vsyncadd (%p3207_p13), [#allocation9], 4294966272 }
  0xc0   : > { %2625 = dma.done.wait (%p3208_p0), [#allocation12], 1024   ;;  %p3209_p7 = pmov %p3208_p0 }
  0xc1   : > { %v2296_v0 = vld [vmem:[#allocation5] sm:$0xff]   ;;  %v2297_v1 = vld [vmem:[#allocation5 + $0x8] sm:$0xff]   ;;  %v2298_v2 = vld [vmem:[#allocation5 + $0x10] sm:$0xff]   ;;  %s3210_s24 = sld [smem:[#allocation28_spill]]  ;;  %s3211_s25 = sld [smem:[#allocation29_spill]] }
  0xc2   : > { %2627 = vsyncadd (%p3209_p7), [#allocation12], 4294966272  ;;  %2067 = vmatprep.subr.bf16.mxu0 %v2296_v0  ;;  %v2299_v3 = vld [vmem:[#allocation5 + $0x18] sm:$0xff]   ;;  %v2304_v4 = vld [vmem:[%s2960_s14] sm:$0xff]   ;;  %s3212_s13 = sld [smem:[#allocation32_spill]]  ;;  %s3213_s1 = sld [smem:[#allocation30_spill]] }
  0xc3   : > { %2068 = vmatpush3.bf16.msra.mxu0 %v2296_v0  ;;  %2083 = vmatprep.mubr.bf16.mxu0 %v2304_v4  ;;  %v2300_v5 = vld [vmem:[#allocation5 + $0x20] sm:$0xff]   ;;  %v2309_v7 = vld [vmem:[#allocation7 + $0x8] sm:$0xff]   ;;  %v2302_v9 = vld [vmem:[#allocation5 + $0x30] sm:$0xff]   ;;  %s3214_s11 = sld [smem:[#allocation31_spill]]  ;;  %s3215_s19 = sld [smem:[#allocation33_spill]] }
  0xc4   : > { %2069 = vmatprep.subr.bf16.mxu0 %v2297_v1  ;;  %v2308_v6 = vld [vmem:[#allocation7] sm:$0xff]   ;;  %v2301_v8 = vld [vmem:[#allocation5 + $0x28] sm:$0xff]   ;;  %v2303_v10 = vld [vmem:[#allocation5 + $0x38] sm:$0xff]   ;;  %s1898_s20 = sshll.u32 %s2956_s22, 6  ;;  %s2008_s12 = sshll.u32 %s2760_s17, 10 }
  0xc5   : > { %2091 = vmatprep.subr.bf16.mxu1 %v2308_v6  ;;  %v2305_v11 = vld [vmem:[%s2960_s14 + $0x8] sm:$0xff]   ;;  %v2306_v12 = vld [vmem:[%s2960_s14 + $0x10] sm:$0xff]   ;;  %v2307_v13 = vld [vmem:[%s2960_s14 + $0x18] sm:$0xff]   ;;  %s583_s29 = scalar_lea.vmem [#allocation13], %s1898_s20  ;;  %s3216_s18 = sld [smem:[#allocation25_spill]] }
  0xc6   : > { %2092 = vmatpush3.bf16.msra.mxu1 %v2308_v6  ;;  %v2310_v14 = vld [vmem:[#allocation7 + $0x10] sm:$0xff]   ;;  %v2311_v15 = vld [vmem:[#allocation7 + $0x18] sm:$0xff]   ;;  %v2312_v16 = vld [vmem:[#allocation7 + $0x20] sm:$0xff]   ;;  %s1757_s6 = sshll.u32 %s583_s29, 4  ;;  %s3217_s14 = sld [smem:[#allocation34_spill]]  ;;  %s3103_s6 = int_to_ptr.vmem [resolvable:$true] %s1757_s6 }
  0xc7   : > { %2070 = vmatpush3.bf16.msra.mxu0 %v2297_v1  ;;  %2093 = vmatprep.subr.bf16.mxu1 %v2309_v7  ;;  %v2313_v17 = vld [vmem:[#allocation7 + $0x28] sm:$0xff]   ;;  %v2314_v18 = vld [vmem:[#allocation7 + $0x30] sm:$0xff]   ;;  %v2315_v19 = vld [vmem:[#allocation7 + $0x38] sm:$0xff]   ;;  %s1743_s17 = scalar_lea.sflag [#allocation4], %s2956_s22  ;;  %s2661_s27 = smov [#allocation13]  }
  0xc8   : > { %2071 = vmatprep.subr.bf16.mxu0 %v2298_v2  ;;  %v2316_v20 = vld [vmem:[%s3157_s5] sm:$0xff]   ;;  %v2317_v21 = vld [vmem:[%s3157_s5 + $0x8] sm:$0xff]   ;;  %s2572_s28 = sshll.u32 %s2661_s27, 4  ;;  %s2573_s28 = int_to_ptr.vmem [resolvable:$false] %s2572_s28 }
  0xc9   : > { %v1899_v22 = vld [vmem:[%s3154_s2] ss:$0 sm:$0xff]  ;;  %p2575_p3 = scmp.lt.s32.totalorder %s3103_s6, %s2573_s28 }
  0xca   : > { %2094 = vmatpush3.bf16.msra.mxu1 %v2309_v7 }
  0xcb   : > { %2072 = vmatpush3.bf16.msra.mxu0 %v2298_v2  ;;  %2095 = vmatprep.subr.bf16.mxu1 %v2310_v14  ;;  %p3218_p9 = scmp.ne.s32.totalorder %s3216_s18, 0 }
  0xcc   : > { %2073 = vmatprep.subr.bf16.mxu0 %v2299_v3  ;;  %s3108_s23 = scalar_lea.hbm %s3217_s14, %s2008_s12 }
  0xce   : > { %2096 = vmatpush3.bf16.msra.mxu1 %v2310_v14 }
  0xcf   : > { %2074 = vmatpush3.bf16.msra.mxu0 %v2299_v3  ;;  %2097 = vmatprep.subr.bf16.mxu1 %v2311_v15 }
  0xd0   : > { %2075 = vmatprep.subr.bf16.mxu0 %v2300_v5 }
  0xd2   : > { %2098 = vmatpush3.bf16.msra.mxu1 %v2311_v15 }
  0xd3   : > { %2076 = vmatpush3.bf16.msra.mxu0 %v2300_v5  ;;  %2099 = vmatprep.subr.bf16.mxu1 %v2312_v16 }
  0xd4   : > { %2077 = vmatprep.subr.bf16.mxu0 %v2301_v8 }
  0xd6   : > { %2100 = vmatpush3.bf16.msra.mxu1 %v2312_v16 }
  0xd7   : > { %2078 = vmatpush3.bf16.msra.mxu0 %v2301_v8  ;;  %2101 = vmatprep.subr.bf16.mxu1 %v2313_v17 }
  0xd8   : > { %2079 = vmatprep.subr.bf16.mxu0 %v2302_v9 }
  0xda   : > { %2102 = vmatpush3.bf16.msra.mxu1 %v2313_v17 }
  0xdb   : > { %2080 = vmatpush3.bf16.msra.mxu0 %v2302_v9  ;;  %2103 = vmatprep.subr.bf16.mxu1 %v2314_v18 }
  0xdc   : > { %2081 = vmatprep.subr.bf16.mxu0 %v2303_v10 }
  0xde   : > { %2104 = vmatpush3.bf16.msra.mxu1 %v2314_v18 }
  0xdf   : > { %2082 = vmatpush3.bf16.msra.mxu0 %v2303_v10  ;;  %2105 = vmatprep.subr.bf16.mxu1 %v2315_v19 }
  0xe0   : > { %2115 = vmatprep.subr.bf16.mxu0 %v2316_v20 }
  0xe2   : > { %2084 = vmatmul.mubr.bf16.vlgmr.msra.gmra.mrb[0].mxu0 %v2305_v11  ;;  %2106 = vmatpush3.bf16.msra.mxu1 %v2315_v19 }
  0xe3   : > { %2087 = vmatprep.mubr.bf16.mxu0 %v2306_v12  ;;  %2116 = vmatpush3.bf16.msra.mxu0 %v2316_v20 }
  0xe4   : > { %2117 = vmatprep.subr.bf16.mxu0 %v2317_v21 }
  0xe7   : > { %2118 = vmatpush3.bf16.msra.mxu0 %v2317_v21 }
  0xea   : > { %2088 = vmatmul.mubr.bf16.gmra.mrb[4].mxu0 %v2307_v13 }
 0x1b5   : > { %v2085_v23 = vpop.f32.mrb[0].mxu0 }
 0x1b6   : > { %v733_v24 = vadd.f32 %v2085_v23, %v1899_v22  ;;  %v724_v25 = vpop.f32.mrb[1].mxu0 }
 0x1b7   : > { %v725_v26 = vadd.f32 %v1899_v22, %v724_v25  ;;  %v2086_v27 = vpop.f32.mrb[2].mxu0 }
 0x1b8   : > { %v775_v28 = vmul.f32 1.442695, %v733_v24  ;;  %v736_v29 = vadd.f32 %v2086_v27, %v1899_v22  ;;  %v727_v30 = vpop.f32.mrb[3].mxu0  ;;  %v765_v55 = vmul.f32 1.050701, %v733_v24  ;;  %vm757_vm0 = vcmp.gt.f32.partialorder %v733_v24, 0.0 }
 0x1b9   : > { %v771_v31 = vmul.f32 1.442695, %v725_v26  ;;  %v728_v32 = vadd.f32 %v1899_v22, %v727_v30  ;;  %v763_v58 = vmul.f32 1.050701, %v725_v26  ;;  %vm755_vm2 = vcmp.gt.f32.partialorder %v725_v26, 0.0  ;;  %v2318_v27 = vld [vmem:[%s3157_s5 + $0x10] sm:$0xff]  }
 0x1ba   : > { %2364 = vpow2.f32 %v775_v28  ;;  %v777_v33 = vmul.f32 1.442695, %v736_v29  ;;  %v766_v59 = vmul.f32 1.050701, %v736_v29  ;;  %vm758_vm1 = vcmp.gt.f32.partialorder %v736_v29, 0.0  ;;  %2119 = vmatprep.subr.bf16.mxu0 %v2318_v27  ;;  %v2319_v28 = vld [vmem:[%s3157_s5 + $0x18] sm:$0xff]  }
 0x1bb   : > { %2366 = vpow2.f32 %v771_v31  ;;  %v773_v34 = vmul.f32 1.442695, %v728_v32  ;;  %v764_v61 = vmul.f32 1.050701, %v728_v32  ;;  %vm756_vm3 = vcmp.gt.f32.partialorder %v728_v32, 0.0  ;;  %2120 = vmatpush3.bf16.msra.mxu0 %v2318_v27  ;;  %v2320_v29 = vld [vmem:[%s3157_s5 + $0x20] sm:$0xff]  }
 0x1bc   : > { %2368 = vpow2.f32 %v777_v33  ;;  %2121 = vmatprep.subr.bf16.mxu0 %v2319_v28  ;;  %v2321_v30 = vld [vmem:[%s3157_s5 + $0x28] sm:$0xff]   ;;  %v2322_v31 = vld [vmem:[%s3157_s5 + $0x30] sm:$0xff]   ;;  %v2323_v32 = vld [vmem:[%s3157_s5 + $0x38] sm:$0xff]  }
 0x1bd   : > { %2370 = vpow2.f32 %v773_v34  ;;  %v2089_v35 = vpop.f32.mrb[4].mxu0  ;;  %v1920_v33 = vld [vmem:[%s3210_s24] ss:$0 sm:$0xff]  ;;  %s2568_s24 = scalar_lea.vmem %s3103_s6, 1024 }
 0x1be   : > { %v2991_v36 = vadd.f32 %v2089_v35, %v1899_v22  ;;  %v740_v37 = vpop.f32.mrb[5].mxu0  ;;  %p2569_p8 = scmp.ne.s32.totalorder %s3103_s6, %s2568_s24 }
 0x1bf   : > { %v2993_v38 = vadd.f32 %v1899_v22, %v740_v37  ;;  %v2090_v39 = vpop.f32.mrb[6].mxu0  ;;  %2122 = vmatpush3.bf16.msra.mxu0 %v2319_v28 }
 0x1c0   : > { %v783_v40 = vmul.f32 1.442695, %v2991_v36  ;;  %v752_v41 = vadd.f32 %v2090_v39, %v1899_v22  ;;  %v743_v42 = vpop.f32.mrb[7].mxu0  ;;  %v769_v13 = vmul.f32 1.050701, %v2991_v36  ;;  %vm761_vm4 = vcmp.gt.f32.partialorder %v2991_v36, 0.0  ;;  %2123 = vmatprep.subr.bf16.mxu0 %v2320_v29  ;;  %p2570_p10 = pnand %p2569_p8, %p3218_p9 }
 0x1c1   : > { %v779_v43 = vmul.f32 1.442695, %v2993_v38  ;;  %v744_v44 = vadd.f32 %v1899_v22, %v743_v42  ;;  %v767_v16 = vmul.f32 1.050701, %v2993_v38  ;;  %vm759_vm6 = vcmp.gt.f32.partialorder %v2993_v38, 0.0 }
 0x1c2   : > { %2372 = vpow2.f32 %v783_v40  ;;  %v785_v45 = vmul.f32 1.442695, %v752_v41  ;;  %v770_v17 = vmul.f32 1.050701, %v752_v41  ;;  %vm762_vm5 = vcmp.gt.f32.partialorder %v752_v41, 0.0  ;;  %p2571_p1 = pneg %p2570_p10 }
 0x1c3   : > { %2374 = vpow2.f32 %v779_v43  ;;  %v781_v46 = vmul.f32 1.442695, %v744_v44  ;;  %v768_v19 = vmul.f32 1.050701, %v744_v44  ;;  %vm760_vm7 = vcmp.gt.f32.partialorder %v744_v44, 0.0  ;;  %2124 = vmatpush3.bf16.msra.mxu0 %v2320_v29 }
 0x1c4   : > { %v2365_v47 = vpop.eup %2364  ;;  %2376 = vpow2.f32 %v785_v45  ;;  %2125 = vmatprep.subr.bf16.mxu0 %v2321_v30 }
 0x1c5   : > { %v2367_v48 = vpop.eup %2366  ;;  %v1914_v49 = vadd.f32 -1.0, %v2365_v47  ;;  %2378 = vpow2.f32 %v781_v46 }
 0x1c6   : > { %v2369_v50 = vpop.eup %2368  ;;  %v1912_v51 = vadd.f32 -1.0, %v2367_v48 }
 0x1c7   : > { %v2371_v52 = vpop.eup %2370  ;;  %v797_v53 = vmul.f32 1.7580993, %v1914_v49  ;;  %v1915_v54 = vadd.f32 -1.0, %v2369_v50  ;;  %2126 = vmatpush3.bf16.msra.mxu0 %v2321_v30 }
 0x1c8   : > { %v1913_v56 = vadd.f32 -1.0, %v2371_v52  ;;  %v795_v57 = vmul.f32 1.7580993, %v1912_v51  ;;  %2127 = vmatprep.subr.bf16.mxu0 %v2322_v31 }
 0x1c9   : > { %v798_v60 = vmul.f32 1.7580993, %v1915_v54  ;;  %v805_v63 = vsel %vm757_vm0, %v765_v55, %v797_v53 }
 0x1ca   : > { %v796_v62 = vmul.f32 1.7580993, %v1913_v56  ;;  %v803_v2 = vsel %vm755_vm2, %v763_v58, %v795_v57 }
 0x1cb   : > { %v806_v0 = vsel %vm758_vm1, %v766_v59, %v798_v60  ;;  %2128 = vmatpush3.bf16.msra.mxu0 %v2322_v31 }
 0x1cc   : > { %v2373_v1 = vpop.eup %2372  ;;  %v804_v3 = vsel %vm756_vm3, %v764_v61, %v796_v62  ;;  %v812_v4 = vpack.c.bf16 %v806_v0, %v805_v63  ;;  %2129 = vmatprep.subr.bf16.mxu0 %v2323_v32 }
 0x1cd   : > { %v2375_v5 = vpop.eup %2374  ;;  %v1918_v6 = vadd.f32 -1.0, %v2373_v1  ;;  %v811_v7 = vpack.c.bf16 %v804_v3, %v803_v2 }
 0x1ce   : > { %v2377_v8 = vpop.eup %2376  ;;  %v1916_v9 = vadd.f32 -1.0, %v2375_v5 }
 0x1cf   : > { %v2379_v10 = vpop.eup %2378  ;;  %v801_v11 = vmul.f32 1.7580993, %v1918_v6  ;;  %v1919_v12 = vadd.f32 -1.0, %v2377_v8  ;;  %2107 = vmatprep.mubr.bf16.mxu1 %v811_v7  ;;  %2130 = vmatpush3.bf16.msra.mxu0 %v2323_v32 }
 0x1d0   : > { %v799_v14 = vmul.f32 1.7580993, %v1916_v9  ;;  %v1917_v15 = vadd.f32 -1.0, %v2379_v10  ;;  %2108 = vmatmul.mubr.bf16.vlgmr.msra.gmra.mrb[0].mxu1 %v812_v4 }
 0x1d1   : > { %v802_v18 = vmul.f32 1.7580993, %v1919_v12  ;;  %v809_v21 = vsel %vm761_vm4, %v769_v13, %v801_v11 }
 0x1d2   : > { %v800_v20 = vmul.f32 1.7580993, %v1917_v15  ;;  %v807_v23 = vsel %vm759_vm6, %v767_v16, %v799_v14 }
 0x1d3   : > { %v810_v22 = vsel %vm762_vm5, %v770_v17, %v802_v18 }
 0x1d4   : > { %v808_v24 = vsel %vm760_vm7, %v768_v19, %v800_v20  ;;  %v814_v25 = vpack.c.bf16 %v810_v22, %v809_v21 }
 0x1d5   : > { %v813_v26 = vpack.c.bf16 %v808_v24, %v807_v23 }
 0x1d7   : > { %2111 = vmatprep.mubr.bf16.mxu1 %v813_v26 }
 0x1d8   : > { %2112 = vmatmul.mubr.bf16.gmra.mrb[4].mxu1 %v814_v25 }
 0x2a3   : > { %v2109_v34 = vpop.f32.mrb[0].mxu1 }
 0x2a4   : > { %v929_v35 = vadd.f32 %v2109_v34, %v1920_v33  ;;  %v920_v36 = vpop.f32.mrb[1].mxu1 }
 0x2a5   : > { %v921_v37 = vadd.f32 %v1920_v33, %v920_v36  ;;  %v2110_v38 = vpop.f32.mrb[2].mxu1 }
 0x2a6   : > { %v971_v39 = vmul.f32 1.442695, %v929_v35  ;;  %v932_v40 = vadd.f32 %v2110_v38, %v1920_v33  ;;  %v923_v41 = vpop.f32.mrb[3].mxu1  ;;  %v961_v2 = vmul.f32 1.050701, %v929_v35  ;;  %vm953_vm8 = vcmp.gt.f32.partialorder %v929_v35, 0.0 }
 0x2a7   : > { %v967_v42 = vmul.f32 1.442695, %v921_v37  ;;  %v924_v43 = vadd.f32 %v1920_v33, %v923_v41  ;;  %v959_v5 = vmul.f32 1.050701, %v921_v37  ;;  %vm951_vm10 = vcmp.gt.f32.partialorder %v921_v37, 0.0  ;;  %v2324_v38 = vld [vmem:[#allocation10] sm:$0xff]  }
 0x2a8   : > { %2380 = vpow2.f32 %v971_v39  ;;  %v973_v44 = vmul.f32 1.442695, %v932_v40  ;;  %v962_v6 = vmul.f32 1.050701, %v932_v40  ;;  %vm954_vm9 = vcmp.gt.f32.partialorder %v932_v40, 0.0  ;;  %2139 = vmatprep.subr.bf16.mxu1 %v2324_v38  ;;  %v2325_v39 = vld [vmem:[#allocation10 + $0x8] sm:$0xff]  }
 0x2a9   : > { %2382 = vpow2.f32 %v967_v42  ;;  %v969_v45 = vmul.f32 1.442695, %v924_v43  ;;  %v960_v8 = vmul.f32 1.050701, %v924_v43  ;;  %vm952_vm11 = vcmp.gt.f32.partialorder %v924_v43, 0.0  ;;  %2140 = vmatpush3.bf16.msra.mxu1 %v2324_v38  ;;  %v2326_v40 = vld [vmem:[#allocation10 + $0x10] sm:$0xff]  }
 0x2aa   : > { %2384 = vpow2.f32 %v973_v44  ;;  %2141 = vmatprep.subr.bf16.mxu1 %v2325_v39  ;;  %v2327_v41 = vld [vmem:[#allocation10 + $0x18] sm:$0xff]   ;;  %v3032_v42 = vld [vmem:[#allocation8] sm:$0xff]   ;;  %v2333_v44 = vld [vmem:[#allocation11 + $0x8] sm:$0xff]  }
 0x2ab   : > { %2386 = vpow2.f32 %v969_v45  ;;  %v2113_v46 = vpop.f32.mrb[4].mxu1  ;;  %v2332_v43 = vld [vmem:[#allocation11] sm:$0xff]  }
 0x2ac   : > { %v3022_v47 = vadd.f32 %v2113_v46, %v1920_v33  ;;  %v936_v48 = vpop.f32.mrb[5].mxu1  ;;  %2163 = vmatprep.subr.bf16.mxu0 %v2332_v43  ;;  %v1937_v45 = vld [vmem:[%s3211_s25] ss:$0 sm:$0xff]  ;;  %s2574_s25 = scalar_lea.vmem %s2573_s28, 2048 }
 0x2ad   : > { %v3024_v49 = vadd.f32 %v1920_v33, %v936_v48  ;;  %v2114_v50 = vpop.f32.mrb[6].mxu1  ;;  %2142 = vmatpush3.bf16.msra.mxu1 %v2325_v39  ;;  %p2576_p2 = scmp.lt.s32.totalorder %s2574_s25, %s2568_s24 }
 0x2ae   : > { %v979_v51 = vmul.f32 1.442695, %v3022_v47  ;;  %v948_v52 = vadd.f32 %v2114_v50, %v1920_v33  ;;  %v939_v53 = vpop.f32.mrb[7].mxu1  ;;  %v965_v24 = vmul.f32 1.050701, %v3022_v47  ;;  %vm957_vm12 = vcmp.gt.f32.partialorder %v3022_v47, 0.0  ;;  %2143 = vmatprep.subr.bf16.mxu1 %v2326_v40 }
 0x2af   : > { %v975_v54 = vmul.f32 1.442695, %v3024_v49  ;;  %v940_v55 = vadd.f32 %v1920_v33, %v939_v53  ;;  %v963_v27 = vmul.f32 1.050701, %v3024_v49  ;;  %vm955_vm14 = vcmp.gt.f32.partialorder %v3024_v49, 0.0  ;;  %p2577_p5 = por %p2576_p2, %p2575_p3 }
 0x2b0   : > { %2388 = vpow2.f32 %v979_v51  ;;  %v981_v56 = vmul.f32 1.442695, %v948_v52  ;;  %v966_v28 = vmul.f32 1.050701, %v948_v52  ;;  %vm958_vm13 = vcmp.gt.f32.partialorder %v948_v52, 0.0 }
 0x2b1   : > { %2390 = vpow2.f32 %v975_v54  ;;  %v977_v57 = vmul.f32 1.442695, %v940_v55  ;;  %v964_v30 = vmul.f32 1.050701, %v940_v55  ;;  %vm956_vm15 = vcmp.gt.f32.partialorder %v940_v55, 0.0  ;;  %2144 = vmatpush3.bf16.msra.mxu1 %v2326_v40  ;;  %p2578_p6 = pnand %p2577_p5, %p2571_p1 }
 0x2b2   : > { %v2381_v58 = vpop.eup %2380  ;;  %2392 = vpow2.f32 %v981_v56  ;;  %2145 = vmatprep.subr.bf16.mxu1 %v2327_v41 }
 0x2b3   : > { %v2383_v59 = vpop.eup %2382  ;;  %v1931_v60 = vadd.f32 -1.0, %v2381_v58  ;;  %2394 = vpow2.f32 %v977_v57 }
 0x2b4   : > { %v2385_v61 = vpop.eup %2384  ;;  %v1929_v62 = vadd.f32 -1.0, %v2383_v59 }
 0x2b5   : > { %v2387_v63 = vpop.eup %2386  ;;  %v993_v0 = vmul.f32 1.7580993, %v1931_v60  ;;  %v1932_v1 = vadd.f32 -1.0, %v2385_v61  ;;  %2146 = vmatpush3.bf16.msra.mxu1 %v2327_v41 }
 0x2b6   : > { %v991_v3 = vmul.f32 1.7580993, %v1929_v62  ;;  %v1930_v4 = vadd.f32 -1.0, %v2387_v63  ;;  %2151 = vmatprep.subr.bf16.mxu1 %v3032_v42 }
 0x2b7   : > { %v994_v7 = vmul.f32 1.7580993, %v1932_v1  ;;  %v1001_v10 = vsel %vm953_vm8, %v961_v2, %v993_v0  ;;  %vm1247_vm8 = vcmask 523264  }
 0x2b8   : > { %v992_v9 = vmul.f32 1.7580993, %v1930_v4  ;;  %v999_v14 = vsel %vm951_vm10, %v959_v5, %v991_v3 }
 0x2b9   : > { %v1002_v11 = vsel %vm954_vm9, %v962_v6, %v994_v7 }
 0x2ba   : > { %v2389_v12 = vpop.eup %2388  ;;  %v1008_v13 = vpack.c.bf16 %v1002_v11, %v1001_v10  ;;  %v1000_v15 = vsel %vm952_vm11, %v960_v8, %v992_v9 }
 0x2bb   : > { %v2391_v16 = vpop.eup %2390  ;;  %v1935_v17 = vadd.f32 -1.0, %v2389_v12  ;;  %v1007_v18 = vpack.c.bf16 %v1000_v15, %v999_v14 }
 0x2bc   : > { %v2393_v19 = vpop.eup %2392  ;;  %v1933_v20 = vadd.f32 -1.0, %v2391_v16 }
 0x2bd   : > { %v2395_v21 = vpop.eup %2394  ;;  %v997_v22 = vmul.f32 1.7580993, %v1935_v17  ;;  %v1936_v23 = vadd.f32 -1.0, %v2393_v19  ;;  %2131 = vmatprep.mubr.bf16.mxu0 %v1007_v18 }
 0x2be   : > { %v995_v25 = vmul.f32 1.7580993, %v1933_v20  ;;  %v1934_v26 = vadd.f32 -1.0, %v2395_v21  ;;  %2132 = vmatmul.mubr.bf16.vlgmr.msra.gmra.mrb[8].mxu0 %v1008_v13 }
 0x2bf   : > { %v998_v29 = vmul.f32 1.7580993, %v1936_v23  ;;  %v1005_v32 = vsel %vm957_vm12, %v965_v24, %v997_v22  ;;  %2164 = vmatpush3.bf16.msra.mxu0 %v2332_v43 }
 0x2c0   : > { %v996_v31 = vmul.f32 1.7580993, %v1934_v26  ;;  %v1003_v34 = vsel %vm955_vm14, %v963_v27, %v995_v25  ;;  %2165 = vmatprep.subr.bf16.mxu0 %v2333_v44 }
 0x2c1   : > { %v1006_v33 = vsel %vm958_vm13, %v966_v28, %v998_v29 }
 0x2c2   : > { %v1004_v35 = vsel %vm956_vm15, %v964_v30, %v996_v31  ;;  %v1010_v36 = vpack.c.bf16 %v1006_v33, %v1005_v32 }
 0x2c3   : > { %v1009_v37 = vpack.c.bf16 %v1004_v35, %v1003_v34  ;;  %2166 = vmatpush3.bf16.msra.mxu0 %v2333_v44 }
 0x2c5   : > { %2135 = vmatprep.mubr.bf16.mxu0 %v1009_v37 }
 0x2c6   : > { %2136 = vmatmul.mubr.bf16.gmra.mrb[12].mxu0 %v1010_v36 }
 0x391   : > { %v2133_v46 = vpop.f32.mrb[8].mxu0 }
 0x392   : > { %v1125_v47 = vadd.f32 %v2133_v46, %v1937_v45  ;;  %v1116_v48 = vpop.f32.mrb[9].mxu0 }
 0x393   : > { %v1117_v49 = vadd.f32 %v1937_v45, %v1116_v48  ;;  %v2134_v50 = vpop.f32.mrb[10].mxu0 }
 0x394   : > { %v1167_v51 = vmul.f32 1.442695, %v1125_v47  ;;  %v1128_v52 = vadd.f32 %v2134_v50, %v1937_v45  ;;  %v1119_v53 = vpop.f32.mrb[11].mxu0  ;;  %v1157_v14 = vmul.f32 1.050701, %v1125_v47  ;;  %vm1149_vm0 = vcmp.gt.f32.partialorder %v1125_v47, 0.0 }
 0x395   : > { %v1163_v54 = vmul.f32 1.442695, %v1117_v49  ;;  %v1120_v55 = vadd.f32 %v1937_v45, %v1119_v53  ;;  %v1155_v17 = vmul.f32 1.050701, %v1117_v49  ;;  %vm1147_vm2 = vcmp.gt.f32.partialorder %v1117_v49, 0.0  ;;  %v2331_v53 = vld [vmem:[#allocation8 + $0x18] sm:$0xff]  }
 0x396   : > { %2396 = vpow2.f32 %v1167_v51  ;;  %v1169_v56 = vmul.f32 1.442695, %v1128_v52  ;;  %v1158_v18 = vmul.f32 1.050701, %v1128_v52  ;;  %vm1150_vm1 = vcmp.gt.f32.partialorder %v1128_v52, 0.0  ;;  %v2329_v51 = vld [vmem:[#allocation8 + $0x8] sm:$0xff]  }
 0x397   : > { %2398 = vpow2.f32 %v1163_v54  ;;  %v1165_v57 = vmul.f32 1.442695, %v1120_v55  ;;  %v1156_v20 = vmul.f32 1.050701, %v1120_v55  ;;  %vm1148_vm3 = vcmp.gt.f32.partialorder %v1120_v55, 0.0  ;;  %v2330_v52 = vld [vmem:[#allocation8 + $0x10] sm:$0xff]  }
 0x398   : > { %2400 = vpow2.f32 %v1169_v56  ;;  %v2334_v54 = vld [vmem:[#allocation11 + $0x10] sm:$0xff]   ;;  %v2335_v55 = vld [vmem:[#allocation11 + $0x18] sm:$0xff]   ;;  %v2336_v56 = vld [vmem:[#allocation11 + $0x20] sm:$0xff]  }
 0x399   : > { %2402 = vpow2.f32 %v1165_v57  ;;  %v2137_v58 = vpop.f32.mrb[12].mxu0  ;;  %2167 = vmatprep.subr.bf16.mxu0 %v2334_v54  ;;  %v2338_v57 = vld [vmem:[#allocation11 + $0x30] sm:$0xff]  }
 0x39a   : > { %v1141_v59 = vadd.f32 %v2137_v58, %v1937_v45  ;;  %v1132_v60 = vpop.f32.mrb[13].mxu0  ;;  %2168 = vmatpush3.bf16.msra.mxu0 %v2334_v54  ;;  %v2339_v58 = vld [vmem:[#allocation11 + $0x38] sm:$0xff]  }
 0x39b   : > { %v3038_v61 = vadd.f32 %v1937_v45, %v1132_v60  ;;  %v2138_v62 = vpop.f32.mrb[14].mxu0  ;;  %2169 = vmatprep.subr.bf16.mxu0 %v2335_v55  ;;  %v2342_v60 = vld [vmem:[%s3212_s13 + $0x4] ss:$8 sps:$4 sm:$0xff]  }
 0x39c   : > { %v1175_v63 = vmul.f32 1.442695, %v1141_v59  ;;  %v1144_v0 = vadd.f32 %v2138_v62, %v1937_v45  ;;  %v1135_v1 = vpop.f32.mrb[15].mxu0  ;;  %v1161_v36 = vmul.f32 1.050701, %v1141_v59  ;;  %vm1153_vm4 = vcmp.gt.f32.partialorder %v1141_v59, 0.0 }
 0x39d   : > { %v1171_v2 = vmul.f32 1.442695, %v3038_v61  ;;  %v1136_v3 = vadd.f32 %v1937_v45, %v1135_v1  ;;  %v1159_v39 = vmul.f32 1.050701, %v3038_v61  ;;  %vm1151_vm6 = vcmp.gt.f32.partialorder %v3038_v61, 0.0 }
 0x39e   : > { %2404 = vpow2.f32 %v1175_v63  ;;  %v1177_v4 = vmul.f32 1.442695, %v1144_v0  ;;  %v1162_v40 = vmul.f32 1.050701, %v1144_v0  ;;  %vm1154_vm5 = vcmp.gt.f32.partialorder %v1144_v0, 0.0  ;;  %2170 = vmatpush3.bf16.msra.mxu0 %v2335_v55 }
 0x39f   : > { %2406 = vpow2.f32 %v1171_v2  ;;  %v1173_v5 = vmul.f32 1.442695, %v1136_v3  ;;  %v1160_v43 = vmul.f32 1.050701, %v1136_v3  ;;  %vm1152_vm7 = vcmp.gt.f32.partialorder %v1136_v3, 0.0  ;;  %2171 = vmatprep.subr.bf16.mxu0 %v2336_v56 }
 0x3a0   : > { %v2397_v6 = vpop.eup %2396  ;;  %2408 = vpow2.f32 %v1177_v4  ;;  %v2340_v59 = vld [vmem:[%s3212_s13] ss:$8 sps:$4 sm:$0xff]   ;;  %v2345_v61 = vld [vmem:[%s3212_s13 + $0x14] ss:$8 sps:$4 sm:$0xff]   ;;  %v2343_v62 = vld [vmem:[%s3212_s13 + $0x10] ss:$8 sps:$4 sm:$0xff]  }
 0x3a1   : > { %v2399_v7 = vpop.eup %2398  ;;  %v1948_v8 = vadd.f32 -1.0, %v2397_v6  ;;  %2410 = vpow2.f32 %v1173_v5  ;;  %v1966_v63 = vld [vmem:[%s3213_s1] ss:$0 sm:$0xff] }
 0x3a2   : > { %v2401_v9 = vpop.eup %2400  ;;  %v1946_v10 = vadd.f32 -1.0, %v2399_v7  ;;  %2172 = vmatpush3.bf16.msra.mxu0 %v2336_v56 }
 0x3a3   : > { %v2403_v11 = vpop.eup %2402  ;;  %v1189_v12 = vmul.f32 1.7580993, %v1948_v8  ;;  %v1949_v13 = vadd.f32 -1.0, %v2401_v9 }
 0x3a4   : > { %v1187_v15 = vmul.f32 1.7580993, %v1946_v10  ;;  %v1947_v16 = vadd.f32 -1.0, %v2403_v11 }
 0x3a5   : > { %v1190_v19 = vmul.f32 1.7580993, %v1949_v13  ;;  %v1197_v22 = vsel %vm1149_vm0, %v1157_v14, %v1189_v12 }
 0x3a6   : > { %v1188_v21 = vmul.f32 1.7580993, %v1947_v16  ;;  %v1195_v25 = vsel %vm1147_vm2, %v1155_v17, %v1187_v15 }
 0x3a7   : > { %v1198_v23 = vsel %vm1150_vm1, %v1158_v18, %v1190_v19 }
 0x3a8   : > { %v2405_v24 = vpop.eup %2404  ;;  %v1204_v26 = vpack.c.bf16 %v1198_v23, %v1197_v22  ;;  %v1196_v27 = vsel %vm1148_vm3, %v1156_v20, %v1188_v21 }
 0x3a9   : > { %v2407_v28 = vpop.eup %2406  ;;  %v1952_v29 = vadd.f32 -1.0, %v2405_v24  ;;  %v1203_v30 = vpack.c.bf16 %v1196_v27, %v1195_v25 }
 0x3aa   : > { %v2409_v31 = vpop.eup %2408  ;;  %v1950_v32 = vadd.f32 -1.0, %v2407_v28 }
 0x3ab   : > { %v2411_v33 = vpop.eup %2410  ;;  %v1193_v34 = vmul.f32 1.7580993, %v1952_v29  ;;  %v1953_v35 = vadd.f32 -1.0, %v2409_v31 }
 0x3ac   : > { %v1191_v37 = vmul.f32 1.7580993, %v1950_v32  ;;  %v1951_v38 = vadd.f32 -1.0, %v2411_v33 }
 0x3ad   : > { %v1194_v41 = vmul.f32 1.7580993, %v1953_v35  ;;  %v1201_v45 = vsel %vm1153_vm4, %v1161_v36, %v1193_v34  ;;  %v2348_v34 = vld [vmem:[%s3212_s13 + $0x24] ss:$8 sps:$4 sm:$0xff]   ;;  %v2346_v35 = vld [vmem:[%s3212_s13 + $0x20] ss:$8 sps:$4 sm:$0xff]  }
 0x3ae   : > { %v1192_v44 = vmul.f32 1.7580993, %v1951_v38  ;;  %v1199_v47 = vsel %vm1151_vm6, %v1159_v39, %v1191_v37  ;;  %v2351_v36 = vld [vmem:[%s3212_s13 + $0x34] ss:$8 sps:$4 sm:$0xff]   ;;  %v2349_v37 = vld [vmem:[%s3212_s13 + $0x30] ss:$8 sps:$4 sm:$0xff]  }
 0x3af   : > { %v1202_v46 = vsel %vm1154_vm5, %v1162_v40, %v1194_v41  ;;  %v2354_v38 = vld [vmem:[%s3212_s13 + $0x44] ss:$8 sps:$4 sm:$0xff]   ;;  %v2352_v39 = vld [vmem:[%s3212_s13 + $0x40] ss:$8 sps:$4 sm:$0xff]   ;;  %v2357_v40 = vld [vmem:[%s3212_s13 + $0x54] ss:$8 sps:$4 sm:$0xff]  }
 0x3b0   : > { %v1206_v48 = vpack.c.bf16 %v1202_v46, %v1201_v45  ;;  %v1200_v49 = vsel %vm1152_vm7, %v1160_v43, %v1192_v44  ;;  %v2355_v41 = vld [vmem:[%s3212_s13 + $0x50] ss:$8 sps:$4 sm:$0xff]   ;;  %v2360_v43 = vld [vmem:[%s3212_s13 + $0x64] ss:$8 sps:$4 sm:$0xff]   ;;  %v2358_v44 = vld [vmem:[%s3212_s13 + $0x60] ss:$8 sps:$4 sm:$0xff]  }
 0x3b1   : > { %v1205_v50 = vpack.c.bf16 %v1200_v49, %v1199_v47  ;;  %v2363_v45 = vld [vmem:[%s3212_s13 + $0x74] ss:$8 sps:$4 sm:$0xff]   ;;  %v2361_v46 = vld [vmem:[%s3212_s13 + $0x70] ss:$8 sps:$4 sm:$0xff]   ;;  %v2660_v47 = vmov 0  }
 0x3b3   : > { %2147 = vmatprep.mubr.msk.bf16.mxu1 %vm1247_vm8, %v1205_v50 }
 0x3b4   : > { %2148 = vmatmul.mubr.msk.bf16.vlgmr.msra.gmra.mrb[8].mxu1 %vm1247_vm8, %v1206_v48  ;;  %v1971_v48 = vld [vmem:[%s3214_s11] ss:$0 sm:$0xff] }
 0x3b5   : > { %2152 = vmatpush3.bf16.msra.mxu1 %v3032_v42  ;;  %2159 = vmatprep.mubr.msk.bf16.mxu1 %vm1247_vm8, %v1203_v30  ;;  %v2337_v42 = vld [vmem:[#allocation11 + $0x28] sm:$0xff]  }
 0x3b6   : > { %2153 = vmatprep.subr.bf16.mxu1 %v2329_v51  ;;  %2173 = vmatprep.subr.bf16.mxu0 %v2337_v42 }
 0x3b7   : > { %2174 = vmatpush3.bf16.msra.mxu0 %v2337_v42 }
 0x3b8   : > { %2175 = vmatprep.subr.bf16.mxu0 %v2338_v57 }
 0x3b9   : > { %2154 = vmatpush3.bf16.msra.mxu1 %v2329_v51 }
 0x3ba   : > { %2155 = vmatprep.subr.bf16.mxu1 %v2330_v52 }
 0x3bb   : > { %2176 = vmatpush3.bf16.msra.mxu0 %v2338_v57 }
 0x3bc   : > { %2177 = vmatprep.subr.bf16.mxu0 %v2339_v58 }
 0x3bd   : > { %2156 = vmatpush3.bf16.msra.mxu1 %v2330_v52 }
 0x3be   : > { %2157 = vmatprep.subr.bf16.mxu1 %v2331_v53 }
 0x3bf   : > { %2178 = vmatpush3.bf16.msra.mxu0 %v2339_v58 }
 0x3c1   : > { %2158 = vmatpush3.bf16.msra.mxu1 %v2331_v53 }
 0x3c2   : > { %1681 = vmatprep.subr.bf16.mxu1 %v2342_v60 }
 0x3c4   : > { %2160 = vmatmul.mubr.msk.bf16.vlgmr.msra.gmra.mrb[8].mxu1 %vm1247_vm8, %v1204_v26 }
 0x3c5   : > { %1682 = vmatpush1.bf16.msra.mxu1 %v2340_v59  ;;  %1713 = vmatprep.mubr.bf16.mxu1 %v2660_v47 }
 0x3c6   : > { %1683 = vmatprep.subr.bf16.mxu1 %v2345_v61 }
 0x3c9   : > { %1684 = vmatpush1.bf16.msra.mxu1 %v2343_v62 }
 0x3ca   : > { %1685 = vmatprep.subr.bf16.mxu1 %v2348_v34 }
 0x3cd   : > { %1686 = vmatpush1.bf16.msra.mxu1 %v2346_v35 }
 0x3ce   : > { %1687 = vmatprep.subr.bf16.mxu1 %v2351_v36 }
 0x3d1   : > { %1688 = vmatpush1.bf16.msra.mxu1 %v2349_v37 }
 0x3d2   : > { %1689 = vmatprep.subr.bf16.mxu1 %v2354_v38 }
 0x3d5   : > { %1690 = vmatpush1.bf16.msra.mxu1 %v2352_v39 }
 0x3d6   : > { %1691 = vmatprep.subr.bf16.mxu1 %v2357_v40 }
 0x3d9   : > { %1692 = vmatpush1.bf16.msra.mxu1 %v2355_v41 }
 0x3da   : > { %1693 = vmatprep.subr.bf16.mxu1 %v2360_v43 }
 0x3dd   : > { %1694 = vmatpush1.bf16.msra.mxu1 %v2358_v44 }
 0x3de   : > { %1695 = vmatprep.subr.bf16.mxu1 %v2363_v45 }
 0x3e1   : > { %1696 = vmatpush1.bf16.msra.mxu1 %v2361_v46 }
 0x497   : > { %v2161_v0 = vpop.f32.mrb[8].mxu1 }
 0x498   : > { %v1391_v1 = vadd.f32 %v2161_v0, %v1966_v63  ;;  %v1367_v2 = vpop.f32.mrb[9].mxu1 }
 0x499   : > { %v1389_v3 = vadd.f32 %v1966_v63, %v1367_v2  ;;  %v2162_v4 = vpop.f32.mrb[10].mxu1 }
 0x49a   : > { %v1405_v5 = vmul.f32 1.442695, %v1391_v1  ;;  %v1392_v6 = vadd.f32 %v2162_v4, %v1966_v63  ;;  %v1370_v7 = vpop.f32.mrb[11].mxu1  ;;  %v1399_v20 = vmul.f32 1.050701, %v1391_v1  ;;  %vm1395_vm9 = vcmp.gt.f32.partialorder %v1391_v1, 0.0 }
 0x49b   : > { %v1401_v8 = vmul.f32 1.442695, %v1389_v3  ;;  %v1390_v9 = vadd.f32 %v1966_v63, %v1370_v7  ;;  %v1397_v23 = vmul.f32 1.050701, %v1389_v3  ;;  %vm1393_vm11 = vcmp.gt.f32.partialorder %v1389_v3, 0.0 }
 0x49c   : > { %2412 = vpow2.f32 %v1405_v5  ;;  %v1407_v10 = vmul.f32 1.442695, %v1392_v6  ;;  %v1400_v24 = vmul.f32 1.050701, %v1392_v6  ;;  %vm1396_vm10 = vcmp.gt.f32.partialorder %v1392_v6, 0.0 }
 0x49d   : > { %2414 = vpow2.f32 %v1401_v8  ;;  %v1403_v11 = vmul.f32 1.442695, %v1390_v9  ;;  %v1398_v26 = vmul.f32 1.050701, %v1390_v9  ;;  %vm1394_vm12 = vcmp.gt.f32.partialorder %v1390_v9, 0.0 }
 0x49e   : > { %2416 = vpow2.f32 %v1407_v10 }
 0x49f   : > { %2418 = vpow2.f32 %v1403_v11 }
 0x4a6   : > { %v2413_v12 = vpop.eup %2412 }
 0x4a7   : > { %v2415_v13 = vpop.eup %2414  ;;  %v1969_v14 = vadd.f32 -1.0, %v2413_v12 }
 0x4a8   : > { %v2417_v15 = vpop.eup %2416  ;;  %v1967_v16 = vadd.f32 -1.0, %v2415_v13 }
 0x4a9   : > { %v2419_v17 = vpop.eup %2418  ;;  %v1415_v18 = vmul.f32 1.7580993, %v1969_v14  ;;  %v1970_v19 = vadd.f32 -1.0, %v2417_v15 }
 0x4aa   : > { %v1413_v21 = vmul.f32 1.7580993, %v1967_v16  ;;  %v1968_v22 = vadd.f32 -1.0, %v2419_v17 }
 0x4ab   : > { %v1416_v25 = vmul.f32 1.7580993, %v1970_v19  ;;  %v1419_v28 = vsel %vm1395_vm9, %v1399_v20, %v1415_v18  ;;  %v1591_v18 = vlaneseq }
 0x4ac   : > { %v1414_v27 = vmul.f32 1.7580993, %v1968_v22  ;;  %v1417_v31 = vsel %vm1393_vm11, %v1397_v23, %v1413_v21  ;;  %v1589_v21 = vld [vmem:[%s3215_s19] sm:$0x3] }
 0x4ad   : > { %v1420_v29 = vsel %vm1396_vm10, %v1400_v24, %v1416_v25  ;;  %v1592_v19 = vshrl.u32 %v1591_v18, 7 }
 0x4ae   : > { %v1422_v30 = vpack.c.bf16 %v1420_v29, %v1419_v28  ;;  %v1418_v32 = vsel %vm1394_vm12, %v1398_v26, %v1414_v27 }
 0x4af   : > { %v1421_v33 = vpack.c.bf16 %v1418_v32, %v1417_v31  ;;  %v1593_v20 = vsub.s32 0, %v1592_v19  ;;  %v1597_v22 = vsub.s32 1, %v1592_v19 }
 0x4b1   : > { %2179 = vmatprep.mubr.bf16.mxu0 %v1421_v33  ;;  %v1594_v23 = vrot.slane %v1589_v21, %v1593_v20  ;;  %v1598_v24 = vrot.slane %v1589_v21, %v1597_v22 }
 0x4b2   : > { %2180 = vmatmul.mubr.bf16.vlgmr.msra.gmra.mrb[16].mxu0 %v1422_v30 }
 0x585   : > { %v2181_v49 = vpop.f32.mrb[16].mxu0 }
 0x586   : > { %v1537_v50 = vadd.f32 %v2181_v49, %v1971_v48  ;;  %v1528_v51 = vpop.f32.mrb[17].mxu0 }
 0x587   : > { %v1529_v52 = vadd.f32 %v1971_v48, %v1528_v51  ;;  %v2182_v53 = vpop.f32.mrb[18].mxu0 }
 0x588   : > { %v1555_v54 = vmul.f32 1.442695, %v1537_v50  ;;  %v1540_v55 = vadd.f32 %v2182_v53, %v1971_v48  ;;  %v1531_v56 = vpop.f32.mrb[19].mxu0  ;;  %v1549_v4 = vmul.f32 1.050701, %v1537_v50  ;;  %vm1545_vm13 = vcmp.gt.f32.partialorder %v1537_v50, 0.0 }
 0x589   : > { %v1551_v42 = vmul.f32 1.442695, %v1529_v52  ;;  %v1532_v57 = vadd.f32 %v1971_v48, %v1531_v56  ;;  %v1547_v7 = vmul.f32 1.050701, %v1529_v52  ;;  %vm1543_vm15 = vcmp.gt.f32.partialorder %v1529_v52, 0.0 }
 0x58a   : > { %2420 = vpow2.f32 %v1555_v54  ;;  %v1557_v58 = vmul.f32 1.442695, %v1540_v55  ;;  %v1550_v8 = vmul.f32 1.050701, %v1540_v55  ;;  %vm1546_vm14 = vcmp.gt.f32.partialorder %v1540_v55, 0.0 }
 0x58b   : > { %2422 = vpow2.f32 %v1551_v42  ;;  %v1553_v59 = vmul.f32 1.442695, %v1532_v57  ;;  %v1548_v10 = vmul.f32 1.050701, %v1532_v57  ;;  %vm1544_vm0 = vcmp.gt.f32.partialorder %v1532_v57, 0.0 }
 0x58c   : > { %2424 = vpow2.f32 %v1557_v58 }
 0x58d   : > { %2426 = vpow2.f32 %v1553_v59 }
 0x594   : > { %v2421_v60 = vpop.eup %2420 }
 0x595   : > { %v2423_v61 = vpop.eup %2422  ;;  %v1982_v62 = vadd.f32 -1.0, %v2421_v60 }
 0x596   : > { %v2425_v63 = vpop.eup %2424  ;;  %v1980_v0 = vadd.f32 -1.0, %v2423_v61 }
 0x597   : > { %v2427_v1 = vpop.eup %2426  ;;  %v1565_v2 = vmul.f32 1.7580993, %v1982_v62  ;;  %v1983_v3 = vadd.f32 -1.0, %v2425_v63 }
 0x598   : > { %v1563_v5 = vmul.f32 1.7580993, %v1980_v0  ;;  %v1981_v6 = vadd.f32 -1.0, %v2427_v1 }
 0x599   : > { %v1566_v9 = vmul.f32 1.7580993, %v1983_v3  ;;  %v1569_v12 = vsel %vm1545_vm13, %v1549_v4, %v1565_v2 }
 0x59a   : > { %v1564_v11 = vmul.f32 1.7580993, %v1981_v6  ;;  %v1567_v14 = vsel %vm1543_vm15, %v1547_v7, %v1563_v5 }
 0x59b   : > { %v1570_v13 = vsel %vm1546_vm14, %v1550_v8, %v1566_v9 }
 0x59c   : > { %v1568_v15 = vsel %vm1544_vm0, %v1548_v10, %v1564_v11  ;;  %v1572_v16 = vpack.c.bf16 %v1570_v13, %v1569_v12 }
 0x59d   : > { %v1571_v17 = vpack.c.bf16 %v1568_v15, %v1567_v14 }
 0x59f   : > { %1714 = vmatmul.mubr.bf16.vlgmr.msra.gmra.mrb[12].mxu1 %v1571_v17 }
 0x5a0   : > { %1723 = vmatprep.mubr.bf16.mxu1 %v2660_v47 }
 0x5a7   : > { %1724 = vmatmul.mubr.bf16.gmra.mrb[16].mxu1 %v1572_v16 }
 0x672   : > { %v1715_v25 = vpop.f32.mrb[12].mxu1 }
 0x673   : > { %v1716_v26 = vadd.f32 %v1715_v25, %v1594_v23  ;;  %v1717_v27 = vpop.f32.mrb[13].mxu1 }
 0x674   : > { %v1718_v28 = vadd.f32 %v1717_v27, %v1598_v24  ;;  %v1719_v29 = vpop.f32.mrb[14].mxu1 }
 0x675   : > { %1734 = vst [vmem:[%s583_s29] sm:$0xff] %v1716_v26  ;;  %v1720_v30 = vadd.f32 %v1719_v29, %v1594_v23  ;;  %v1721_v31 = vpop.f32.mrb[15].mxu1 }
 0x676   : > { %1735 = vst [vmem:[%s583_s29 + $0x8] sm:$0xff] %v1718_v28  ;;  %v1722_v32 = vadd.f32 %v1721_v31, %v1598_v24 }
 0x677   : > { %1736 = vst [vmem:[%s583_s29 + $0x10] sm:$0xff] %v1720_v30 }
 0x678   : > { %1737 = vst [vmem:[%s583_s29 + $0x18] sm:$0xff] %v1722_v32 }
 0x67a   : > { %v1725_v33 = vpop.f32.mrb[16].mxu1 }
 0x67b   : > { %v1726_v34 = vadd.f32 %v1725_v33, %v1594_v23  ;;  %v1727_v35 = vpop.f32.mrb[17].mxu1 }
 0x67c   : > { %v1728_v36 = vadd.f32 %v1727_v35, %v1598_v24  ;;  %v1729_v37 = vpop.f32.mrb[18].mxu1 }
 0x67d   : > { %1738 = vst [vmem:[%s583_s29 + $0x20] sm:$0xff] %v1726_v34  ;;  %v1730_v38 = vadd.f32 %v1729_v37, %v1594_v23  ;;  %v1731_v39 = vpop.f32.mrb[19].mxu1 }
 0x67e   : > { %1739 = vst [vmem:[%s583_s29 + $0x28] sm:$0xff] %v1728_v36  ;;  %v1732_v40 = vadd.f32 %v1731_v39, %v1598_v24 }
 0x67f   : > { %1740 = vst [vmem:[%s583_s29 + $0x30] sm:$0xff] %v1730_v38 }
 0x680   : > { %1741 = vst [vmem:[%s583_s29 + $0x38] sm:$0xff] %v1732_v40 }
 0x681   : > { %2581 = shalt.err (!%p2578_p6)
}
 0x682   : > { %s2582_s4 = scalar_lea.hbm %s3108_s23, 1024  ;;  %s2586_s21 = scalar_lea.hbm %s3217_s14, 2048 }
 0x683   : > { %p2583_p11 = scmp.ne.s32.totalorder %s3108_s23, %s2582_s4  ;;  %p2587_p0 = scmp.lt.u32.totalorder %s3108_s23, %s3217_s14 }
 0x684   : > { %p2588_p7 = scmp.lt.u32.totalorder %s2586_s21, %s2582_s4  ;;  %p2590_p10 = scmp.lt.u32.totalorder %s2582_s4, %s3108_s23 }
 0x685   : > { %p2584_p12 = pnand %p2583_p11, %p3218_p9 }
 0x686   : > { %p2589_p8 = por %p2588_p7, %p2587_p0 }
 0x687   : > { %p2585_p13 = pneg %p2584_p12 }
 0x688   : > { %p2591_p1 = por %p2590_p10, %p2589_p8 }
 0x68a   : > { %p2592_p3 = pnand %p2591_p1, %p2585_p13 }
 0x68c   : > { %2595 = shalt.err (!%p2592_p3)
}
 0x68d   : > { %s2662_s29 = smov 256   ;;  %s2663_s12 = smov 16  }
 0x68e   : > { %2216 = dma.vmem_to_hbm [thread:$0]  (%p3218_p9), %s3103_s6, 1024, %s3108_s23, %s1743_s17, %s2662_s29, %s2662_s29, %s2663_s12  }
 0x68f PF: > { %s3219_s1 = sld [smem:[#allocation22_spill]]  ;;  %s3220_s9 = sld [smem:[#allocation26_spill]] }
 0x695   : > { %s1772_s24 = sand.u32 1, %s3219_s1   ;;  %p3221_p2 = scmp.ne.s32.totalorder %s3220_s9, 0 }
 0x696   : > { %s1773_s27 = scalar_lea.sflag [#allocation4], %s1772_s24 }
 0x697   : > { %p2235_p5 = pnand %p1885_p4, %p3221_p2 }
 0x699   : > { %2629 = dma.done.wait (!%p2235_p5), %s1773_s27, 1024  }
 0x69a   : > { %2631 = vsyncadd (!%p2235_p5), %s1773_s27, 4294966272  ;;  %s3222_s16 = sld [smem:[#allocation23_spill]]  ;;  %s3223_s28 = sld [smem:[#allocation24_spill]] }
 0x69b   : > { %s3224_s29 = smov %s2638_s30  ;;  %s3225_s30 = smov %s2642_s15 }
 0x6a0   : > { %p30_p6 = scmp.ge.s32.totalorder %s3222_s16, 4   ;;  %s3226_s15 = smov %s3223_s28 }
 0x6a2   :  { %32 = sbr.rel (!%p30_p6) target bundleno = 17 (0x11), region = 146 }
 0x6a9   :  { %1778 = vsyncpa [#allocation3], 1 }
 0x6aa   :  { %1780 = vsyncpa [#allocation3 + $0x1], 1 }
 0x6ab   :  { %1781 = vsyncpa [#allocation6], 1 }
 0x6ac   :  { %1782 = vsyncpa [#allocation9], 1 }
 0x6ad   :  { %1783 = vsyncpa [#allocation12], 1 }
 0x6ae   :  { %1784 = vsyncpa [#allocation4], 1 }
 0x6af   :  { %1786 = vsyncpa [#allocation4 + $0x1], 1 }

</bundles_post_ra>
